<compile_context>
chip_gen: v5e
topology: v5e:2x2
jax: 0.10.0
libtpu: 0.0.40
codegen_flags: <defaults>
</compile_context>

<pallas_src>
import math

import jax
import jax.numpy as jnp
from jax.experimental import pallas as pl
from jax.experimental.pallas import tpu as pltpu

# ----------------------------- config ---------------------------------------
B = 2            # batch
S = 8            # sequence length
H = 32           # hidden size
F = 64           # FFN intermediate size
NH = 2           # attention heads
HD = H // NH     # head dim
NUM_LAYERS = 4   # -> 5 hidden states (embeddings + 4 layers); last 4 averaged
VOCAB = 100
MAX_POS = 64
LN_EPS = 1e-7    # DeBERTa layer-norm eps
BS = B * S       # flattened rows fed to the MXU

EMB_ROW = 3 * NUM_LAYERS   # row of the packed vec block holding emb-LN params
VEC_ROWS = 16              # 3 rows/layer * 4 layers + 1 emb row, padded to 16
BF16 = jnp.bfloat16


# ----------------------------- kernel helpers -------------------------------
def _layernorm(x, g, b):
    mu = jnp.mean(x, axis=-1, keepdims=True)
    var = jnp.mean((x - mu) ** 2, axis=-1, keepdims=True)
    return (x - mu) * jax.lax.rsqrt(var + LN_EPS) * g + b


# ----------------------------- fused Pallas kernel ---------------------------
def encoder_kernel(emb_ref, mask_ref, vec_ref, wa_ref, wf_ref, o_ref):
    # activations live as (B*S, H) f32; mask is (B*S, B*S) additive
    x = emb_ref[...]
    mask = mask_ref[...]

    # embedding layernorm  (hidden_states[0])
    emb_g = vec_ref[EMB_ROW:EMB_ROW + 1, 0:H]
    emb_b = vec_ref[EMB_ROW:EMB_ROW + 1, H:2 * H]
    h = _layernorm(x, emb_g, emb_b)

    acc = jnp.zeros((BS, H), jnp.float32)   # running sum of last-4 hidden states

    for l in range(NUM_LAYERS):             # static unroll; l is a Python int
        r = 3 * l
        bqkv = vec_ref[r:r + 1, 0:3 * H]
        bo = vec_ref[r:r + 1, 3 * H:4 * H]
        ln1_g = vec_ref[r + 1:r + 2, 0:H]
        ln1_b = vec_ref[r + 1:r + 2, H:2 * H]
        b1 = vec_ref[r + 1:r + 2, 2 * H:2 * H + F]
        b2 = vec_ref[r + 2:r + 3, 0:H]
        ln2_g = vec_ref[r + 2:r + 3, H:2 * H]
        ln2_b = vec_ref[r + 2:r + 3, 2 * H:3 * H]

        # ---- fused QKV projection: one (BS,H)x(H,3H) bf16 MXU push ----
        # (1/sqrt(HD) attention scale already folded into the Q columns)
        qkv = jnp.dot(h.astype(BF16), wa_ref[l, :, 0:3 * H],
                      preferred_element_type=jnp.float32) + bqkv
        qkv_b = qkv.astype(BF16)

        # ---- per-head attention over the flattened batch*seq rows ----
        # batch separation + key padding handled by the additive block-diagonal
        # mask; per-head Wo slices are accumulated directly (no ctx scratch).
        attn = jnp.zeros((BS, H), jnp.float32)
        for hh in range(NH):                # static unroll over heads
            qh = qkv_b[:, hh * HD:(hh + 1) * HD]                 # (BS, HD)
            kh = qkv_b[:, H + hh * HD:H + (hh + 1) * HD]         # (BS, HD)
            vh = qkv_b[:, 2 * H + hh * HD:2 * H + (hh + 1) * HD]
            # contract on the head dim of both operands -> no kh.T relayout
            s = jax.lax.dot_general(qh, kh, (((1,), (1,)), ((), ())),
                                    preferred_element_type=jnp.float32) + mask
            s = s - jnp.max(s, axis=-1, keepdims=True)
            p = jnp.exp(s)
            p = p * pl.reciprocal(jnp.sum(p, axis=-1, keepdims=True), approx=True)
            ctx = jnp.dot(p.astype(BF16), vh,
                          preferred_element_type=jnp.float32)    # (BS, HD)
            attn = attn + jnp.dot(
                ctx.astype(BF16),
                wa_ref[l, hh * HD:(hh + 1) * HD, 3 * H:4 * H],   # Wo head slice
                preferred_element_type=jnp.float32)
        attn = attn + bo
        h1 = _layernorm(h + attn, ln1_g, ln1_b)

        # ---- FFN (W2 stored transposed -> second matmul also avoids .T) ----
        ff = jnp.dot(h1.astype(BF16), wf_ref[l, :, 0:F],
                     preferred_element_type=jnp.float32) + b1
        ff = jax.nn.gelu(ff)                                     # f32 elementwise
        ff2 = jax.lax.dot_general(ff.astype(BF16), wf_ref[l, :, F:2 * F],
                                  (((1,), (1,)), ((), ())),
                                  preferred_element_type=jnp.float32) + b2
        h = _layernorm(h1 + ff2, ln2_g, ln2_b)

        # hidden_states[-4:] == outputs of the last 4 layers
        if l >= NUM_LAYERS - 4:
            acc = acc + h

    # mean over the stacked last-4 hidden states; dropout(p=0.0) is identity
    o_ref[...] = acc * 0.25


# ----------------------------- pallas_call wrapper ---------------------------
_VMEM_SPEC = pl.BlockSpec(memory_space=pltpu.MemorySpace.VMEM)


def encoder_pallas(emb2d, mask_add, packed):
    return pl.pallas_call(
        encoder_kernel,
        out_shape=jax.ShapeDtypeStruct((BS, H), jnp.float32),
        in_specs=[_VMEM_SPEC] * 5,
        out_specs=_VMEM_SPEC,
    )(emb2d, mask_add, packed["vec"], packed["wa"], packed["wf"])


# ----------------------------- parameters ------------------------------------
def init_params(key):
    def normal(k, shape, scale=0.02):
        return scale * jax.random.normal(k, shape, dtype=jnp.float32)

    keys = jax.random.split(key, 16)
    L = NUM_LAYERS
    inv_scale = 1.0 / math.sqrt(HD)
    # attention scale folded into the Q projection (weights AND bias)
    wq = normal(keys[3], (L, H, H)) * inv_scale
    bq = normal(keys[6], (L, H), 0.01) * inv_scale
    bk = normal(keys[7], (L, H), 0.01)
    bv = normal(keys[8], (L, H), 0.01)
    raw = {
        "word_emb": normal(keys[0], (VOCAB, H)),
        "pos_emb": normal(keys[1], (MAX_POS, H)),
        "type_emb": normal(keys[2], (2, H)),
        "emb_ln_g": jnp.ones((H,), jnp.float32),
        "emb_ln_b": jnp.zeros((H,), jnp.float32),
        "wq": wq,
        "wk": normal(keys[4], (L, H, H)),
        "wv": normal(keys[5], (L, H, H)),
        "bqkv": jnp.concatenate([bq, bk, bv], axis=-1),      # (L, 3H)
        "wo": normal(keys[9], (L, H, H)),
        "bo": normal(keys[10], (L, H), 0.01),
        "ln1_g": jnp.ones((L, H), jnp.float32),
        "ln1_b": jnp.zeros((L, H), jnp.float32),
        "w1": normal(keys[11], (L, H, F)),
        "b1": normal(keys[12], (L, F), 0.01),
        "w2": normal(keys[13], (L, F, H)),
        "b2": normal(keys[14], (L, H), 0.01),
        "ln2_g": jnp.ones((L, H), jnp.float32),
        "ln2_b": jnp.zeros((L, H), jnp.float32),
    }
    return raw


def pack_params(raw):
    """Pack per-layer weights into 2 bf16 lane-dense matmul blocks + 1 f32 vec block."""
    L = NUM_LAYERS
    wqkv = jnp.concatenate([raw["wq"], raw["wk"], raw["wv"]], axis=-1)    # (L,H,3H)
    wa = jnp.concatenate([wqkv, raw["wo"]], axis=-1).astype(BF16)         # (L,H,4H)
    w2t = jnp.transpose(raw["w2"], (0, 2, 1))                             # (L,H,F)
    wf = jnp.concatenate([raw["w1"], w2t], axis=-1).astype(BF16)          # (L,H,2F)

    vec = jnp.zeros((VEC_ROWS, 128), jnp.float32)
    for l in range(L):
        r = 3 * l
        vec = vec.at[r, 0:3 * H].set(raw["bqkv"][l])
        vec = vec.at[r, 3 * H:4 * H].set(raw["bo"][l])
        vec = vec.at[r + 1, 0:H].set(raw["ln1_g"][l])
        vec = vec.at[r + 1, H:2 * H].set(raw["ln1_b"][l])
        vec = vec.at[r + 1, 2 * H:2 * H + F].set(raw["b1"][l])
        vec = vec.at[r + 2, 0:H].set(raw["b2"][l])
        vec = vec.at[r + 2, H:2 * H].set(raw["ln2_g"][l])
        vec = vec.at[r + 2, 2 * H:3 * H].set(raw["ln2_b"][l])
    vec = vec.at[EMB_ROW, 0:H].set(raw["emb_ln_g"])
    vec = vec.at[EMB_ROW, H:2 * H].set(raw["emb_ln_b"])
    return {"wa": wa, "wf": wf, "vec": vec}


# ----------------------------- forward (Pallas) -------------------------------
def encoder_forward(raw, packed, input_ids, attention_mask, token_type_ids):
    # embeddings (gathers are plain-JAX glue outside the kernel)
    we = raw["word_emb"][input_ids]                          # (B, S, H)
    pe = raw["pos_emb"][jnp.arange(S)][None, :, :]           # (1, S, H)
    te = raw["type_emb"][token_type_ids]                     # (B, S, H)
    emb2d = (we + pe + te).reshape(BS, H)

    # additive attention mask over flattened rows:
    #   0 where (same batch AND key not padded), -1e9 otherwise
    key_keep = attention_mask.astype(jnp.float32).reshape(BS)
    batch_id = jnp.repeat(jnp.arange(B), S)
    keep = (batch_id[:, None] == batch_id[None, :]) & (key_keep[None, :] > 0.5)
    mask_add = jnp.where(keep, 0.0, -1e9).astype(jnp.float32)   # (BS, BS)

    out2d = encoder_pallas(emb2d, mask_add, packed)
    return out2d.reshape(B, S, H)


# ----------------------------- pure-JAX reference (f32) -----------------------
def encoder_reference(raw, input_ids, attention_mask, token_type_ids):
    we = raw["word_emb"][input_ids]
    pe = raw["pos_emb"][jnp.arange(S)][None, :, :]
    te = raw["type_emb"][token_type_ids]
    h = _layernorm(we + pe + te, raw["emb_ln_g"], raw["emb_ln_b"])   # (B,S,H)
    add = jnp.where(attention_mask[:, None, None, :] > 0, 0.0, -1e9)  # (B,1,1,S)

    hidden = []
    for l in range(NUM_LAYERS):
        q = h @ raw["wq"][l] + raw["bqkv"][l][:H]
        k = h @ raw["wk"][l] + raw["bqkv"][l][H:2 * H]
        v = h @ raw["wv"][l] + raw["bqkv"][l][2 * H:]
        qh = q.reshape(B, S, NH, HD).transpose(0, 2, 1, 3)
        kh = k.reshape(B, S, NH, HD).transpose(0, 2, 1, 3)
        vh = v.reshape(B, S, NH, HD).transpose(0, 2, 1, 3)
        s = jnp.einsum("bhqd,bhkd->bhqk", qh, kh) + add   # scale folded into Wq/bq
        p = jax.nn.softmax(s, axis=-1)
        ctx = jnp.einsum("bhqk,bhkd->bhqd", p, vh).transpose(0, 2, 1, 3).reshape(B, S, H)
        attn = ctx @ raw["wo"][l] + raw["bo"][l]
        h1 = _layernorm(h + attn, raw["ln1_g"][l], raw["ln1_b"][l])
        ff = jax.nn.gelu(h1 @ raw["w1"][l] + raw["b1"][l])
        ff = ff @ raw["w2"][l] + raw["b2"][l]
        h = _layernorm(h1 + ff, raw["ln2_g"][l], raw["ln2_b"][l])
        hidden.append(h)
    return jnp.mean(jnp.stack(hidden[-4:]), axis=0)


# ----------------------------- main -------------------------------------------
if __name__ == "__main__":
    key = jax.random.PRNGKey(0)
    pkey, ikey = jax.random.split(key)
    raw = init_params(pkey)
    packed = pack_params(raw)

    input_ids = jax.random.randint(ikey, (B, S), 0, VOCAB, dtype=jnp.int32)
    attention_mask = jnp.array([[1] * S, [1] * (S - 2) + [0, 0]], dtype=jnp.int32)
    token_type_ids = jnp.zeros((B, S), dtype=jnp.int32)

    fwd = jax.jit(encoder_forward)
    out = fwd(raw, packed, input_ids, attention_mask, token_type_ids)
    out = jax.block_until_ready(out)

    assert out.shape == (B, S, H), out.shape
    assert out.dtype == jnp.float32
    assert bool(jnp.all(jnp.isfinite(out)))

    # loose-tolerance check vs pure-JAX f32 reference (kernel uses bf16 matmul
    # operands + approx reciprocal in softmax, so exact bit-match is not expected)
    ref = encoder_reference(raw, input_ids, attention_mask, token_type_ids)
    max_err = float(jnp.max(jnp.abs(out - ref)))
    assert max_err < 0.1, f"max abs error vs reference too large: {max_err}"

    print("KERNEL_OK")
</pallas_src>

<mosaic_0001>
module attributes {stable_mosaic.version = 11 : i64} {
  func.func @encoder_kernel(%arg0: memref<16x32xf32, #tpu.memory_space<vmem>>, %arg1: memref<16x16xf32, #tpu.memory_space<vmem>>, %arg2: memref<16x128xf32, #tpu.memory_space<vmem>>, %arg3: memref<4x32x128xbf16, #tpu.memory_space<vmem>>, %arg4: memref<4x32x128xbf16, #tpu.memory_space<vmem>>, %arg5: memref<16x32xf32, #tpu.memory_space<vmem>>) attributes {dimension_semantics = [], scalar_prefetch = 0 : i64, scratch_operands = 0 : i64, tpu.core_type = #tpu.core_type<tc>} {
    %c0 = arith.constant 0 : index
    %c0_0 = arith.constant 0 : index
    %0 = vector.load %arg0[%c0, %c0_0] : memref<16x32xf32, #tpu.memory_space<vmem>>, vector<16x32xf32>
    %c0_1 = arith.constant 0 : index
    %c0_2 = arith.constant 0 : index
    %1 = vector.load %arg1[%c0_1, %c0_2] : memref<16x16xf32, #tpu.memory_space<vmem>>, vector<16x16xf32>
    %c12 = arith.constant 12 : index
    %c0_3 = arith.constant 0 : index
    %2 = vector.load %arg2[%c12, %c0_3] : memref<16x128xf32, #tpu.memory_space<vmem>>, vector<1x32xf32>
    %c12_4 = arith.constant 12 : index
    %c32 = arith.constant 32 : index
    %3 = vector.load %arg2[%c12_4, %c32] : memref<16x128xf32, #tpu.memory_space<vmem>>, vector<1x32xf32>
    %cst = arith.constant dense<0.000000e+00> : vector<16xf32>
    %4 = vector.multi_reduction <add>, %0, %cst [1] : vector<16x32xf32> to vector<16xf32>
    %5 = vector.shape_cast %4 : vector<16xf32> to vector<16x1xf32>
    %cst_5 = arith.constant 3.200000e+01 : f32
    %6 = vector.broadcast %cst_5 : f32 to vector<16x1xf32>
    %7 = arith.divf %5, %6 : vector<16x1xf32>
    %8 = vector.broadcast %7 : vector<16x1xf32> to vector<16x32xf32>
    %9 = arith.subf %0, %8 : vector<16x32xf32>
    %10 = arith.mulf %9, %9 : vector<16x32xf32>
    %cst_6 = arith.constant dense<0.000000e+00> : vector<16xf32>
    %11 = vector.multi_reduction <add>, %10, %cst_6 [1] : vector<16x32xf32> to vector<16xf32>
    %12 = vector.shape_cast %11 : vector<16xf32> to vector<16x1xf32>
    %cst_7 = arith.constant 3.200000e+01 : f32
    %13 = vector.broadcast %cst_7 : f32 to vector<16x1xf32>
    %14 = arith.divf %12, %13 : vector<16x1xf32>
    %15 = vector.broadcast %7 : vector<16x1xf32> to vector<16x32xf32>
    %16 = arith.subf %0, %15 : vector<16x32xf32>
    %cst_8 = arith.constant 1.000000e-07 : f32
    %17 = vector.broadcast %cst_8 : f32 to vector<16x1xf32>
    %18 = arith.addf %14, %17 : vector<16x1xf32>
    %19 = math.rsqrt %18 : vector<16x1xf32>
    %20 = vector.broadcast %19 : vector<16x1xf32> to vector<16x32xf32>
    %21 = arith.mulf %16, %20 : vector<16x32xf32>
    %22 = vector.broadcast %2 : vector<1x32xf32> to vector<16x32xf32>
    %23 = arith.mulf %21, %22 : vector<16x32xf32>
    %24 = vector.broadcast %3 : vector<1x32xf32> to vector<16x32xf32>
    %25 = arith.addf %23, %24 : vector<16x32xf32>
    %cst_9 = arith.constant 0.000000e+00 : f32
    %26 = vector.broadcast %cst_9 : f32 to vector<16x32xf32>
    %c0_10 = arith.constant 0 : index
    %c0_11 = arith.constant 0 : index
    %27 = vector.load %arg2[%c0_10, %c0_11] : memref<16x128xf32, #tpu.memory_space<vmem>>, vector<1x96xf32>
    %c0_12 = arith.constant 0 : index
    %c96 = arith.constant 96 : index
    %28 = vector.load %arg2[%c0_12, %c96] : memref<16x128xf32, #tpu.memory_space<vmem>>, vector<1x32xf32>
    %c1 = arith.constant 1 : index
    %c0_13 = arith.constant 0 : index
    %29 = vector.load %arg2[%c1, %c0_13] : memref<16x128xf32, #tpu.memory_space<vmem>>, vector<1x32xf32>
    %c1_14 = arith.constant 1 : index
    %c32_15 = arith.constant 32 : index
    %30 = vector.load %arg2[%c1_14, %c32_15] : memref<16x128xf32, #tpu.memory_space<vmem>>, vector<1x32xf32>
    %c1_16 = arith.constant 1 : index
    %c64 = arith.constant 64 : index
    %31 = vector.load %arg2[%c1_16, %c64] : memref<16x128xf32, #tpu.memory_space<vmem>>, vector<1x64xf32>
    %c2 = arith.constant 2 : index
    %c0_17 = arith.constant 0 : index
    %32 = vector.load %arg2[%c2, %c0_17] : memref<16x128xf32, #tpu.memory_space<vmem>>, vector<1x32xf32>
    %c2_18 = arith.constant 2 : index
    %c32_19 = arith.constant 32 : index
    %33 = vector.load %arg2[%c2_18, %c32_19] : memref<16x128xf32, #tpu.memory_space<vmem>>, vector<1x32xf32>
    %c2_20 = arith.constant 2 : index
    %c64_21 = arith.constant 64 : index
    %34 = vector.load %arg2[%c2_20, %c64_21] : memref<16x128xf32, #tpu.memory_space<vmem>>, vector<1x32xf32>
    %35 = arith.truncf %25 : vector<16x32xf32> to vector<16x32xbf16>
    %c0_22 = arith.constant 0 : index
    %c0_23 = arith.constant 0 : index
    %c0_24 = arith.constant 0 : index
    %36 = vector.load %arg3[%c0_22, %c0_23, %c0_24] : memref<4x32x128xbf16, #tpu.memory_space<vmem>>, vector<1x32x96xbf16>
    %37 = vector.shape_cast %36 : vector<1x32x96xbf16> to vector<32x96xbf16>
    %cst_25 = arith.constant dense<0.000000e+00> : vector<16x96xf32>
    %38 = tpu.matmul %35, %37, %cst_25 {dimension_numbers = #tpu.dot_dimension_numbers<[1], [0], [0], [1], [0, 0, 1, 1], [], []>} : vector<16x32xbf16>, vector<32x96xbf16>, vector<16x96xf32> -> vector<16x96xf32>
    %39 = vector.broadcast %27 : vector<1x96xf32> to vector<16x96xf32>
    %40 = arith.addf %38, %39 : vector<16x96xf32>
    %41 = arith.truncf %40 : vector<16x96xf32> to vector<16x96xbf16>
    %cst_26 = arith.constant 0.000000e+00 : f32
    %42 = vector.broadcast %cst_26 : f32 to vector<16x32xf32>
    %43 = vector.extract_strided_slice %41 {offsets = [0, 0], sizes = [16, 16], strides = [1, 1]} : vector<16x96xbf16> to vector<16x16xbf16>
    %44 = vector.extract_strided_slice %41 {offsets = [0, 32], sizes = [16, 16], strides = [1, 1]} : vector<16x96xbf16> to vector<16x16xbf16>
    %45 = vector.extract_strided_slice %41 {offsets = [0, 64], sizes = [16, 16], strides = [1, 1]} : vector<16x96xbf16> to vector<16x16xbf16>
    %cst_27 = arith.constant dense<0.000000e+00> : vector<16x16xf32>
    %46 = tpu.matmul %43, %44, %cst_27 {dimension_numbers = #tpu.dot_dimension_numbers<[1], [1], [0], [0], [0, 0, 1, 0], [], []>} : vector<16x16xbf16>, vector<16x16xbf16>, vector<16x16xf32> -> vector<16x16xf32>
    %47 = arith.addf %46, %1 : vector<16x16xf32>
    %cst_28 = arith.constant dense<0xFF800000> : vector<16xf32>
    %48 = vector.multi_reduction <maximumf>, %47, %cst_28 [1] : vector<16x16xf32> to vector<16xf32>
    %49 = vector.shape_cast %48 : vector<16xf32> to vector<16x1xf32>
    %50 = vector.broadcast %49 : vector<16x1xf32> to vector<16x16xf32>
    %51 = arith.subf %47, %50 : vector<16x16xf32>
    %52 = math.exp %51 : vector<16x16xf32>
    %cst_29 = arith.constant dense<0.000000e+00> : vector<16xf32>
    %53 = vector.multi_reduction <add>, %52, %cst_29 [1] : vector<16x16xf32> to vector<16xf32>
    %54 = vector.shape_cast %53 : vector<16xf32> to vector<16x1xf32>
    %55 = tpu.reciprocal %54 {approx = true} : vector<16x1xf32> -> vector<16x1xf32>
    %56 = vector.broadcast %55 : vector<16x1xf32> to vector<16x16xf32>
    %57 = arith.mulf %52, %56 : vector<16x16xf32>
    %58 = arith.truncf %57 : vector<16x16xf32> to vector<16x16xbf16>
    %cst_30 = arith.constant dense<0.000000e+00> : vector<16x16xf32>
    %59 = tpu.matmul %58, %45, %cst_30 {dimension_numbers = #tpu.dot_dimension_numbers<[1], [0], [0], [1], [0, 0, 1, 1], [], []>} : vector<16x16xbf16>, vector<16x16xbf16>, vector<16x16xf32> -> vector<16x16xf32>
    %60 = arith.truncf %59 : vector<16x16xf32> to vector<16x16xbf16>
    %c0_31 = arith.constant 0 : index
    %c0_32 = arith.constant 0 : index
    %c96_33 = arith.constant 96 : index
    %61 = vector.load %arg3[%c0_31, %c0_32, %c96_33] : memref<4x32x128xbf16, #tpu.memory_space<vmem>>, vector<1x16x32xbf16>
    %62 = vector.shape_cast %61 : vector<1x16x32xbf16> to vector<16x32xbf16>
    %cst_34 = arith.constant dense<0.000000e+00> : vector<16x32xf32>
    %63 = tpu.matmul %60, %62, %cst_34 {dimension_numbers = #tpu.dot_dimension_numbers<[1], [0], [0], [1], [0, 0, 1, 1], [], []>} : vector<16x16xbf16>, vector<16x32xbf16>, vector<16x32xf32> -> vector<16x32xf32>
    %64 = arith.addf %42, %63 : vector<16x32xf32>
    %65 = vector.extract_strided_slice %41 {offsets = [0, 16], sizes = [16, 16], strides = [1, 1]} : vector<16x96xbf16> to vector<16x16xbf16>
    %66 = vector.extract_strided_slice %41 {offsets = [0, 48], sizes = [16, 16], strides = [1, 1]} : vector<16x96xbf16> to vector<16x16xbf16>
    %67 = vector.extract_strided_slice %41 {offsets = [0, 80], sizes = [16, 16], strides = [1, 1]} : vector<16x96xbf16> to vector<16x16xbf16>
    %cst_35 = arith.constant dense<0.000000e+00> : vector<16x16xf32>
    %68 = tpu.matmul %65, %66, %cst_35 {dimension_numbers = #tpu.dot_dimension_numbers<[1], [1], [0], [0], [0, 0, 1, 0], [], []>} : vector<16x16xbf16>, vector<16x16xbf16>, vector<16x16xf32> -> vector<16x16xf32>
    %69 = arith.addf %68, %1 : vector<16x16xf32>
    %cst_36 = arith.constant dense<0xFF800000> : vector<16xf32>
    %70 = vector.multi_reduction <maximumf>, %69, %cst_36 [1] : vector<16x16xf32> to vector<16xf32>
    %71 = vector.shape_cast %70 : vector<16xf32> to vector<16x1xf32>
    %72 = vector.broadcast %71 : vector<16x1xf32> to vector<16x16xf32>
    %73 = arith.subf %69, %72 : vector<16x16xf32>
    %74 = math.exp %73 : vector<16x16xf32>
    %cst_37 = arith.constant dense<0.000000e+00> : vector<16xf32>
    %75 = vector.multi_reduction <add>, %74, %cst_37 [1] : vector<16x16xf32> to vector<16xf32>
    %76 = vector.shape_cast %75 : vector<16xf32> to vector<16x1xf32>
    %77 = tpu.reciprocal %76 {approx = true} : vector<16x1xf32> -> vector<16x1xf32>
    %78 = vector.broadcast %77 : vector<16x1xf32> to vector<16x16xf32>
    %79 = arith.mulf %74, %78 : vector<16x16xf32>
    %80 = arith.truncf %79 : vector<16x16xf32> to vector<16x16xbf16>
    %cst_38 = arith.constant dense<0.000000e+00> : vector<16x16xf32>
    %81 = tpu.matmul %80, %67, %cst_38 {dimension_numbers = #tpu.dot_dimension_numbers<[1], [0], [0], [1], [0, 0, 1, 1], [], []>} : vector<16x16xbf16>, vector<16x16xbf16>, vector<16x16xf32> -> vector<16x16xf32>
    %82 = arith.truncf %81 : vector<16x16xf32> to vector<16x16xbf16>
    %c0_39 = arith.constant 0 : index
    %c16 = arith.constant 16 : index
    %c96_40 = arith.constant 96 : index
    %83 = vector.load %arg3[%c0_39, %c16, %c96_40] : memref<4x32x128xbf16, #tpu.memory_space<vmem>>, vector<1x16x32xbf16>
    %84 = vector.shape_cast %83 : vector<1x16x32xbf16> to vector<16x32xbf16>
    %cst_41 = arith.constant dense<0.000000e+00> : vector<16x32xf32>
    %85 = tpu.matmul %82, %84, %cst_41 {dimension_numbers = #tpu.dot_dimension_numbers<[1], [0], [0], [1], [0, 0, 1, 1], [], []>} : vector<16x16xbf16>, vector<16x32xbf16>, vector<16x32xf32> -> vector<16x32xf32>
    %86 = arith.addf %64, %85 : vector<16x32xf32>
    %87 = vector.broadcast %28 : vector<1x32xf32> to vector<16x32xf32>
    %88 = arith.addf %86, %87 : vector<16x32xf32>
    %89 = arith.addf %25, %88 : vector<16x32xf32>
    %cst_42 = arith.constant dense<0.000000e+00> : vector<16xf32>
    %90 = vector.multi_reduction <add>, %89, %cst_42 [1] : vector<16x32xf32> to vector<16xf32>
    %91 = vector.shape_cast %90 : vector<16xf32> to vector<16x1xf32>
    %cst_43 = arith.constant 3.200000e+01 : f32
    %92 = vector.broadcast %cst_43 : f32 to vector<16x1xf32>
    %93 = arith.divf %91, %92 : vector<16x1xf32>
    %94 = vector.broadcast %93 : vector<16x1xf32> to vector<16x32xf32>
    %95 = arith.subf %89, %94 : vector<16x32xf32>
    %96 = arith.mulf %95, %95 : vector<16x32xf32>
    %cst_44 = arith.constant dense<0.000000e+00> : vector<16xf32>
    %97 = vector.multi_reduction <add>, %96, %cst_44 [1] : vector<16x32xf32> to vector<16xf32>
    %98 = vector.shape_cast %97 : vector<16xf32> to vector<16x1xf32>
    %cst_45 = arith.constant 3.200000e+01 : f32
    %99 = vector.broadcast %cst_45 : f32 to vector<16x1xf32>
    %100 = arith.divf %98, %99 : vector<16x1xf32>
    %101 = vector.broadcast %93 : vector<16x1xf32> to vector<16x32xf32>
    %102 = arith.subf %89, %101 : vector<16x32xf32>
    %cst_46 = arith.constant 1.000000e-07 : f32
    %103 = vector.broadcast %cst_46 : f32 to vector<16x1xf32>
    %104 = arith.addf %100, %103 : vector<16x1xf32>
    %105 = math.rsqrt %104 : vector<16x1xf32>
    %106 = vector.broadcast %105 : vector<16x1xf32> to vector<16x32xf32>
    %107 = arith.mulf %102, %106 : vector<16x32xf32>
    %108 = vector.broadcast %29 : vector<1x32xf32> to vector<16x32xf32>
    %109 = arith.mulf %107, %108 : vector<16x32xf32>
    %110 = vector.broadcast %30 : vector<1x32xf32> to vector<16x32xf32>
    %111 = arith.addf %109, %110 : vector<16x32xf32>
    %112 = arith.truncf %111 : vector<16x32xf32> to vector<16x32xbf16>
    %c0_47 = arith.constant 0 : index
    %c0_48 = arith.constant 0 : index
    %c0_49 = arith.constant 0 : index
    %113 = vector.load %arg4[%c0_47, %c0_48, %c0_49] : memref<4x32x128xbf16, #tpu.memory_space<vmem>>, vector<1x32x64xbf16>
    %114 = vector.shape_cast %113 : vector<1x32x64xbf16> to vector<32x64xbf16>
    %cst_50 = arith.constant dense<0.000000e+00> : vector<16x64xf32>
    %115 = tpu.matmul %112, %114, %cst_50 {dimension_numbers = #tpu.dot_dimension_numbers<[1], [0], [0], [1], [0, 0, 1, 1], [], []>} : vector<16x32xbf16>, vector<32x64xbf16>, vector<16x64xf32> -> vector<16x64xf32>
    %116 = vector.broadcast %31 : vector<1x64xf32> to vector<16x64xf32>
    %117 = arith.addf %115, %116 : vector<16x64xf32>
    %118 = arith.mulf %117, %117 : vector<16x64xf32>
    %119 = arith.mulf %117, %118 : vector<16x64xf32>
    %cst_51 = arith.constant 4.471500e-02 : f32
    %120 = vector.broadcast %cst_51 : f32 to vector<16x64xf32>
    %121 = arith.mulf %120, %119 : vector<16x64xf32>
    %122 = arith.addf %117, %121 : vector<16x64xf32>
    %cst_52 = arith.constant 0.797884583 : f32
    %123 = vector.broadcast %cst_52 : f32 to vector<16x64xf32>
    %124 = arith.mulf %123, %122 : vector<16x64xf32>
    %125 = math.tanh %124 : vector<16x64xf32>
    %cst_53 = arith.constant 1.000000e+00 : f32
    %126 = vector.broadcast %cst_53 : f32 to vector<16x64xf32>
    %127 = arith.addf %126, %125 : vector<16x64xf32>
    %cst_54 = arith.constant 5.000000e-01 : f32
    %128 = vector.broadcast %cst_54 : f32 to vector<16x64xf32>
    %129 = arith.mulf %128, %127 : vector<16x64xf32>
    %130 = arith.mulf %117, %129 : vector<16x64xf32>
    %131 = arith.truncf %130 : vector<16x64xf32> to vector<16x64xbf16>
    %c0_55 = arith.constant 0 : index
    %c0_56 = arith.constant 0 : index
    %c64_57 = arith.constant 64 : index
    %132 = vector.load %arg4[%c0_55, %c0_56, %c64_57] : memref<4x32x128xbf16, #tpu.memory_space<vmem>>, vector<1x32x64xbf16>
    %133 = vector.shape_cast %132 : vector<1x32x64xbf16> to vector<32x64xbf16>
    %cst_58 = arith.constant dense<0.000000e+00> : vector<16x32xf32>
    %134 = tpu.matmul %131, %133, %cst_58 {dimension_numbers = #tpu.dot_dimension_numbers<[1], [1], [0], [0], [0, 0, 1, 0], [], []>} : vector<16x64xbf16>, vector<32x64xbf16>, vector<16x32xf32> -> vector<16x32xf32>
    %135 = vector.broadcast %32 : vector<1x32xf32> to vector<16x32xf32>
    %136 = arith.addf %134, %135 : vector<16x32xf32>
    %137 = arith.addf %111, %136 : vector<16x32xf32>
    %cst_59 = arith.constant dense<0.000000e+00> : vector<16xf32>
    %138 = vector.multi_reduction <add>, %137, %cst_59 [1] : vector<16x32xf32> to vector<16xf32>
    %139 = vector.shape_cast %138 : vector<16xf32> to vector<16x1xf32>
    %cst_60 = arith.constant 3.200000e+01 : f32
    %140 = vector.broadcast %cst_60 : f32 to vector<16x1xf32>
    %141 = arith.divf %139, %140 : vector<16x1xf32>
    %142 = vector.broadcast %141 : vector<16x1xf32> to vector<16x32xf32>
    %143 = arith.subf %137, %142 : vector<16x32xf32>
    %144 = arith.mulf %143, %143 : vector<16x32xf32>
    %cst_61 = arith.constant dense<0.000000e+00> : vector<16xf32>
    %145 = vector.multi_reduction <add>, %144, %cst_61 [1] : vector<16x32xf32> to vector<16xf32>
    %146 = vector.shape_cast %145 : vector<16xf32> to vector<16x1xf32>
    %cst_62 = arith.constant 3.200000e+01 : f32
    %147 = vector.broadcast %cst_62 : f32 to vector<16x1xf32>
    %148 = arith.divf %146, %147 : vector<16x1xf32>
    %149 = vector.broadcast %141 : vector<16x1xf32> to vector<16x32xf32>
    %150 = arith.subf %137, %149 : vector<16x32xf32>
    %cst_63 = arith.constant 1.000000e-07 : f32
    %151 = vector.broadcast %cst_63 : f32 to vector<16x1xf32>
    %152 = arith.addf %148, %151 : vector<16x1xf32>
    %153 = math.rsqrt %152 : vector<16x1xf32>
    %154 = vector.broadcast %153 : vector<16x1xf32> to vector<16x32xf32>
    %155 = arith.mulf %150, %154 : vector<16x32xf32>
    %156 = vector.broadcast %33 : vector<1x32xf32> to vector<16x32xf32>
    %157 = arith.mulf %155, %156 : vector<16x32xf32>
    %158 = vector.broadcast %34 : vector<1x32xf32> to vector<16x32xf32>
    %159 = arith.addf %157, %158 : vector<16x32xf32>
    %160 = arith.addf %26, %159 : vector<16x32xf32>
    %c3 = arith.constant 3 : index
    %c0_64 = arith.constant 0 : index
    %161 = vector.load %arg2[%c3, %c0_64] : memref<16x128xf32, #tpu.memory_space<vmem>>, vector<1x96xf32>
    %c3_65 = arith.constant 3 : index
    %c96_66 = arith.constant 96 : index
    %162 = vector.load %arg2[%c3_65, %c96_66] : memref<16x128xf32, #tpu.memory_space<vmem>>, vector<1x32xf32>
    %c4 = arith.constant 4 : index
    %c0_67 = arith.constant 0 : index
    %163 = vector.load %arg2[%c4, %c0_67] : memref<16x128xf32, #tpu.memory_space<vmem>>, vector<1x32xf32>
    %c4_68 = arith.constant 4 : index
    %c32_69 = arith.constant 32 : index
    %164 = vector.load %arg2[%c4_68, %c32_69] : memref<16x128xf32, #tpu.memory_space<vmem>>, vector<1x32xf32>
    %c4_70 = arith.constant 4 : index
    %c64_71 = arith.constant 64 : index
    %165 = vector.load %arg2[%c4_70, %c64_71] : memref<16x128xf32, #tpu.memory_space<vmem>>, vector<1x64xf32>
    %c5 = arith.constant 5 : index
    %c0_72 = arith.constant 0 : index
    %166 = vector.load %arg2[%c5, %c0_72] : memref<16x128xf32, #tpu.memory_space<vmem>>, vector<1x32xf32>
    %c5_73 = arith.constant 5 : index
    %c32_74 = arith.constant 32 : index
    %167 = vector.load %arg2[%c5_73, %c32_74] : memref<16x128xf32, #tpu.memory_space<vmem>>, vector<1x32xf32>
    %c5_75 = arith.constant 5 : index
    %c64_76 = arith.constant 64 : index
    %168 = vector.load %arg2[%c5_75, %c64_76] : memref<16x128xf32, #tpu.memory_space<vmem>>, vector<1x32xf32>
    %169 = arith.truncf %159 : vector<16x32xf32> to vector<16x32xbf16>
    %c1_77 = arith.constant 1 : index
    %c0_78 = arith.constant 0 : index
    %c0_79 = arith.constant 0 : index
    %170 = vector.load %arg3[%c1_77, %c0_78, %c0_79] : memref<4x32x128xbf16, #tpu.memory_space<vmem>>, vector<1x32x96xbf16>
    %171 = vector.shape_cast %170 : vector<1x32x96xbf16> to vector<32x96xbf16>
    %cst_80 = arith.constant dense<0.000000e+00> : vector<16x96xf32>
    %172 = tpu.matmul %169, %171, %cst_80 {dimension_numbers = #tpu.dot_dimension_numbers<[1], [0], [0], [1], [0, 0, 1, 1], [], []>} : vector<16x32xbf16>, vector<32x96xbf16>, vector<16x96xf32> -> vector<16x96xf32>
    %173 = vector.broadcast %161 : vector<1x96xf32> to vector<16x96xf32>
    %174 = arith.addf %172, %173 : vector<16x96xf32>
    %175 = arith.truncf %174 : vector<16x96xf32> to vector<16x96xbf16>
    %cst_81 = arith.constant 0.000000e+00 : f32
    %176 = vector.broadcast %cst_81 : f32 to vector<16x32xf32>
    %177 = vector.extract_strided_slice %175 {offsets = [0, 0], sizes = [16, 16], strides = [1, 1]} : vector<16x96xbf16> to vector<16x16xbf16>
    %178 = vector.extract_strided_slice %175 {offsets = [0, 32], sizes = [16, 16], strides = [1, 1]} : vector<16x96xbf16> to vector<16x16xbf16>
    %179 = vector.extract_strided_slice %175 {offsets = [0, 64], sizes = [16, 16], strides = [1, 1]} : vector<16x96xbf16> to vector<16x16xbf16>
    %cst_82 = arith.constant dense<0.000000e+00> : vector<16x16xf32>
    %180 = tpu.matmul %177, %178, %cst_82 {dimension_numbers = #tpu.dot_dimension_numbers<[1], [1], [0], [0], [0, 0, 1, 0], [], []>} : vector<16x16xbf16>, vector<16x16xbf16>, vector<16x16xf32> -> vector<16x16xf32>
    %181 = arith.addf %180, %1 : vector<16x16xf32>
    %cst_83 = arith.constant dense<0xFF800000> : vector<16xf32>
    %182 = vector.multi_reduction <maximumf>, %181, %cst_83 [1] : vector<16x16xf32> to vector<16xf32>
    %183 = vector.shape_cast %182 : vector<16xf32> to vector<16x1xf32>
    %184 = vector.broadcast %183 : vector<16x1xf32> to vector<16x16xf32>
    %185 = arith.subf %181, %184 : vector<16x16xf32>
    %186 = math.exp %185 : vector<16x16xf32>
    %cst_84 = arith.constant dense<0.000000e+00> : vector<16xf32>
    %187 = vector.multi_reduction <add>, %186, %cst_84 [1] : vector<16x16xf32> to vector<16xf32>
    %188 = vector.shape_cast %187 : vector<16xf32> to vector<16x1xf32>
    %189 = tpu.reciprocal %188 {approx = true} : vector<16x1xf32> -> vector<16x1xf32>
    %190 = vector.broadcast %189 : vector<16x1xf32> to vector<16x16xf32>
    %191 = arith.mulf %186, %190 : vector<16x16xf32>
    %192 = arith.truncf %191 : vector<16x16xf32> to vector<16x16xbf16>
    %cst_85 = arith.constant dense<0.000000e+00> : vector<16x16xf32>
    %193 = tpu.matmul %192, %179, %cst_85 {dimension_numbers = #tpu.dot_dimension_numbers<[1], [0], [0], [1], [0, 0, 1, 1], [], []>} : vector<16x16xbf16>, vector<16x16xbf16>, vector<16x16xf32> -> vector<16x16xf32>
    %194 = arith.truncf %193 : vector<16x16xf32> to vector<16x16xbf16>
    %c1_86 = arith.constant 1 : index
    %c0_87 = arith.constant 0 : index
    %c96_88 = arith.constant 96 : index
    %195 = vector.load %arg3[%c1_86, %c0_87, %c96_88] : memref<4x32x128xbf16, #tpu.memory_space<vmem>>, vector<1x16x32xbf16>
    %196 = vector.shape_cast %195 : vector<1x16x32xbf16> to vector<16x32xbf16>
    %cst_89 = arith.constant dense<0.000000e+00> : vector<16x32xf32>
    %197 = tpu.matmul %194, %196, %cst_89 {dimension_numbers = #tpu.dot_dimension_numbers<[1], [0], [0], [1], [0, 0, 1, 1], [], []>} : vector<16x16xbf16>, vector<16x32xbf16>, vector<16x32xf32> -> vector<16x32xf32>
    %198 = arith.addf %176, %197 : vector<16x32xf32>
    %199 = vector.extract_strided_slice %175 {offsets = [0, 16], sizes = [16, 16], strides = [1, 1]} : vector<16x96xbf16> to vector<16x16xbf16>
    %200 = vector.extract_strided_slice %175 {offsets = [0, 48], sizes = [16, 16], strides = [1, 1]} : vector<16x96xbf16> to vector<16x16xbf16>
    %201 = vector.extract_strided_slice %175 {offsets = [0, 80], sizes = [16, 16], strides = [1, 1]} : vector<16x96xbf16> to vector<16x16xbf16>
    %cst_90 = arith.constant dense<0.000000e+00> : vector<16x16xf32>
    %202 = tpu.matmul %199, %200, %cst_90 {dimension_numbers = #tpu.dot_dimension_numbers<[1], [1], [0], [0], [0, 0, 1, 0], [], []>} : vector<16x16xbf16>, vector<16x16xbf16>, vector<16x16xf32> -> vector<16x16xf32>
    %203 = arith.addf %202, %1 : vector<16x16xf32>
    %cst_91 = arith.constant dense<0xFF800000> : vector<16xf32>
    %204 = vector.multi_reduction <maximumf>, %203, %cst_91 [1] : vector<16x16xf32> to vector<16xf32>
    %205 = vector.shape_cast %204 : vector<16xf32> to vector<16x1xf32>
    %206 = vector.broadcast %205 : vector<16x1xf32> to vector<16x16xf32>
    %207 = arith.subf %203, %206 : vector<16x16xf32>
    %208 = math.exp %207 : vector<16x16xf32>
    %cst_92 = arith.constant dense<0.000000e+00> : vector<16xf32>
    %209 = vector.multi_reduction <add>, %208, %cst_92 [1] : vector<16x16xf32> to vector<16xf32>
    %210 = vector.shape_cast %209 : vector<16xf32> to vector<16x1xf32>
    %211 = tpu.reciprocal %210 {approx = true} : vector<16x1xf32> -> vector<16x1xf32>
    %212 = vector.broadcast %211 : vector<16x1xf32> to vector<16x16xf32>
    %213 = arith.mulf %208, %212 : vector<16x16xf32>
    %214 = arith.truncf %213 : vector<16x16xf32> to vector<16x16xbf16>
    %cst_93 = arith.constant dense<0.000000e+00> : vector<16x16xf32>
    %215 = tpu.matmul %214, %201, %cst_93 {dimension_numbers = #tpu.dot_dimension_numbers<[1], [0], [0], [1], [0, 0, 1, 1], [], []>} : vector<16x16xbf16>, vector<16x16xbf16>, vector<16x16xf32> -> vector<16x16xf32>
    %216 = arith.truncf %215 : vector<16x16xf32> to vector<16x16xbf16>
    %c1_94 = arith.constant 1 : index
    %c16_95 = arith.constant 16 : index
    %c96_96 = arith.constant 96 : index
    %217 = vector.load %arg3[%c1_94, %c16_95, %c96_96] : memref<4x32x128xbf16, #tpu.memory_space<vmem>>, vector<1x16x32xbf16>
    %218 = vector.shape_cast %217 : vector<1x16x32xbf16> to vector<16x32xbf16>
    %cst_97 = arith.constant dense<0.000000e+00> : vector<16x32xf32>
    %219 = tpu.matmul %216, %218, %cst_97 {dimension_numbers = #tpu.dot_dimension_numbers<[1], [0], [0], [1], [0, 0, 1, 1], [], []>} : vector<16x16xbf16>, vector<16x32xbf16>, vector<16x32xf32> -> vector<16x32xf32>
    %220 = arith.addf %198, %219 : vector<16x32xf32>
    %221 = vector.broadcast %162 : vector<1x32xf32> to vector<16x32xf32>
    %222 = arith.addf %220, %221 : vector<16x32xf32>
    %223 = arith.addf %159, %222 : vector<16x32xf32>
    %cst_98 = arith.constant dense<0.000000e+00> : vector<16xf32>
    %224 = vector.multi_reduction <add>, %223, %cst_98 [1] : vector<16x32xf32> to vector<16xf32>
    %225 = vector.shape_cast %224 : vector<16xf32> to vector<16x1xf32>
    %cst_99 = arith.constant 3.200000e+01 : f32
    %226 = vector.broadcast %cst_99 : f32 to vector<16x1xf32>
    %227 = arith.divf %225, %226 : vector<16x1xf32>
    %228 = vector.broadcast %227 : vector<16x1xf32> to vector<16x32xf32>
    %229 = arith.subf %223, %228 : vector<16x32xf32>
    %230 = arith.mulf %229, %229 : vector<16x32xf32>
    %cst_100 = arith.constant dense<0.000000e+00> : vector<16xf32>
    %231 = vector.multi_reduction <add>, %230, %cst_100 [1] : vector<16x32xf32> to vector<16xf32>
    %232 = vector.shape_cast %231 : vector<16xf32> to vector<16x1xf32>
    %cst_101 = arith.constant 3.200000e+01 : f32
    %233 = vector.broadcast %cst_101 : f32 to vector<16x1xf32>
    %234 = arith.divf %232, %233 : vector<16x1xf32>
    %235 = vector.broadcast %227 : vector<16x1xf32> to vector<16x32xf32>
    %236 = arith.subf %223, %235 : vector<16x32xf32>
    %cst_102 = arith.constant 1.000000e-07 : f32
    %237 = vector.broadcast %cst_102 : f32 to vector<16x1xf32>
    %238 = arith.addf %234, %237 : vector<16x1xf32>
    %239 = math.rsqrt %238 : vector<16x1xf32>
    %240 = vector.broadcast %239 : vector<16x1xf32> to vector<16x32xf32>
    %241 = arith.mulf %236, %240 : vector<16x32xf32>
    %242 = vector.broadcast %163 : vector<1x32xf32> to vector<16x32xf32>
    %243 = arith.mulf %241, %242 : vector<16x32xf32>
    %244 = vector.broadcast %164 : vector<1x32xf32> to vector<16x32xf32>
    %245 = arith.addf %243, %244 : vector<16x32xf32>
    %246 = arith.truncf %245 : vector<16x32xf32> to vector<16x32xbf16>
    %c1_103 = arith.constant 1 : index
    %c0_104 = arith.constant 0 : index
    %c0_105 = arith.constant 0 : index
    %247 = vector.load %arg4[%c1_103, %c0_104, %c0_105] : memref<4x32x128xbf16, #tpu.memory_space<vmem>>, vector<1x32x64xbf16>
    %248 = vector.shape_cast %247 : vector<1x32x64xbf16> to vector<32x64xbf16>
    %cst_106 = arith.constant dense<0.000000e+00> : vector<16x64xf32>
    %249 = tpu.matmul %246, %248, %cst_106 {dimension_numbers = #tpu.dot_dimension_numbers<[1], [0], [0], [1], [0, 0, 1, 1], [], []>} : vector<16x32xbf16>, vector<32x64xbf16>, vector<16x64xf32> -> vector<16x64xf32>
    %250 = vector.broadcast %165 : vector<1x64xf32> to vector<16x64xf32>
    %251 = arith.addf %249, %250 : vector<16x64xf32>
    %252 = arith.mulf %251, %251 : vector<16x64xf32>
    %253 = arith.mulf %251, %252 : vector<16x64xf32>
    %cst_107 = arith.constant 4.471500e-02 : f32
    %254 = vector.broadcast %cst_107 : f32 to vector<16x64xf32>
    %255 = arith.mulf %254, %253 : vector<16x64xf32>
    %256 = arith.addf %251, %255 : vector<16x64xf32>
    %cst_108 = arith.constant 0.797884583 : f32
    %257 = vector.broadcast %cst_108 : f32 to vector<16x64xf32>
    %258 = arith.mulf %257, %256 : vector<16x64xf32>
    %259 = math.tanh %258 : vector<16x64xf32>
    %cst_109 = arith.constant 1.000000e+00 : f32
    %260 = vector.broadcast %cst_109 : f32 to vector<16x64xf32>
    %261 = arith.addf %260, %259 : vector<16x64xf32>
    %cst_110 = arith.constant 5.000000e-01 : f32
    %262 = vector.broadcast %cst_110 : f32 to vector<16x64xf32>
    %263 = arith.mulf %262, %261 : vector<16x64xf32>
    %264 = arith.mulf %251, %263 : vector<16x64xf32>
    %265 = arith.truncf %264 : vector<16x64xf32> to vector<16x64xbf16>
    %c1_111 = arith.constant 1 : index
    %c0_112 = arith.constant 0 : index
    %c64_113 = arith.constant 64 : index
    %266 = vector.load %arg4[%c1_111, %c0_112, %c64_113] : memref<4x32x128xbf16, #tpu.memory_space<vmem>>, vector<1x32x64xbf16>
    %267 = vector.shape_cast %266 : vector<1x32x64xbf16> to vector<32x64xbf16>
    %cst_114 = arith.constant dense<0.000000e+00> : vector<16x32xf32>
    %268 = tpu.matmul %265, %267, %cst_114 {dimension_numbers = #tpu.dot_dimension_numbers<[1], [1], [0], [0], [0, 0, 1, 0], [], []>} : vector<16x64xbf16>, vector<32x64xbf16>, vector<16x32xf32> -> vector<16x32xf32>
    %269 = vector.broadcast %166 : vector<1x32xf32> to vector<16x32xf32>
    %270 = arith.addf %268, %269 : vector<16x32xf32>
    %271 = arith.addf %245, %270 : vector<16x32xf32>
    %cst_115 = arith.constant dense<0.000000e+00> : vector<16xf32>
    %272 = vector.multi_reduction <add>, %271, %cst_115 [1] : vector<16x32xf32> to vector<16xf32>
    %273 = vector.shape_cast %272 : vector<16xf32> to vector<16x1xf32>
    %cst_116 = arith.constant 3.200000e+01 : f32
    %274 = vector.broadcast %cst_116 : f32 to vector<16x1xf32>
    %275 = arith.divf %273, %274 : vector<16x1xf32>
    %276 = vector.broadcast %275 : vector<16x1xf32> to vector<16x32xf32>
    %277 = arith.subf %271, %276 : vector<16x32xf32>
    %278 = arith.mulf %277, %277 : vector<16x32xf32>
    %cst_117 = arith.constant dense<0.000000e+00> : vector<16xf32>
    %279 = vector.multi_reduction <add>, %278, %cst_117 [1] : vector<16x32xf32> to vector<16xf32>
    %280 = vector.shape_cast %279 : vector<16xf32> to vector<16x1xf32>
    %cst_118 = arith.constant 3.200000e+01 : f32
    %281 = vector.broadcast %cst_118 : f32 to vector<16x1xf32>
    %282 = arith.divf %280, %281 : vector<16x1xf32>
    %283 = vector.broadcast %275 : vector<16x1xf32> to vector<16x32xf32>
    %284 = arith.subf %271, %283 : vector<16x32xf32>
    %cst_119 = arith.constant 1.000000e-07 : f32
    %285 = vector.broadcast %cst_119 : f32 to vector<16x1xf32>
    %286 = arith.addf %282, %285 : vector<16x1xf32>
    %287 = math.rsqrt %286 : vector<16x1xf32>
    %288 = vector.broadcast %287 : vector<16x1xf32> to vector<16x32xf32>
    %289 = arith.mulf %284, %288 : vector<16x32xf32>
    %290 = vector.broadcast %167 : vector<1x32xf32> to vector<16x32xf32>
    %291 = arith.mulf %289, %290 : vector<16x32xf32>
    %292 = vector.broadcast %168 : vector<1x32xf32> to vector<16x32xf32>
    %293 = arith.addf %291, %292 : vector<16x32xf32>
    %294 = arith.addf %160, %293 : vector<16x32xf32>
    %c6 = arith.constant 6 : index
    %c0_120 = arith.constant 0 : index
    %295 = vector.load %arg2[%c6, %c0_120] : memref<16x128xf32, #tpu.memory_space<vmem>>, vector<1x96xf32>
    %c6_121 = arith.constant 6 : index
    %c96_122 = arith.constant 96 : index
    %296 = vector.load %arg2[%c6_121, %c96_122] : memref<16x128xf32, #tpu.memory_space<vmem>>, vector<1x32xf32>
    %c7 = arith.constant 7 : index
    %c0_123 = arith.constant 0 : index
    %297 = vector.load %arg2[%c7, %c0_123] : memref<16x128xf32, #tpu.memory_space<vmem>>, vector<1x32xf32>
    %c7_124 = arith.constant 7 : index
    %c32_125 = arith.constant 32 : index
    %298 = vector.load %arg2[%c7_124, %c32_125] : memref<16x128xf32, #tpu.memory_space<vmem>>, vector<1x32xf32>
    %c7_126 = arith.constant 7 : index
    %c64_127 = arith.constant 64 : index
    %299 = vector.load %arg2[%c7_126, %c64_127] : memref<16x128xf32, #tpu.memory_space<vmem>>, vector<1x64xf32>
    %c8 = arith.constant 8 : index
    %c0_128 = arith.constant 0 : index
    %300 = vector.load %arg2[%c8, %c0_128] : memref<16x128xf32, #tpu.memory_space<vmem>>, vector<1x32xf32>
    %c8_129 = arith.constant 8 : index
    %c32_130 = arith.constant 32 : index
    %301 = vector.load %arg2[%c8_129, %c32_130] : memref<16x128xf32, #tpu.memory_space<vmem>>, vector<1x32xf32>
    %c8_131 = arith.constant 8 : index
    %c64_132 = arith.constant 64 : index
    %302 = vector.load %arg2[%c8_131, %c64_132] : memref<16x128xf32, #tpu.memory_space<vmem>>, vector<1x32xf32>
    %303 = arith.truncf %293 : vector<16x32xf32> to vector<16x32xbf16>
    %c2_133 = arith.constant 2 : index
    %c0_134 = arith.constant 0 : index
    %c0_135 = arith.constant 0 : index
    %304 = vector.load %arg3[%c2_133, %c0_134, %c0_135] : memref<4x32x128xbf16, #tpu.memory_space<vmem>>, vector<1x32x96xbf16>
    %305 = vector.shape_cast %304 : vector<1x32x96xbf16> to vector<32x96xbf16>
    %cst_136 = arith.constant dense<0.000000e+00> : vector<16x96xf32>
    %306 = tpu.matmul %303, %305, %cst_136 {dimension_numbers = #tpu.dot_dimension_numbers<[1], [0], [0], [1], [0, 0, 1, 1], [], []>} : vector<16x32xbf16>, vector<32x96xbf16>, vector<16x96xf32> -> vector<16x96xf32>
    %307 = vector.broadcast %295 : vector<1x96xf32> to vector<16x96xf32>
    %308 = arith.addf %306, %307 : vector<16x96xf32>
    %309 = arith.truncf %308 : vector<16x96xf32> to vector<16x96xbf16>
    %cst_137 = arith.constant 0.000000e+00 : f32
    %310 = vector.broadcast %cst_137 : f32 to vector<16x32xf32>
    %311 = vector.extract_strided_slice %309 {offsets = [0, 0], sizes = [16, 16], strides = [1, 1]} : vector<16x96xbf16> to vector<16x16xbf16>
    %312 = vector.extract_strided_slice %309 {offsets = [0, 32], sizes = [16, 16], strides = [1, 1]} : vector<16x96xbf16> to vector<16x16xbf16>
    %313 = vector.extract_strided_slice %309 {offsets = [0, 64], sizes = [16, 16], strides = [1, 1]} : vector<16x96xbf16> to vector<16x16xbf16>
    %cst_138 = arith.constant dense<0.000000e+00> : vector<16x16xf32>
    %314 = tpu.matmul %311, %312, %cst_138 {dimension_numbers = #tpu.dot_dimension_numbers<[1], [1], [0], [0], [0, 0, 1, 0], [], []>} : vector<16x16xbf16>, vector<16x16xbf16>, vector<16x16xf32> -> vector<16x16xf32>
    %315 = arith.addf %314, %1 : vector<16x16xf32>
    %cst_139 = arith.constant dense<0xFF800000> : vector<16xf32>
    %316 = vector.multi_reduction <maximumf>, %315, %cst_139 [1] : vector<16x16xf32> to vector<16xf32>
    %317 = vector.shape_cast %316 : vector<16xf32> to vector<16x1xf32>
    %318 = vector.broadcast %317 : vector<16x1xf32> to vector<16x16xf32>
    %319 = arith.subf %315, %318 : vector<16x16xf32>
    %320 = math.exp %319 : vector<16x16xf32>
    %cst_140 = arith.constant dense<0.000000e+00> : vector<16xf32>
    %321 = vector.multi_reduction <add>, %320, %cst_140 [1] : vector<16x16xf32> to vector<16xf32>
    %322 = vector.shape_cast %321 : vector<16xf32> to vector<16x1xf32>
    %323 = tpu.reciprocal %322 {approx = true} : vector<16x1xf32> -> vector<16x1xf32>
    %324 = vector.broadcast %323 : vector<16x1xf32> to vector<16x16xf32>
    %325 = arith.mulf %320, %324 : vector<16x16xf32>
    %326 = arith.truncf %325 : vector<16x16xf32> to vector<16x16xbf16>
    %cst_141 = arith.constant dense<0.000000e+00> : vector<16x16xf32>
    %327 = tpu.matmul %326, %313, %cst_141 {dimension_numbers = #tpu.dot_dimension_numbers<[1], [0], [0], [1], [0, 0, 1, 1], [], []>} : vector<16x16xbf16>, vector<16x16xbf16>, vector<16x16xf32> -> vector<16x16xf32>
    %328 = arith.truncf %327 : vector<16x16xf32> to vector<16x16xbf16>
    %c2_142 = arith.constant 2 : index
    %c0_143 = arith.constant 0 : index
    %c96_144 = arith.constant 96 : index
    %329 = vector.load %arg3[%c2_142, %c0_143, %c96_144] : memref<4x32x128xbf16, #tpu.memory_space<vmem>>, vector<1x16x32xbf16>
    %330 = vector.shape_cast %329 : vector<1x16x32xbf16> to vector<16x32xbf16>
    %cst_145 = arith.constant dense<0.000000e+00> : vector<16x32xf32>
    %331 = tpu.matmul %328, %330, %cst_145 {dimension_numbers = #tpu.dot_dimension_numbers<[1], [0], [0], [1], [0, 0, 1, 1], [], []>} : vector<16x16xbf16>, vector<16x32xbf16>, vector<16x32xf32> -> vector<16x32xf32>
    %332 = arith.addf %310, %331 : vector<16x32xf32>
    %333 = vector.extract_strided_slice %309 {offsets = [0, 16], sizes = [16, 16], strides = [1, 1]} : vector<16x96xbf16> to vector<16x16xbf16>
    %334 = vector.extract_strided_slice %309 {offsets = [0, 48], sizes = [16, 16], strides = [1, 1]} : vector<16x96xbf16> to vector<16x16xbf16>
    %335 = vector.extract_strided_slice %309 {offsets = [0, 80], sizes = [16, 16], strides = [1, 1]} : vector<16x96xbf16> to vector<16x16xbf16>
    %cst_146 = arith.constant dense<0.000000e+00> : vector<16x16xf32>
    %336 = tpu.matmul %333, %334, %cst_146 {dimension_numbers = #tpu.dot_dimension_numbers<[1], [1], [0], [0], [0, 0, 1, 0], [], []>} : vector<16x16xbf16>, vector<16x16xbf16>, vector<16x16xf32> -> vector<16x16xf32>
    %337 = arith.addf %336, %1 : vector<16x16xf32>
    %cst_147 = arith.constant dense<0xFF800000> : vector<16xf32>
    %338 = vector.multi_reduction <maximumf>, %337, %cst_147 [1] : vector<16x16xf32> to vector<16xf32>
    %339 = vector.shape_cast %338 : vector<16xf32> to vector<16x1xf32>
    %340 = vector.broadcast %339 : vector<16x1xf32> to vector<16x16xf32>
    %341 = arith.subf %337, %340 : vector<16x16xf32>
    %342 = math.exp %341 : vector<16x16xf32>
    %cst_148 = arith.constant dense<0.000000e+00> : vector<16xf32>
    %343 = vector.multi_reduction <add>, %342, %cst_148 [1] : vector<16x16xf32> to vector<16xf32>
    %344 = vector.shape_cast %343 : vector<16xf32> to vector<16x1xf32>
    %345 = tpu.reciprocal %344 {approx = true} : vector<16x1xf32> -> vector<16x1xf32>
    %346 = vector.broadcast %345 : vector<16x1xf32> to vector<16x16xf32>
    %347 = arith.mulf %342, %346 : vector<16x16xf32>
    %348 = arith.truncf %347 : vector<16x16xf32> to vector<16x16xbf16>
    %cst_149 = arith.constant dense<0.000000e+00> : vector<16x16xf32>
    %349 = tpu.matmul %348, %335, %cst_149 {dimension_numbers = #tpu.dot_dimension_numbers<[1], [0], [0], [1], [0, 0, 1, 1], [], []>} : vector<16x16xbf16>, vector<16x16xbf16>, vector<16x16xf32> -> vector<16x16xf32>
    %350 = arith.truncf %349 : vector<16x16xf32> to vector<16x16xbf16>
    %c2_150 = arith.constant 2 : index
    %c16_151 = arith.constant 16 : index
    %c96_152 = arith.constant 96 : index
    %351 = vector.load %arg3[%c2_150, %c16_151, %c96_152] : memref<4x32x128xbf16, #tpu.memory_space<vmem>>, vector<1x16x32xbf16>
    %352 = vector.shape_cast %351 : vector<1x16x32xbf16> to vector<16x32xbf16>
    %cst_153 = arith.constant dense<0.000000e+00> : vector<16x32xf32>
    %353 = tpu.matmul %350, %352, %cst_153 {dimension_numbers = #tpu.dot_dimension_numbers<[1], [0], [0], [1], [0, 0, 1, 1], [], []>} : vector<16x16xbf16>, vector<16x32xbf16>, vector<16x32xf32> -> vector<16x32xf32>
    %354 = arith.addf %332, %353 : vector<16x32xf32>
    %355 = vector.broadcast %296 : vector<1x32xf32> to vector<16x32xf32>
    %356 = arith.addf %354, %355 : vector<16x32xf32>
    %357 = arith.addf %293, %356 : vector<16x32xf32>
    %cst_154 = arith.constant dense<0.000000e+00> : vector<16xf32>
    %358 = vector.multi_reduction <add>, %357, %cst_154 [1] : vector<16x32xf32> to vector<16xf32>
    %359 = vector.shape_cast %358 : vector<16xf32> to vector<16x1xf32>
    %cst_155 = arith.constant 3.200000e+01 : f32
    %360 = vector.broadcast %cst_155 : f32 to vector<16x1xf32>
    %361 = arith.divf %359, %360 : vector<16x1xf32>
    %362 = vector.broadcast %361 : vector<16x1xf32> to vector<16x32xf32>
    %363 = arith.subf %357, %362 : vector<16x32xf32>
    %364 = arith.mulf %363, %363 : vector<16x32xf32>
    %cst_156 = arith.constant dense<0.000000e+00> : vector<16xf32>
    %365 = vector.multi_reduction <add>, %364, %cst_156 [1] : vector<16x32xf32> to vector<16xf32>
    %366 = vector.shape_cast %365 : vector<16xf32> to vector<16x1xf32>
    %cst_157 = arith.constant 3.200000e+01 : f32
    %367 = vector.broadcast %cst_157 : f32 to vector<16x1xf32>
    %368 = arith.divf %366, %367 : vector<16x1xf32>
    %369 = vector.broadcast %361 : vector<16x1xf32> to vector<16x32xf32>
    %370 = arith.subf %357, %369 : vector<16x32xf32>
    %cst_158 = arith.constant 1.000000e-07 : f32
    %371 = vector.broadcast %cst_158 : f32 to vector<16x1xf32>
    %372 = arith.addf %368, %371 : vector<16x1xf32>
    %373 = math.rsqrt %372 : vector<16x1xf32>
    %374 = vector.broadcast %373 : vector<16x1xf32> to vector<16x32xf32>
    %375 = arith.mulf %370, %374 : vector<16x32xf32>
    %376 = vector.broadcast %297 : vector<1x32xf32> to vector<16x32xf32>
    %377 = arith.mulf %375, %376 : vector<16x32xf32>
    %378 = vector.broadcast %298 : vector<1x32xf32> to vector<16x32xf32>
    %379 = arith.addf %377, %378 : vector<16x32xf32>
    %380 = arith.truncf %379 : vector<16x32xf32> to vector<16x32xbf16>
    %c2_159 = arith.constant 2 : index
    %c0_160 = arith.constant 0 : index
    %c0_161 = arith.constant 0 : index
    %381 = vector.load %arg4[%c2_159, %c0_160, %c0_161] : memref<4x32x128xbf16, #tpu.memory_space<vmem>>, vector<1x32x64xbf16>
    %382 = vector.shape_cast %381 : vector<1x32x64xbf16> to vector<32x64xbf16>
    %cst_162 = arith.constant dense<0.000000e+00> : vector<16x64xf32>
    %383 = tpu.matmul %380, %382, %cst_162 {dimension_numbers = #tpu.dot_dimension_numbers<[1], [0], [0], [1], [0, 0, 1, 1], [], []>} : vector<16x32xbf16>, vector<32x64xbf16>, vector<16x64xf32> -> vector<16x64xf32>
    %384 = vector.broadcast %299 : vector<1x64xf32> to vector<16x64xf32>
    %385 = arith.addf %383, %384 : vector<16x64xf32>
    %386 = arith.mulf %385, %385 : vector<16x64xf32>
    %387 = arith.mulf %385, %386 : vector<16x64xf32>
    %cst_163 = arith.constant 4.471500e-02 : f32
    %388 = vector.broadcast %cst_163 : f32 to vector<16x64xf32>
    %389 = arith.mulf %388, %387 : vector<16x64xf32>
    %390 = arith.addf %385, %389 : vector<16x64xf32>
    %cst_164 = arith.constant 0.797884583 : f32
    %391 = vector.broadcast %cst_164 : f32 to vector<16x64xf32>
    %392 = arith.mulf %391, %390 : vector<16x64xf32>
    %393 = math.tanh %392 : vector<16x64xf32>
    %cst_165 = arith.constant 1.000000e+00 : f32
    %394 = vector.broadcast %cst_165 : f32 to vector<16x64xf32>
    %395 = arith.addf %394, %393 : vector<16x64xf32>
    %cst_166 = arith.constant 5.000000e-01 : f32
    %396 = vector.broadcast %cst_166 : f32 to vector<16x64xf32>
    %397 = arith.mulf %396, %395 : vector<16x64xf32>
    %398 = arith.mulf %385, %397 : vector<16x64xf32>
    %399 = arith.truncf %398 : vector<16x64xf32> to vector<16x64xbf16>
    %c2_167 = arith.constant 2 : index
    %c0_168 = arith.constant 0 : index
    %c64_169 = arith.constant 64 : index
    %400 = vector.load %arg4[%c2_167, %c0_168, %c64_169] : memref<4x32x128xbf16, #tpu.memory_space<vmem>>, vector<1x32x64xbf16>
    %401 = vector.shape_cast %400 : vector<1x32x64xbf16> to vector<32x64xbf16>
    %cst_170 = arith.constant dense<0.000000e+00> : vector<16x32xf32>
    %402 = tpu.matmul %399, %401, %cst_170 {dimension_numbers = #tpu.dot_dimension_numbers<[1], [1], [0], [0], [0, 0, 1, 0], [], []>} : vector<16x64xbf16>, vector<32x64xbf16>, vector<16x32xf32> -> vector<16x32xf32>
    %403 = vector.broadcast %300 : vector<1x32xf32> to vector<16x32xf32>
    %404 = arith.addf %402, %403 : vector<16x32xf32>
    %405 = arith.addf %379, %404 : vector<16x32xf32>
    %cst_171 = arith.constant dense<0.000000e+00> : vector<16xf32>
    %406 = vector.multi_reduction <add>, %405, %cst_171 [1] : vector<16x32xf32> to vector<16xf32>
    %407 = vector.shape_cast %406 : vector<16xf32> to vector<16x1xf32>
    %cst_172 = arith.constant 3.200000e+01 : f32
    %408 = vector.broadcast %cst_172 : f32 to vector<16x1xf32>
    %409 = arith.divf %407, %408 : vector<16x1xf32>
    %410 = vector.broadcast %409 : vector<16x1xf32> to vector<16x32xf32>
    %411 = arith.subf %405, %410 : vector<16x32xf32>
    %412 = arith.mulf %411, %411 : vector<16x32xf32>
    %cst_173 = arith.constant dense<0.000000e+00> : vector<16xf32>
    %413 = vector.multi_reduction <add>, %412, %cst_173 [1] : vector<16x32xf32> to vector<16xf32>
    %414 = vector.shape_cast %413 : vector<16xf32> to vector<16x1xf32>
    %cst_174 = arith.constant 3.200000e+01 : f32
    %415 = vector.broadcast %cst_174 : f32 to vector<16x1xf32>
    %416 = arith.divf %414, %415 : vector<16x1xf32>
    %417 = vector.broadcast %409 : vector<16x1xf32> to vector<16x32xf32>
    %418 = arith.subf %405, %417 : vector<16x32xf32>
    %cst_175 = arith.constant 1.000000e-07 : f32
    %419 = vector.broadcast %cst_175 : f32 to vector<16x1xf32>
    %420 = arith.addf %416, %419 : vector<16x1xf32>
    %421 = math.rsqrt %420 : vector<16x1xf32>
    %422 = vector.broadcast %421 : vector<16x1xf32> to vector<16x32xf32>
    %423 = arith.mulf %418, %422 : vector<16x32xf32>
    %424 = vector.broadcast %301 : vector<1x32xf32> to vector<16x32xf32>
    %425 = arith.mulf %423, %424 : vector<16x32xf32>
    %426 = vector.broadcast %302 : vector<1x32xf32> to vector<16x32xf32>
    %427 = arith.addf %425, %426 : vector<16x32xf32>
    %428 = arith.addf %294, %427 : vector<16x32xf32>
    %c9 = arith.constant 9 : index
    %c0_176 = arith.constant 0 : index
    %429 = vector.load %arg2[%c9, %c0_176] : memref<16x128xf32, #tpu.memory_space<vmem>>, vector<1x96xf32>
    %c9_177 = arith.constant 9 : index
    %c96_178 = arith.constant 96 : index
    %430 = vector.load %arg2[%c9_177, %c96_178] : memref<16x128xf32, #tpu.memory_space<vmem>>, vector<1x32xf32>
    %c10 = arith.constant 10 : index
    %c0_179 = arith.constant 0 : index
    %431 = vector.load %arg2[%c10, %c0_179] : memref<16x128xf32, #tpu.memory_space<vmem>>, vector<1x32xf32>
    %c10_180 = arith.constant 10 : index
    %c32_181 = arith.constant 32 : index
    %432 = vector.load %arg2[%c10_180, %c32_181] : memref<16x128xf32, #tpu.memory_space<vmem>>, vector<1x32xf32>
    %c10_182 = arith.constant 10 : index
    %c64_183 = arith.constant 64 : index
    %433 = vector.load %arg2[%c10_182, %c64_183] : memref<16x128xf32, #tpu.memory_space<vmem>>, vector<1x64xf32>
    %c11 = arith.constant 11 : index
    %c0_184 = arith.constant 0 : index
    %434 = vector.load %arg2[%c11, %c0_184] : memref<16x128xf32, #tpu.memory_space<vmem>>, vector<1x32xf32>
    %c11_185 = arith.constant 11 : index
    %c32_186 = arith.constant 32 : index
    %435 = vector.load %arg2[%c11_185, %c32_186] : memref<16x128xf32, #tpu.memory_space<vmem>>, vector<1x32xf32>
    %c11_187 = arith.constant 11 : index
    %c64_188 = arith.constant 64 : index
    %436 = vector.load %arg2[%c11_187, %c64_188] : memref<16x128xf32, #tpu.memory_space<vmem>>, vector<1x32xf32>
    %437 = arith.truncf %427 : vector<16x32xf32> to vector<16x32xbf16>
    %c3_189 = arith.constant 3 : index
    %c0_190 = arith.constant 0 : index
    %c0_191 = arith.constant 0 : index
    %438 = vector.load %arg3[%c3_189, %c0_190, %c0_191] : memref<4x32x128xbf16, #tpu.memory_space<vmem>>, vector<1x32x96xbf16>
    %439 = vector.shape_cast %438 : vector<1x32x96xbf16> to vector<32x96xbf16>
    %cst_192 = arith.constant dense<0.000000e+00> : vector<16x96xf32>
    %440 = tpu.matmul %437, %439, %cst_192 {dimension_numbers = #tpu.dot_dimension_numbers<[1], [0], [0], [1], [0, 0, 1, 1], [], []>} : vector<16x32xbf16>, vector<32x96xbf16>, vector<16x96xf32> -> vector<16x96xf32>
    %441 = vector.broadcast %429 : vector<1x96xf32> to vector<16x96xf32>
    %442 = arith.addf %440, %441 : vector<16x96xf32>
    %443 = arith.truncf %442 : vector<16x96xf32> to vector<16x96xbf16>
    %cst_193 = arith.constant 0.000000e+00 : f32
    %444 = vector.broadcast %cst_193 : f32 to vector<16x32xf32>
    %445 = vector.extract_strided_slice %443 {offsets = [0, 0], sizes = [16, 16], strides = [1, 1]} : vector<16x96xbf16> to vector<16x16xbf16>
    %446 = vector.extract_strided_slice %443 {offsets = [0, 32], sizes = [16, 16], strides = [1, 1]} : vector<16x96xbf16> to vector<16x16xbf16>
    %447 = vector.extract_strided_slice %443 {offsets = [0, 64], sizes = [16, 16], strides = [1, 1]} : vector<16x96xbf16> to vector<16x16xbf16>
    %cst_194 = arith.constant dense<0.000000e+00> : vector<16x16xf32>
    %448 = tpu.matmul %445, %446, %cst_194 {dimension_numbers = #tpu.dot_dimension_numbers<[1], [1], [0], [0], [0, 0, 1, 0], [], []>} : vector<16x16xbf16>, vector<16x16xbf16>, vector<16x16xf32> -> vector<16x16xf32>
    %449 = arith.addf %448, %1 : vector<16x16xf32>
    %cst_195 = arith.constant dense<0xFF800000> : vector<16xf32>
    %450 = vector.multi_reduction <maximumf>, %449, %cst_195 [1] : vector<16x16xf32> to vector<16xf32>
    %451 = vector.shape_cast %450 : vector<16xf32> to vector<16x1xf32>
    %452 = vector.broadcast %451 : vector<16x1xf32> to vector<16x16xf32>
    %453 = arith.subf %449, %452 : vector<16x16xf32>
    %454 = math.exp %453 : vector<16x16xf32>
    %cst_196 = arith.constant dense<0.000000e+00> : vector<16xf32>
    %455 = vector.multi_reduction <add>, %454, %cst_196 [1] : vector<16x16xf32> to vector<16xf32>
    %456 = vector.shape_cast %455 : vector<16xf32> to vector<16x1xf32>
    %457 = tpu.reciprocal %456 {approx = true} : vector<16x1xf32> -> vector<16x1xf32>
    %458 = vector.broadcast %457 : vector<16x1xf32> to vector<16x16xf32>
    %459 = arith.mulf %454, %458 : vector<16x16xf32>
    %460 = arith.truncf %459 : vector<16x16xf32> to vector<16x16xbf16>
    %cst_197 = arith.constant dense<0.000000e+00> : vector<16x16xf32>
    %461 = tpu.matmul %460, %447, %cst_197 {dimension_numbers = #tpu.dot_dimension_numbers<[1], [0], [0], [1], [0, 0, 1, 1], [], []>} : vector<16x16xbf16>, vector<16x16xbf16>, vector<16x16xf32> -> vector<16x16xf32>
    %462 = arith.truncf %461 : vector<16x16xf32> to vector<16x16xbf16>
    %c3_198 = arith.constant 3 : index
    %c0_199 = arith.constant 0 : index
    %c96_200 = arith.constant 96 : index
    %463 = vector.load %arg3[%c3_198, %c0_199, %c96_200] : memref<4x32x128xbf16, #tpu.memory_space<vmem>>, vector<1x16x32xbf16>
    %464 = vector.shape_cast %463 : vector<1x16x32xbf16> to vector<16x32xbf16>
    %cst_201 = arith.constant dense<0.000000e+00> : vector<16x32xf32>
    %465 = tpu.matmul %462, %464, %cst_201 {dimension_numbers = #tpu.dot_dimension_numbers<[1], [0], [0], [1], [0, 0, 1, 1], [], []>} : vector<16x16xbf16>, vector<16x32xbf16>, vector<16x32xf32> -> vector<16x32xf32>
    %466 = arith.addf %444, %465 : vector<16x32xf32>
    %467 = vector.extract_strided_slice %443 {offsets = [0, 16], sizes = [16, 16], strides = [1, 1]} : vector<16x96xbf16> to vector<16x16xbf16>
    %468 = vector.extract_strided_slice %443 {offsets = [0, 48], sizes = [16, 16], strides = [1, 1]} : vector<16x96xbf16> to vector<16x16xbf16>
    %469 = vector.extract_strided_slice %443 {offsets = [0, 80], sizes = [16, 16], strides = [1, 1]} : vector<16x96xbf16> to vector<16x16xbf16>
    %cst_202 = arith.constant dense<0.000000e+00> : vector<16x16xf32>
    %470 = tpu.matmul %467, %468, %cst_202 {dimension_numbers = #tpu.dot_dimension_numbers<[1], [1], [0], [0], [0, 0, 1, 0], [], []>} : vector<16x16xbf16>, vector<16x16xbf16>, vector<16x16xf32> -> vector<16x16xf32>
    %471 = arith.addf %470, %1 : vector<16x16xf32>
    %cst_203 = arith.constant dense<0xFF800000> : vector<16xf32>
    %472 = vector.multi_reduction <maximumf>, %471, %cst_203 [1] : vector<16x16xf32> to vector<16xf32>
    %473 = vector.shape_cast %472 : vector<16xf32> to vector<16x1xf32>
    %474 = vector.broadcast %473 : vector<16x1xf32> to vector<16x16xf32>
    %475 = arith.subf %471, %474 : vector<16x16xf32>
    %476 = math.exp %475 : vector<16x16xf32>
    %cst_204 = arith.constant dense<0.000000e+00> : vector<16xf32>
    %477 = vector.multi_reduction <add>, %476, %cst_204 [1] : vector<16x16xf32> to vector<16xf32>
    %478 = vector.shape_cast %477 : vector<16xf32> to vector<16x1xf32>
    %479 = tpu.reciprocal %478 {approx = true} : vector<16x1xf32> -> vector<16x1xf32>
    %480 = vector.broadcast %479 : vector<16x1xf32> to vector<16x16xf32>
    %481 = arith.mulf %476, %480 : vector<16x16xf32>
    %482 = arith.truncf %481 : vector<16x16xf32> to vector<16x16xbf16>
    %cst_205 = arith.constant dense<0.000000e+00> : vector<16x16xf32>
    %483 = tpu.matmul %482, %469, %cst_205 {dimension_numbers = #tpu.dot_dimension_numbers<[1], [0], [0], [1], [0, 0, 1, 1], [], []>} : vector<16x16xbf16>, vector<16x16xbf16>, vector<16x16xf32> -> vector<16x16xf32>
    %484 = arith.truncf %483 : vector<16x16xf32> to vector<16x16xbf16>
    %c3_206 = arith.constant 3 : index
    %c16_207 = arith.constant 16 : index
    %c96_208 = arith.constant 96 : index
    %485 = vector.load %arg3[%c3_206, %c16_207, %c96_208] : memref<4x32x128xbf16, #tpu.memory_space<vmem>>, vector<1x16x32xbf16>
    %486 = vector.shape_cast %485 : vector<1x16x32xbf16> to vector<16x32xbf16>
    %cst_209 = arith.constant dense<0.000000e+00> : vector<16x32xf32>
    %487 = tpu.matmul %484, %486, %cst_209 {dimension_numbers = #tpu.dot_dimension_numbers<[1], [0], [0], [1], [0, 0, 1, 1], [], []>} : vector<16x16xbf16>, vector<16x32xbf16>, vector<16x32xf32> -> vector<16x32xf32>
    %488 = arith.addf %466, %487 : vector<16x32xf32>
    %489 = vector.broadcast %430 : vector<1x32xf32> to vector<16x32xf32>
    %490 = arith.addf %488, %489 : vector<16x32xf32>
    %491 = arith.addf %427, %490 : vector<16x32xf32>
    %cst_210 = arith.constant dense<0.000000e+00> : vector<16xf32>
    %492 = vector.multi_reduction <add>, %491, %cst_210 [1] : vector<16x32xf32> to vector<16xf32>
    %493 = vector.shape_cast %492 : vector<16xf32> to vector<16x1xf32>
    %cst_211 = arith.constant 3.200000e+01 : f32
    %494 = vector.broadcast %cst_211 : f32 to vector<16x1xf32>
    %495 = arith.divf %493, %494 : vector<16x1xf32>
    %496 = vector.broadcast %495 : vector<16x1xf32> to vector<16x32xf32>
    %497 = arith.subf %491, %496 : vector<16x32xf32>
    %498 = arith.mulf %497, %497 : vector<16x32xf32>
    %cst_212 = arith.constant dense<0.000000e+00> : vector<16xf32>
    %499 = vector.multi_reduction <add>, %498, %cst_212 [1] : vector<16x32xf32> to vector<16xf32>
    %500 = vector.shape_cast %499 : vector<16xf32> to vector<16x1xf32>
    %cst_213 = arith.constant 3.200000e+01 : f32
    %501 = vector.broadcast %cst_213 : f32 to vector<16x1xf32>
    %502 = arith.divf %500, %501 : vector<16x1xf32>
    %503 = vector.broadcast %495 : vector<16x1xf32> to vector<16x32xf32>
    %504 = arith.subf %491, %503 : vector<16x32xf32>
    %cst_214 = arith.constant 1.000000e-07 : f32
    %505 = vector.broadcast %cst_214 : f32 to vector<16x1xf32>
    %506 = arith.addf %502, %505 : vector<16x1xf32>
    %507 = math.rsqrt %506 : vector<16x1xf32>
    %508 = vector.broadcast %507 : vector<16x1xf32> to vector<16x32xf32>
    %509 = arith.mulf %504, %508 : vector<16x32xf32>
    %510 = vector.broadcast %431 : vector<1x32xf32> to vector<16x32xf32>
    %511 = arith.mulf %509, %510 : vector<16x32xf32>
    %512 = vector.broadcast %432 : vector<1x32xf32> to vector<16x32xf32>
    %513 = arith.addf %511, %512 : vector<16x32xf32>
    %514 = arith.truncf %513 : vector<16x32xf32> to vector<16x32xbf16>
    %c3_215 = arith.constant 3 : index
    %c0_216 = arith.constant 0 : index
    %c0_217 = arith.constant 0 : index
    %515 = vector.load %arg4[%c3_215, %c0_216, %c0_217] : memref<4x32x128xbf16, #tpu.memory_space<vmem>>, vector<1x32x64xbf16>
    %516 = vector.shape_cast %515 : vector<1x32x64xbf16> to vector<32x64xbf16>
    %cst_218 = arith.constant dense<0.000000e+00> : vector<16x64xf32>
    %517 = tpu.matmul %514, %516, %cst_218 {dimension_numbers = #tpu.dot_dimension_numbers<[1], [0], [0], [1], [0, 0, 1, 1], [], []>} : vector<16x32xbf16>, vector<32x64xbf16>, vector<16x64xf32> -> vector<16x64xf32>
    %518 = vector.broadcast %433 : vector<1x64xf32> to vector<16x64xf32>
    %519 = arith.addf %517, %518 : vector<16x64xf32>
    %520 = arith.mulf %519, %519 : vector<16x64xf32>
    %521 = arith.mulf %519, %520 : vector<16x64xf32>
    %cst_219 = arith.constant 4.471500e-02 : f32
    %522 = vector.broadcast %cst_219 : f32 to vector<16x64xf32>
    %523 = arith.mulf %522, %521 : vector<16x64xf32>
    %524 = arith.addf %519, %523 : vector<16x64xf32>
    %cst_220 = arith.constant 0.797884583 : f32
    %525 = vector.broadcast %cst_220 : f32 to vector<16x64xf32>
    %526 = arith.mulf %525, %524 : vector<16x64xf32>
    %527 = math.tanh %526 : vector<16x64xf32>
    %cst_221 = arith.constant 1.000000e+00 : f32
    %528 = vector.broadcast %cst_221 : f32 to vector<16x64xf32>
    %529 = arith.addf %528, %527 : vector<16x64xf32>
    %cst_222 = arith.constant 5.000000e-01 : f32
    %530 = vector.broadcast %cst_222 : f32 to vector<16x64xf32>
    %531 = arith.mulf %530, %529 : vector<16x64xf32>
    %532 = arith.mulf %519, %531 : vector<16x64xf32>
    %533 = arith.truncf %532 : vector<16x64xf32> to vector<16x64xbf16>
    %c3_223 = arith.constant 3 : index
    %c0_224 = arith.constant 0 : index
    %c64_225 = arith.constant 64 : index
    %534 = vector.load %arg4[%c3_223, %c0_224, %c64_225] : memref<4x32x128xbf16, #tpu.memory_space<vmem>>, vector<1x32x64xbf16>
    %535 = vector.shape_cast %534 : vector<1x32x64xbf16> to vector<32x64xbf16>
    %cst_226 = arith.constant dense<0.000000e+00> : vector<16x32xf32>
    %536 = tpu.matmul %533, %535, %cst_226 {dimension_numbers = #tpu.dot_dimension_numbers<[1], [1], [0], [0], [0, 0, 1, 0], [], []>} : vector<16x64xbf16>, vector<32x64xbf16>, vector<16x32xf32> -> vector<16x32xf32>
    %537 = vector.broadcast %434 : vector<1x32xf32> to vector<16x32xf32>
    %538 = arith.addf %536, %537 : vector<16x32xf32>
    %539 = arith.addf %513, %538 : vector<16x32xf32>
    %cst_227 = arith.constant dense<0.000000e+00> : vector<16xf32>
    %540 = vector.multi_reduction <add>, %539, %cst_227 [1] : vector<16x32xf32> to vector<16xf32>
    %541 = vector.shape_cast %540 : vector<16xf32> to vector<16x1xf32>
    %cst_228 = arith.constant 3.200000e+01 : f32
    %542 = vector.broadcast %cst_228 : f32 to vector<16x1xf32>
    %543 = arith.divf %541, %542 : vector<16x1xf32>
    %544 = vector.broadcast %543 : vector<16x1xf32> to vector<16x32xf32>
    %545 = arith.subf %539, %544 : vector<16x32xf32>
    %546 = arith.mulf %545, %545 : vector<16x32xf32>
    %cst_229 = arith.constant dense<0.000000e+00> : vector<16xf32>
    %547 = vector.multi_reduction <add>, %546, %cst_229 [1] : vector<16x32xf32> to vector<16xf32>
    %548 = vector.shape_cast %547 : vector<16xf32> to vector<16x1xf32>
    %cst_230 = arith.constant 3.200000e+01 : f32
    %549 = vector.broadcast %cst_230 : f32 to vector<16x1xf32>
    %550 = arith.divf %548, %549 : vector<16x1xf32>
    %551 = vector.broadcast %543 : vector<16x1xf32> to vector<16x32xf32>
    %552 = arith.subf %539, %551 : vector<16x32xf32>
    %cst_231 = arith.constant 1.000000e-07 : f32
    %553 = vector.broadcast %cst_231 : f32 to vector<16x1xf32>
    %554 = arith.addf %550, %553 : vector<16x1xf32>
    %555 = math.rsqrt %554 : vector<16x1xf32>
    %556 = vector.broadcast %555 : vector<16x1xf32> to vector<16x32xf32>
    %557 = arith.mulf %552, %556 : vector<16x32xf32>
    %558 = vector.broadcast %435 : vector<1x32xf32> to vector<16x32xf32>
    %559 = arith.mulf %557, %558 : vector<16x32xf32>
    %560 = vector.broadcast %436 : vector<1x32xf32> to vector<16x32xf32>
    %561 = arith.addf %559, %560 : vector<16x32xf32>
    %562 = arith.addf %428, %561 : vector<16x32xf32>
    %cst_232 = arith.constant 2.500000e-01 : f32
    %563 = vector.broadcast %cst_232 : f32 to vector<16x32xf32>
    %564 = arith.mulf %562, %563 : vector<16x32xf32>
    %c0_233 = arith.constant 0 : index
    %c0_234 = arith.constant 0 : index
    %565 = vector.load %arg5[%c0_233, %c0_234] : memref<16x32xf32, #tpu.memory_space<vmem>>, vector<16x32xf32>
    tpu.vector_store %arg5[%c0_233, %c0_234], %564 {strides = array<i32>} : memref<16x32xf32, #tpu.memory_space<vmem>>, vector<16x32xf32>,
    return
  }
}

</mosaic_0001>

<bundles_post_ra>
// kernel: encoder_forward.1
= control target key start
LH: loop header
LB: loop body
LE: loop exit
PB: predicated region body
PF: predicated region fallthrough
CT: control target
= control target key end

     0   :  { %vm27_vm0 = vcmask 261120   ;;  %s2651_s0 = inlined_call_operand.vmem [shape: f32[16,32], index: 0, kind: input, shape index: {}]   ;;  %s2652_s1 = inlined_call_operand.vmem [shape: f32[16,16], index: 1, kind: input, shape index: {}]   ;;  %s2653_s2 = inlined_call_operand.vmem [shape: f32[16,128], index: 2, kind: input, shape index: {}]   ;;  %s2654_s3 = inlined_call_operand.vmem [shape: bf16[4,32,128], index: 3, kind: input, shape index: {}]   ;;  %s2655_s4 = inlined_call_operand.vmem [shape: bf16[4,32,128], index: 4, kind: input, shape index: {}]   ;;  %s2656_s5 = inlined_call_operand.hbm [shape: f32[16,32], index: 5, kind: output, shape index: {}]  }
   0x1   :  { %v22_v0 = vld [vmem:[%s2651_s0] sm:$0xff]  ;;  %v23_v2 = vld [vmem:[%s2651_s0 + $0x8] sm:$0xff] }
   0x2   :  { %v28_v1 = vsel %vm27_vm0, %v22_v0, 0.0 }
   0x3   :  { %29 = vadd.xlane.f32.xlu0 %v28_v1 }
   0x4   :  { %10 = vsyncpa [#allocation3], 0  ;;  %v31_v3 = vsel %vm27_vm0, %v23_v2, 0.0  ;;  %v2173_v4 = vmov 32.0   ;;  %v2014_v7 = vld [vmem:[%s2653_s2 + $0xc] ss:$0 sm:$0xff] }
   0x5   :  { %2027 = vrcp.f32 %v2173_v4  ;;  %s2174_s24 = smov 96   ;;  %v2234_v22 = vld [vmem:[%s2654_s3 + $0x8] sm:$0xff]  ;;  %v1984_v25 = vld [vmem:[%s2654_s3] sm:$0xff]  ;;  %s2175_s30 = smov 112   ;;  %vm135_vm8 = vcmask 130048   ;;  %vm437_vm15 = vcmask 523264  }
   0x6   :  { %83 = vrot.lane.b32.xlu2 %v2014_v7, %s2174_s24  ;;  %118 = vmatpush.bf16.msra.mxu0 %v2234_v22  ;;  %v2252_v53 = vld [vmem:[%s2653_s2] ss:$0 sm:$0xff]  ;;  %s2176_s6 = smov 80   ;;  %s2177_s11 = smov 64  }
   0x7   :  { %s2178_s12 = smov 48   ;;  %s2179_s13 = smov 32  }
   0x8   :  { %s2181_s7 = smov 128   ;;  %s2182_s8 = smov 8  }
   0xa   :  { %119 = vmatpush.bf16.msra.mxu0 %v1984_v25 }
   0xb   :  { %32 = vadd.xlane.f32.xlu0 %v31_v3  ;;  %v2028_v5 = vpop.eup %2027  ;;  %v2272_v3 = vld [vmem:[%s2652_s1] sm:$0xff] }
   0xc   :  { %v35_v6 = vmul.f32 32.0, %v2028_v5  ;;  %vm39_vm1 = vweird.f32 %v2028_v5 }
   0xe   :  { %v36_v8 = vsub.f32 1.0, %v35_v6 }
  0x10   :  { %v37_v9 = vmul.f32 %v2028_v5, %v36_v8 }
  0x12   :  { %v38_v10 = vadd.f32 %v2028_v5, %v37_v9 }
  0x14   :  { %v2225_v11 = vsel %vm39_vm1, %v2028_v5, %v38_v10 }
  0x60   :  { %v84_v47 = vpop.permute.xlu2 %83 }
  0x76   :  { %v30_v12 = vpop.xlane.xlu0 %29 }
  0x77   :  { %v41_v13 = vmul.f32 %v2225_v11, %v30_v12 }
  0x79   :  { %v43_v14 = vsub.f32 %v22_v0, %v41_v13 }
  0x7b   :  { %v45_v15 = vmul.f32 %v43_v14, %v43_v14 }
  0x7d   :  { %v47_v16 = vsel %vm27_vm0, %v45_v15, 0.0 }
  0x7e   :  { %48 = vadd.xlane.f32.xlu1 %v47_v16  ;;  %v33_v17 = vpop.xlane.xlu0 %32 }
  0x7f   :  { %v42_v18 = vmul.f32 %v2225_v11, %v33_v17 }
  0x81   :  { %v44_v19 = vsub.f32 %v23_v2, %v42_v18 }
  0x83   :  { %v46_v20 = vmul.f32 %v44_v19, %v44_v19 }
  0x85   :  { %v50_v21 = vsel %vm27_vm0, %v46_v20, 0.0 }
  0x86   :  { %51 = vadd.xlane.f32.xlu1 %v50_v21 }
  0xf1   :  { %v49_v23 = vpop.xlane.xlu1 %48 }
  0xf2   :  { %v53_v24 = vmul.f32 %v49_v23, %v2225_v11 }
  0xf4   :  { %v55_v26 = vadd.f32 1e-07, %v53_v24 }
  0xf6   :  { %2029 = vrsqrt.f32 %v55_v26  ;;  %vm63_vm3 = vweird.f32 %v55_v26 }
  0xf9   :  { %v52_v27 = vpop.xlane.xlu1 %51 }
  0xfa   :  { %v54_v28 = vmul.f32 %v52_v27, %v2225_v11 }
  0xfc   :  { %v2030_v29 = vpop.eup %2029  ;;  %v56_v30 = vadd.f32 1e-07, %v54_v28 }
  0xfd   :  { %v58_v31 = vmul.f32 %v2030_v29, %v55_v26  ;;  %vm64_vm2 = vweird.f32 %v2030_v29 }
  0xfe   :  { %2031 = vrsqrt.f32 %v56_v30  ;;  %vm65_vm4 = vmor %vm63_vm3, %vm64_vm2  ;;  %vm73_vm6 = vweird.f32 %v56_v30 }
  0xff   :  { %v59_v32 = vmul.f32 %v2030_v29, %v58_v31 }
 0x101   :  { %v60_v33 = vmul.f32 0.5, %v59_v32 }
 0x103   :  { %v61_v34 = vsub.f32 1.5, %v60_v33 }
 0x104   :  { %v2032_v35 = vpop.eup %2031 }
 0x105   :  { %v62_v36 = vmul.f32 %v2030_v29, %v61_v34  ;;  %v68_v37 = vmul.f32 %v2032_v35, %v56_v30  ;;  %vm74_vm5 = vweird.f32 %v2032_v35 }
 0x106   :  { %vm75_vm7 = vmor %vm73_vm6, %vm74_vm5 }
 0x107   :  { %v69_v38 = vmul.f32 %v2032_v35, %v68_v37  ;;  %v66_v40 = vsel %vm65_vm4, %v2030_v29, %v62_v36 }
 0x108   :  { %v77_v42 = vmul.f32 %v66_v40, %v43_v14 }
 0x109   :  { %v70_v39 = vmul.f32 0.5, %v69_v38 }
 0x10a   :  { %v80_v46 = vmul.f32 %v2014_v7, %v77_v42  ;;  %v1986_v42 = vld [vmem:[%s2654_s3] sm:$0xff] }
 0x10b   :  { %v71_v41 = vsub.f32 1.5, %v70_v39 }
 0x10c   :  { %v2242_v49 = vadd.f32 %v84_v47, %v80_v46 }
 0x10d   :  { %v72_v43 = vmul.f32 %v2032_v35, %v71_v41 }
 0x10f   :  { %v76_v44 = vsel %vm75_vm7, %v2032_v35, %v72_v43 }
 0x110   :  { %v78_v45 = vmul.f32 %v76_v44, %v44_v19 }
 0x112   :  { %v81_v48 = vmul.f32 %v2014_v7, %v78_v45  ;;  %v2279_v7 = vld [vmem:[%s2652_s1 + $0x8] sm:$0xff] }
 0x114   :  { %v2244_v50 = vadd.f32 %v84_v47, %v81_v48 }
 0x116   :  { %v91_v51 = vpack.c.bf16 %v2244_v50, %v2242_v49 }
 0x118   :  { %1846 = vmatmul.msk.bf16.vlgmr.msra.gmra.mxu0 %vm27_vm0, %v91_v51 }
 0x195   :  { %v121_v52 = vpop.f32.mrf.mxu0 }
 0x196   :  { %v122_v54 = vadd.f32 %v2252_v53, %v121_v52 }
 0x198   :  { %v126_v56 = vpack.c.bf16 %v122_v54, %v122_v54 }
 0x19a   :  { %v130_v59 = vunpack.c.l.b16 %v126_v56 }
 0x19d   :  { %v123_v55 = vpop.f32.mrf.mxu0 }
 0x19e   :  { %v124_v57 = vadd.f32 %v2252_v53, %v123_v55 }
 0x1a0   :  { %v127_v58 = vpack.c.bf16 %v124_v57, %v124_v57 }
 0x1a2   :  { %v131_v60 = vunpack.c.l.b16 %v127_v58 }
 0x1a4   :  { %v2256_v61 = vpack.c.b16 %v131_v60, %v130_v59 }
 0x1a6   :  { %202 = vrot.lane.b32.xlu1 %v2256_v61, %s2175_s30  ;;  %204 = vrot.lane.b32.xlu0 %v2256_v61, %s2176_s6 }
 0x1a7   :  { %133 = vrot.lane.b32.xlu2 %v2256_v61, %s2174_s24 }
 0x201   :  { %v134_v62 = vpop.permute.xlu2 %133 }
 0x202   :  { %v140_v63 = vsel %vm135_vm8, %v134_v62, 0 }
 0x203   :  { %149 = vmatpush.bf16.xpose.msra.mxu1 %v140_v63 }
 0x20a   :  { %1847 = vmatmul.msk.bf16.vlgmr.msra.gmra.mxu1 %vm135_vm8, %v2256_v61 }
 0x218   :  { %v205_v0 = vpop.permute.xlu0 %204  ;;  %v203_v2 = vpop.permute.xlu1 %202 }
 0x219   :  { %v210_v1 = vsel %vm135_vm8, %v205_v0, 0 }
 0x21a   :  { %219 = vmatpush.bf16.xpose.msra.mxu3 %v210_v1 }
 0x221   :  { %1849 = vmatmul.msk.bf16.vlgmr.msra.gmra.mxu3 %vm135_vm8, %v203_v2 }
 0x287   :  { %v151_v4 = vpop.f32.mrf.mxu1 }
 0x288   :  { %v152_v5 = vadd.f32 %v151_v4, %v2272_v3 }
 0x28a   :  { %v156_v6 = vsel %vm135_vm8, %v152_v5, -inf }
 0x28b   :  { %157 = vmax.xlane.f32.xlu2 %v156_v6 }
 0x28f   :  { %v153_v8 = vpop.f32.mrf.mxu1 }
 0x290   :  { %v154_v9 = vadd.f32 %v153_v8, %v2279_v7 }
 0x292   :  { %v159_v10 = vsel %vm135_vm8, %v154_v9, -inf }
 0x293   :  { %160 = vmax.xlane.f32.xlu0 %v159_v10 }
 0x2a4   :  { %v221_v12 = vpop.f32.mrf.mxu3 }
 0x2a5   :  { %v222_v13 = vadd.f32 %v221_v12, %v2272_v3 }
 0x2a7   :  { %179 = vrot.lane.b32.xlu0 %v2256_v61, %s2177_s11  ;;  %v226_v14 = vsel %vm135_vm8, %v222_v13, -inf }
 0x2a8   :  { %227 = vmax.xlane.f32.xlu1 %v226_v14 }
 0x2ac   :  { %v223_v15 = vpop.f32.mrf.mxu3 }
 0x2ad   :  { %v224_v16 = vadd.f32 %v223_v15, %v2279_v7 }
 0x2af   :  { %v229_v17 = vsel %vm135_vm8, %v224_v16, -inf  ;;  %295 = vrot.lane.b32.xlu0 %v1986_v42, %s2179_s13 }
 0x2b0   :  { %230 = vmax.xlane.f32.xlu2 %v229_v17  ;;  %v2016_v17 = vld [vmem:[%s2653_s2 + $0x1] ss:$0 sm:$0xff] }
 0x2b7   :  { %316 = vrot.lane.b32.xlu0 %v2252_v53, %s2179_s13 }
 0x2fe   :  { %v158_v18 = vpop.xlane.xlu2 %157 }
 0x2ff   :  { %v162_v19 = vsub.f32 %v152_v5, %v158_v18 }
 0x301   :  { %v164_v20 = vmul.f32 1.442695, %v162_v19 }
 0x303   :  { %2033 = vpow2.f32 %v164_v20 }
 0x306   :  { %v161_v24 = vpop.xlane.xlu0 %160 }
 0x307   :  { %v163_v28 = vsub.f32 %v154_v9, %v161_v24 }
 0x309   :  { %v2034_v21 = vpop.eup %2033  ;;  %v166_v30 = vmul.f32 1.442695, %v163_v28 }
 0x30a   :  { %v168_v23 = vsel %vm135_vm8, %v2034_v21, 0.0 }
 0x30b   :  { %169 = vadd.xlane.f32.xlu2 %v168_v23 }
 0x319   :  { %v180_v25 = vpop.permute.xlu0 %179 }
 0x31a   :  { %192 = vmatpush.bf16.msra.mxu2 %v180_v25 }
 0x31b   :  { %v228_v26 = vpop.xlane.xlu1 %227 }
 0x31c   :  { %v232_v27 = vsub.f32 %v222_v13, %v228_v26 }
 0x31e   :  { %v234_v29 = vmul.f32 1.442695, %v232_v27  ;;  %v1988_v27 = vld [vmem:[%s2655_s4 + $0x8] sm:$0xff] }
 0x31f   :  { %405 = vmatpush.bf16.msrb.mxu3 %v1988_v27 }
 0x320   :  { %2035 = vpow2.f32 %v234_v29 }
 0x321   :  { %2037 = vpow2.f32 %v166_v30  ;;  %v296_v58 = vpop.permute.xlu0 %295  ;;  %v1987_v30 = vld [vmem:[%s2655_s4] sm:$0xff] }
 0x322   :  { %308 = vmatpush.bf16.msrb.mxu1 %v296_v58 }
 0x323   :  { %v231_v31 = vpop.xlane.xlu2 %230  ;;  %406 = vmatpush.bf16.msrb.mxu3 %v1987_v30 }
 0x324   :  { %v233_v32 = vsub.f32 %v224_v16, %v231_v31 }
 0x326   :  { %v2036_v33 = vpop.eup %2035  ;;  %v236_v34 = vmul.f32 1.442695, %v233_v32 }
 0x327   :  { %v238_v35 = vsel %vm135_vm8, %v2036_v33, 0.0  ;;  %v2038_v36 = vpop.eup %2037 }
 0x328   :  { %2039 = vpow2.f32 %v236_v34  ;;  %239 = vadd.xlane.f32.xlu2 %v238_v35  ;;  %v171_v38 = vsel %vm135_vm8, %v2038_v36, 0.0 }
 0x329   :  { %v317_v4 = vpop.permute.xlu0 %316 }
 0x32e   :  { %v2040_v37 = vpop.eup %2039 }
 0x32f   :  { %v241_v39 = vsel %vm135_vm8, %v2040_v37, 0.0 }
 0x330   :  { %172 = vadd.xlane.f32.xlu2 %v171_v38  ;;  %242 = vadd.xlane.f32.xlu1 %v241_v39 }
 0x348   :  { %249 = vrot.lane.b32.xlu2 %v2256_v61, %s2178_s12 }
 0x349   :  { %270 = vrot.lane.b32.xlu1 %v2234_v22, %s2179_s13 }
 0x37e   :  { %v170_v40 = vpop.xlane.xlu2 %169 }
 0x37f   :  { %2041 = vrcp.f32 %v170_v40 }
 0x385   :  { %v2042_v44 = vpop.eup %2041 }
 0x386   :  { %v176_v47 = vmul.f32 %v2042_v44, %v2034_v21 }
 0x39b   :  { %v240_v41 = vpop.xlane.xlu2 %239 }
 0x3a3   :  { %v173_v43 = vpop.xlane.xlu2 %172  ;;  %v243_v48 = vpop.xlane.xlu1 %242 }
 0x3a4   :  { %2043 = vrcp.f32 %v173_v43 }
 0x3a5   :  { %2045 = vrcp.f32 %v243_v48 }
 0x3a6   :  { %2047 = vrcp.f32 %v240_v41 }
 0x3aa   :  { %v2044_v45 = vpop.eup %2043 }
 0x3ab   :  { %v250_v46 = vpop.permute.xlu2 %249  ;;  %v177_v22 = vmul.f32 %v2044_v45, %v2038_v36  ;;  %v2046_v52 = vpop.eup %2045 }
 0x3ac   :  { %262 = vmatpush.bf16.msrb.mxu2 %v250_v46  ;;  %v2048_v54 = vpop.eup %2047  ;;  %v247_v55 = vmul.f32 %v2046_v52, %v2040_v37 }
 0x3ad   :  { %v178_v51 = vpack.c.bf16 %v177_v22, %v176_v47  ;;  %v246_v56 = vmul.f32 %v2048_v54, %v2036_v33 }
 0x3af   :  { %1848 = vmatmul.msk.bf16.vlgmr.msra.gmra.mxu2 %vm135_vm8, %v178_v51  ;;  %v248_v57 = vpack.c.bf16 %v247_v55, %v246_v56 }
 0x3bb   :  { %v271_v53 = vpop.permute.xlu1 %270 }
 0x3bc   :  { %283 = vmatpush.bf16.msrb.mxu0 %v271_v53 }
 0x3bf   :  { %1850 = vmatmul.msk.bf16.vlgmr.msrb.gmra.mxu2 %vm135_vm8, %v248_v57 }
 0x432   :  { %v194_v59 = vpop.f32.mrf.mxu2 }
 0x43a   :  { %v196_v60 = vpop.f32.mrf.mxu2 }
 0x43b   :  { %v199_v61 = vpack.c.bf16 %v196_v60, %v194_v59 }
 0x43d   :  { %1856 = vmatmul.msk.bf16.vlgmr.msrb.gmra.mxu1 %vm135_vm8, %v199_v61 }
 0x442   :  { %v264_v62 = vpop.f32.mrf.mxu2 }
 0x44a   :  { %v266_v63 = vpop.f32.mrf.mxu2 }
 0x44b   :  { %v269_v0 = vpack.c.bf16 %v266_v63, %v264_v62 }
 0x44d   :  { %1851 = vmatmul.msk.bf16.vlgmr.msrb.gmra.mxu0 %vm135_vm8, %v269_v0 }
 0x4ba   :  { %v310_v1 = vpop.f32.mrf.mxu1 }
 0x4c2   :  { %v312_v10 = vpop.f32.mrf.mxu1 }
 0x4ca   :  { %v285_v2 = vpop.f32.mrf.mxu0 }
 0x4cb   :  { %v311_v5 = vadd.f32 %v310_v1, %v285_v2 }
 0x4cd   :  { %v319_v6 = vadd.f32 %v317_v4, %v311_v5 }
 0x4cf   :  { %v321_v8 = vadd.f32 %v319_v6, %v2242_v49 }
 0x4d1   :  { %v323_v9 = vsel %vm27_vm0, %v321_v8, 0.0 }
 0x4d2   :  { %324 = vadd.xlane.f32.xlu2 %v323_v9  ;;  %v287_v12 = vpop.f32.mrf.mxu0 }
 0x4d3   :  { %v313_v13 = vadd.f32 %v312_v10, %v287_v12 }
 0x4d5   :  { %v320_v14 = vadd.f32 %v317_v4, %v313_v13 }
 0x4d7   :  { %v322_v15 = vadd.f32 %v320_v14, %v2244_v50 }
 0x4d9   :  { %v326_v16 = vsel %vm27_vm0, %v322_v15, 0.0 }
 0x4da   :  { %327 = vadd.xlane.f32.xlu0 %v326_v16 }
 0x4ee   :  { %371 = vrot.lane.b32.xlu0 %v2016_v17, %s2174_s24 }
 0x4f6   :  { %433 = vrot.lane.b32.xlu0 %v1987_v30, %s2177_s11 }
 0x545   :  { %v325_v18 = vpop.xlane.xlu2 %324 }
 0x546   :  { %v329_v49 = vmul.f32 %v325_v18, %v2225_v11 }
 0x548   :  { %v331_v19 = vsub.f32 %v321_v8, %v329_v49 }
 0x54a   :  { %v333_v20 = vmul.f32 %v331_v19, %v331_v19 }
 0x54c   :  { %v335_v21 = vsel %vm27_vm0, %v333_v20, 0.0 }
 0x54d   :  { %336 = vadd.xlane.f32.xlu1 %v335_v21  ;;  %v328_v23 = vpop.xlane.xlu0 %327 }
 0x54e   :  { %v330_v50 = vmul.f32 %v328_v23, %v2225_v11 }
 0x550   :  { %v332_v24 = vsub.f32 %v322_v15, %v330_v50 }
 0x552   :  { %v334_v25 = vmul.f32 %v332_v24, %v332_v24 }
 0x554   :  { %v338_v26 = vsel %vm27_vm0, %v334_v25, 0.0 }
 0x555   :  { %339 = vadd.xlane.f32.xlu2 %v338_v26 }
 0x560   :  { %v372_v54 = vpop.permute.xlu0 %371 }
 0x566   :  { %393 = vrot.lane.b32.xlu1 %v2016_v17, %s2177_s11 }
 0x568   :  { %v434_v60 = vpop.permute.xlu0 %433 }
 0x569   :  { %v442_v61 = vsel %vm437_vm15, %v434_v60, 0 }
 0x56d   :  { %435 = vrot.lane.b32.xlu2 %v1988_v27, %s2177_s11 }
 0x5c0   :  { %v337_v28 = vpop.xlane.xlu1 %336 }
 0x5c1   :  { %v341_v29 = vmul.f32 %v337_v28, %v2225_v11 }
 0x5c3   :  { %v343_v31 = vadd.f32 1e-07, %v341_v29 }
 0x5c5   :  { %2049 = vrsqrt.f32 %v343_v31  ;;  %vm351_vm10 = vweird.f32 %v343_v31 }
 0x5c8   :  { %v340_v32 = vpop.xlane.xlu2 %339 }
 0x5c9   :  { %v342_v33 = vmul.f32 %v340_v32, %v2225_v11 }
 0x5cb   :  { %v2050_v34 = vpop.eup %2049  ;;  %v344_v35 = vadd.f32 1e-07, %v342_v33 }
 0x5cc   :  { %v346_v36 = vmul.f32 %v2050_v34, %v343_v31  ;;  %vm352_vm9 = vweird.f32 %v2050_v34 }
 0x5cd   :  { %2051 = vrsqrt.f32 %v344_v35  ;;  %vm353_vm11 = vmor %vm351_vm10, %vm352_vm9  ;;  %vm361_vm13 = vweird.f32 %v344_v35 }
 0x5ce   :  { %v347_v37 = vmul.f32 %v2050_v34, %v346_v36 }
 0x5d0   :  { %v348_v38 = vmul.f32 0.5, %v347_v37  ;;  %v436_v53 = vpop.permute.xlu2 %435 }
 0x5d1   :  { %v445_v59 = vsel %vm437_vm15, %v436_v53, 0 }
 0x5d2   :  { %v349_v39 = vsub.f32 1.5, %v348_v38  ;;  %453 = vmatpush.bf16.xpose.msra.mxu2 %v445_v59 }
 0x5d3   :  { %v2052_v40 = vpop.eup %2051 }
 0x5d4   :  { %v350_v41 = vmul.f32 %v2050_v34, %v349_v39  ;;  %v356_v42 = vmul.f32 %v2052_v40, %v344_v35  ;;  %vm362_vm12 = vweird.f32 %v2052_v40 }
 0x5d5   :  { %vm363_vm14 = vmor %vm361_vm13, %vm362_vm12 }
 0x5d6   :  { %v357_v43 = vmul.f32 %v2052_v40, %v356_v42  ;;  %v354_v45 = vsel %vm353_vm11, %v2050_v34, %v350_v41 }
 0x5d7   :  { %v365_v47 = vmul.f32 %v354_v45, %v331_v19 }
 0x5d8   :  { %v358_v44 = vmul.f32 0.5, %v357_v43  ;;  %v394_v62 = vpop.permute.xlu1 %393  ;;  %v2348_v43 = vld [vmem:[%s2654_s3 + $0x18] sm:$0xff] }
 0x5d9   :  { %v368_v52 = vmul.f32 %v2016_v17, %v365_v47  ;;  %551 = vmatpush.bf16.msra.mxu0 %v2348_v43 }
 0x5da   :  { %v359_v46 = vsub.f32 1.5, %v358_v44  ;;  %454 = vmatpush.bf16.xpose.msra.mxu2 %v442_v61 }
 0x5db   :  { %v374_v56 = vadd.f32 %v372_v54, %v368_v52 }
 0x5dc   :  { %v360_v22 = vmul.f32 %v2052_v40, %v359_v46  ;;  %v1989_v46 = vld [vmem:[%s2654_s3 + $0x10] sm:$0xff] }
 0x5dd   :  { %552 = vmatpush.bf16.msra.mxu0 %v1989_v46 }
 0x5de   :  { %v364_v48 = vsel %vm363_vm14, %v2052_v40, %v360_v22 }
 0x5df   :  { %v366_v51 = vmul.f32 %v364_v48, %v332_v24  ;;  %v2017_v24 = vld [vmem:[%s2653_s2 + $0x2] ss:$0 sm:$0xff] }
 0x5e1   :  { %v369_v55 = vmul.f32 %v2016_v17, %v366_v51 }
 0x5e3   :  { %v375_v57 = vadd.f32 %v372_v54, %v369_v55 }
 0x5e5   :  { %v376_v58 = vpack.c.bf16 %v375_v57, %v374_v56 }
 0x5e7   :  { %1865 = vmatmul.msk.bf16.vlgmr.msrb.gmra.mxu3 %vm27_vm0, %v376_v58 }
 0x66a   :  { %v408_v63 = vpop.f32.mrf.mxu3 }
 0x66b   :  { %v409_v0 = vadd.f32 %v408_v63, %v394_v62 }
 0x66d   :  { %v413_v1 = vmul.f32 %v409_v0, %v409_v0 }
 0x66f   :  { %v415_v2 = vmul.f32 %v413_v1, %v409_v0 }
 0x671   :  { %v417_v4 = vmul.f32 0.044715, %v415_v2 }
 0x672   :  { %v410_v5 = vpop.f32.mrf.mxu3 }
 0x673   :  { %v419_v6 = vadd.f32 %v417_v4, %v409_v0  ;;  %v411_v8 = vadd.f32 %v410_v5, %v394_v62 }
 0x675   :  { %v421_v9 = vmul.f32 0.7978846, %v419_v6  ;;  %v414_v10 = vmul.f32 %v411_v8, %v411_v8 }
 0x677   :  { %v416_v12 = vmul.f32 %v414_v10, %v411_v8  ;;  %2053 = vtanh.f32 %v421_v9 }
 0x679   :  { %v418_v13 = vmul.f32 0.044715, %v416_v12 }
 0x67b   :  { %v420_v14 = vadd.f32 %v418_v13, %v411_v8 }
 0x67d   :  { %v422_v15 = vmul.f32 0.7978846, %v420_v14  ;;  %v2054_v16 = vpop.eup %2053 }
 0x67e   :  { %v425_v17 = vadd.f32 1.0, %v2054_v16 }
 0x67f   :  { %2055 = vtanh.f32 %v422_v15  ;;  %v2018_v15 = vld [vmem:[%s2653_s2 + $0x3] ss:$0 sm:$0xff] }
 0x680   :  { %v427_v49 = vmul.f32 0.5, %v425_v17 }
 0x682   :  { %v429_v21 = vmul.f32 %v427_v49, %v409_v0 }
 0x685   :  { %v2056_v18 = vpop.eup %2055 }
 0x686   :  { %v426_v19 = vadd.f32 1.0, %v2056_v18 }
 0x688   :  { %v428_v20 = vmul.f32 0.5, %v426_v19 }
 0x68a   :  { %v430_v23 = vmul.f32 %v428_v20, %v411_v8 }
 0x68c   :  { %v431_v50 = vpack.c.bf16 %v430_v23, %v429_v21 }
 0x68e   :  { %1866 = vmatmul.msk.bf16.vlgmr.msra.gmra.mxu2 %vm437_vm15, %v431_v50 }
 0x711   :  { %v456_v25 = vpop.f32.mrf.mxu2 }
 0x712   :  { %v457_v26 = vadd.f32 %v2017_v24, %v456_v25 }
 0x714   :  { %v461_v27 = vadd.f32 %v457_v26, %v374_v56 }
 0x716   :  { %v463_v28 = vsel %vm27_vm0, %v461_v27, 0.0 }
 0x717   :  { %464 = vadd.xlane.f32.xlu1 %v463_v28 }
 0x719   :  { %v458_v29 = vpop.f32.mrf.mxu2 }
 0x71a   :  { %v459_v30 = vadd.f32 %v2017_v24, %v458_v29 }
 0x71c   :  { %v462_v31 = vadd.f32 %v459_v30, %v375_v57 }
 0x71e   :  { %v466_v32 = vsel %vm27_vm0, %v462_v31, 0.0 }
 0x71f   :  { %467 = vadd.xlane.f32.xlu0 %v466_v32 }
 0x733   :  { %508 = vrot.lane.b32.xlu0 %v2017_v24, %s2174_s24 }
 0x78a   :  { %v465_v33 = vpop.xlane.xlu1 %464 }
 0x78b   :  { %v469_v34 = vmul.f32 %v465_v33, %v2225_v11 }
 0x78d   :  { %v471_v35 = vsub.f32 %v461_v27, %v469_v34 }
 0x78f   :  { %v473_v36 = vmul.f32 %v471_v35, %v471_v35 }
 0x791   :  { %v475_v37 = vsel %vm27_vm0, %v473_v36, 0.0 }
 0x792   :  { %v468_v38 = vpop.xlane.xlu0 %467  ;;  %476 = vadd.xlane.f32.xlu2 %v475_v37 }
 0x793   :  { %v470_v39 = vmul.f32 %v468_v38, %v2225_v11 }
 0x795   :  { %v472_v40 = vsub.f32 %v462_v31, %v470_v39 }
 0x797   :  { %v474_v41 = vmul.f32 %v472_v40, %v472_v40 }
 0x799   :  { %v478_v42 = vsel %vm27_vm0, %v474_v41, 0.0 }
 0x79a   :  { %479 = vadd.xlane.f32.xlu1 %v478_v42 }
 0x7a5   :  { %v509_v1 = vpop.permute.xlu0 %508 }
 0x7aa   :  { %513 = vrot.lane.b32.xlu2 %v2017_v24, %s2177_s11 }
 0x805   :  { %v477_v44 = vpop.xlane.xlu2 %476 }
 0x806   :  { %v481_v45 = vmul.f32 %v477_v44, %v2225_v11 }
 0x808   :  { %v483_v47 = vadd.f32 1e-07, %v481_v45 }
 0x80a   :  { %2057 = vrsqrt.f32 %v483_v47  ;;  %vm491_vm2 = vweird.f32 %v483_v47 }
 0x80d   :  { %v480_v22 = vpop.xlane.xlu1 %479  ;;  %v514_v8 = vpop.permute.xlu2 %513 }
 0x80e   :  { %v482_v48 = vmul.f32 %v480_v22, %v2225_v11 }
 0x810   :  { %v2058_v51 = vpop.eup %2057  ;;  %v484_v52 = vadd.f32 1e-07, %v482_v48 }
 0x811   :  { %v486_v54 = vmul.f32 %v2058_v51, %v483_v47  ;;  %vm492_vm1 = vweird.f32 %v2058_v51 }
 0x812   :  { %2059 = vrsqrt.f32 %v484_v52  ;;  %vm493_vm3 = vmor %vm491_vm2, %vm492_vm1  ;;  %vm501_vm5 = vweird.f32 %v484_v52 }
 0x813   :  { %v487_v55 = vmul.f32 %v2058_v51, %v486_v54 }
 0x815   :  { %v488_v56 = vmul.f32 0.5, %v487_v55 }
 0x817   :  { %v489_v57 = vsub.f32 1.5, %v488_v56 }
 0x818   :  { %v2060_v58 = vpop.eup %2059 }
 0x819   :  { %v496_v53 = vmul.f32 %v2060_v58, %v484_v52  ;;  %v490_v59 = vmul.f32 %v2058_v51, %v489_v57  ;;  %vm502_vm4 = vweird.f32 %v2060_v58 }
 0x81a   :  { %vm503_vm6 = vmor %vm501_vm5, %vm502_vm4 }
 0x81b   :  { %v497_v60 = vmul.f32 %v2060_v58, %v496_v53  ;;  %v494_v62 = vsel %vm493_vm3, %v2058_v51, %v490_v59 }
 0x81c   :  { %v505_v0 = vmul.f32 %v494_v62, %v471_v35 }
 0x81d   :  { %v498_v61 = vmul.f32 0.5, %v497_v60 }
 0x81e   :  { %v511_v6 = vmul.f32 %v509_v1, %v505_v0 }
 0x81f   :  { %v499_v63 = vsub.f32 1.5, %v498_v61  ;;  %v1991_v61 = vld [vmem:[%s2654_s3 + $0x10] sm:$0xff] }
 0x820   :  { %v2356_v10 = vadd.f32 %v514_v8, %v511_v6 }
 0x821   :  { %v500_v2 = vmul.f32 %v2060_v58, %v499_v63 }
 0x823   :  { %v504_v4 = vsel %vm503_vm6, %v2060_v58, %v500_v2 }
 0x824   :  { %v506_v5 = vmul.f32 %v504_v4, %v472_v40 }
 0x826   :  { %v512_v9 = vmul.f32 %v509_v1, %v506_v5 }
 0x828   :  { %v2358_v12 = vadd.f32 %v514_v8, %v512_v9 }
 0x82a   :  { %v523_v13 = vpack.c.bf16 %v2358_v12, %v2356_v10 }
 0x82c   :  { %1879 = vmatmul.msk.bf16.vlgmr.msra.gmra.mxu0 %vm27_vm0, %v523_v13 }
 0x8a9   :  { %v554_v14 = vpop.f32.mrf.mxu0 }
 0x8aa   :  { %v555_v16 = vadd.f32 %v2018_v15, %v554_v14 }
 0x8ac   :  { %v559_v18 = vpack.c.bf16 %v555_v16, %v555_v16 }
 0x8ae   :  { %v563_v20 = vunpack.c.l.b16 %v559_v18 }
 0x8b1   :  { %v556_v17 = vpop.f32.mrf.mxu0 }
 0x8b2   :  { %v557_v49 = vadd.f32 %v2018_v15, %v556_v17 }
 0x8b4   :  { %v560_v19 = vpack.c.bf16 %v557_v49, %v557_v49 }
 0x8b6   :  { %v564_v21 = vunpack.c.l.b16 %v560_v19 }
 0x8b8   :  { %v565_v23 = vpack.c.b16 %v564_v21, %v563_v20 }
 0x8ba   :  { %634 = vrot.lane.b32.xlu2 %v565_v23, %s2175_s30  ;;  %636 = vrot.lane.b32.xlu0 %v565_v23, %s2176_s6 }
 0x8bb   :  { %566 = vrot.lane.b32.xlu1 %v565_v23, %s2174_s24 }
 0x914   :  { %v635_v27 = vpop.permute.xlu2 %634 }
 0x92c   :  { %v637_v50 = vpop.permute.xlu0 %636 }
 0x92d   :  { %v642_v24 = vsel %vm135_vm8, %v637_v50, 0  ;;  %v567_v25 = vpop.permute.xlu1 %566 }
 0x92e   :  { %v572_v26 = vsel %vm135_vm8, %v567_v25, 0  ;;  %651 = vmatpush.bf16.xpose.msrb.mxu2 %v642_v24 }
 0x92f   :  { %581 = vmatpush.bf16.xpose.msra.mxu1 %v572_v26 }
 0x935   :  { %1884 = vmatmul.msk.bf16.vlgmr.msrb.gmra.mxu2 %vm135_vm8, %v635_v27 }
 0x936   :  { %1880 = vmatmul.msk.bf16.vlgmr.msra.gmra.mxu1 %vm135_vm8, %v565_v23 }
 0x9b3   :  { %v583_v28 = vpop.f32.mrf.mxu1 }
 0x9b4   :  { %v584_v29 = vadd.f32 %v583_v28, %v2272_v3 }
 0x9b6   :  { %v588_v30 = vsel %vm135_vm8, %v584_v29, -inf }
 0x9b7   :  { %589 = vmax.xlane.f32.xlu0 %v588_v30 }
 0x9b8   :  { %v653_v31 = vpop.f32.mrf.mxu2 }
 0x9b9   :  { %v654_v32 = vadd.f32 %v653_v31, %v2272_v3 }
 0x9bb   :  { %v585_v33 = vpop.f32.mrf.mxu1  ;;  %v658_v34 = vsel %vm135_vm8, %v654_v32, -inf }
 0x9bc   :  { %v586_v35 = vadd.f32 %v585_v33, %v2279_v7  ;;  %659 = vmax.xlane.f32.xlu2 %v658_v34 }
 0x9be   :  { %v591_v36 = vsel %vm135_vm8, %v586_v35, -inf }
 0x9bf   :  { %592 = vmax.xlane.f32.xlu1 %v591_v36 }
 0x9c0   :  { %v655_v37 = vpop.f32.mrf.mxu2 }
 0x9c1   :  { %v656_v38 = vadd.f32 %v655_v37, %v2279_v7  ;;  %v2019_v37 = vld [vmem:[%s2653_s2 + $0x4] ss:$0 sm:$0xff] }
 0x9c3   :  { %v661_v39 = vsel %vm135_vm8, %v656_v38, -inf }
 0x9c4   :  { %662 = vmax.xlane.f32.xlu0 %v661_v39 }
 0x9d8   :  { %611 = vrot.lane.b32.xlu0 %v565_v23, %s2177_s11 }
 0x9e0   :  { %702 = vrot.lane.b32.xlu0 %v2348_v43, %s2179_s13 }
 0x9e8   :  { %748 = vrot.lane.b32.xlu0 %v2018_v15, %s2179_s13 }
 0xa2a   :  { %v590_v3 = vpop.xlane.xlu0 %589 }
 0xa2b   :  { %v594_v40 = vsub.f32 %v584_v29, %v590_v3 }
 0xa2d   :  { %v596_v41 = vmul.f32 1.442695, %v594_v40 }
 0xa2f   :  { %2061 = vpow2.f32 %v596_v41  ;;  %v660_v42 = vpop.xlane.xlu2 %659 }
 0xa30   :  { %v664_v44 = vsub.f32 %v654_v32, %v660_v42 }
 0xa32   :  { %v666_v45 = vmul.f32 1.442695, %v664_v44  ;;  %v593_v46 = vpop.xlane.xlu1 %592 }
 0xa33   :  { %v595_v47 = vsub.f32 %v586_v35, %v593_v46 }
 0xa34   :  { %2063 = vpow2.f32 %v666_v45 }
 0xa35   :  { %v2062_v7 = vpop.eup %2061  ;;  %v598_v22 = vmul.f32 1.442695, %v595_v47 }
 0xa36   :  { %v600_v48 = vsel %vm135_vm8, %v2062_v7, 0.0 }
 0xa37   :  { %2065 = vpow2.f32 %v598_v22  ;;  %601 = vadd.xlane.f32.xlu1 %v600_v48  ;;  %v663_v51 = vpop.xlane.xlu0 %662 }
 0xa38   :  { %v665_v43 = vsub.f32 %v656_v38, %v663_v51 }
 0xa3a   :  { %v668_v52 = vmul.f32 1.442695, %v665_v43  ;;  %v2064_v54 = vpop.eup %2063  ;;  %v1992_v43 = vld [vmem:[%s2655_s4 + $0x10] sm:$0xff] }
 0xa3b   :  { %v670_v57 = vsel %vm135_vm8, %v2064_v54, 0.0 }
 0xa3c   :  { %2067 = vpow2.f32 %v668_v52 }
 0xa3d   :  { %v2066_v55 = vpop.eup %2065 }
 0xa3e   :  { %v603_v56 = vsel %vm135_vm8, %v2066_v55, 0.0 }
 0xa3f   :  { %604 = vadd.xlane.f32.xlu2 %v603_v56  ;;  %671 = vadd.xlane.f32.xlu1 %v670_v57 }
 0xa42   :  { %v2068_v58 = vpop.eup %2067 }
 0xa43   :  { %v673_v53 = vsel %vm135_vm8, %v2068_v58, 0.0 }
 0xa47   :  { %674 = vadd.xlane.f32.xlu2 %v673_v53 }
 0xa4a   :  { %v612_v59 = vpop.permute.xlu0 %611 }
 0xa4b   :  { %624 = vmatpush.bf16.msra.mxu3 %v612_v59 }
 0xa52   :  { %v703_v18 = vpop.permute.xlu0 %702 }
 0xa53   :  { %715 = vmatpush.bf16.msrb.mxu1 %v703_v18 }
 0xa58   :  { %681 = vrot.lane.b32.xlu1 %v565_v23, %s2178_s12 }
 0xa5a   :  { %v749_v26 = vpop.permute.xlu0 %748 }
 0xa5f   :  { %727 = vrot.lane.b32.xlu2 %v1991_v61, %s2179_s13 }
 0xaaa   :  { %v602_v60 = vpop.xlane.xlu1 %601 }
 0xaab   :  { %2069 = vrcp.f32 %v602_v60 }
 0xab1   :  { %v2070_v63 = vpop.eup %2069 }
 0xab2   :  { %v605_v62 = vpop.xlane.xlu2 %604  ;;  %v608_v1 = vmul.f32 %v2070_v63, %v2062_v7  ;;  %v672_v6 = vpop.xlane.xlu1 %671  ;;  %v1993_v7 = vld [vmem:[%s2655_s4 + $0x18] sm:$0xff] }
 0xab3   :  { %2071 = vrcp.f32 %v605_v62  ;;  %838 = vmatpush.bf16.msra.mxu2 %v1993_v7 }
 0xab7   :  { %839 = vmatpush.bf16.msra.mxu2 %v1992_v43 }
 0xab9   :  { %v2072_v0 = vpop.eup %2071 }
 0xaba   :  { %v609_v2 = vmul.f32 %v2072_v0, %v2066_v55  ;;  %v675_v5 = vpop.xlane.xlu2 %674 }
 0xabb   :  { %2073 = vrcp.f32 %v675_v5 }
 0xabc   :  { %v610_v4 = vpack.c.bf16 %v609_v2, %v608_v1  ;;  %2075 = vrcp.f32 %v672_v6 }
 0xabe   :  { %1881 = vmatmul.msk.bf16.vlgmr.msra.gmra.mxu3 %vm135_vm8, %v610_v4 }
 0xac1   :  { %v2074_v8 = vpop.eup %2073 }
 0xac2   :  { %v2076_v9 = vpop.eup %2075  ;;  %v679_v13 = vmul.f32 %v2074_v8, %v2068_v58  ;;  %v728_v17 = vpop.permute.xlu2 %727 }
 0xac3   :  { %v678_v14 = vmul.f32 %v2076_v9, %v2064_v54  ;;  %740 = vmatpush.bf16.msrb.mxu3 %v728_v17 }
 0xac5   :  { %v680_v16 = vpack.c.bf16 %v679_v13, %v678_v14 }
 0xaca   :  { %v682_v15 = vpop.permute.xlu1 %681 }
 0xacb   :  { %694 = vmatpush.bf16.msrb.mxu0 %v682_v15 }
 0xace   :  { %1885 = vmatmul.msk.bf16.vlgmr.msrb.gmra.mxu0 %vm135_vm8, %v680_v16 }
 0xb41   :  { %v626_v49 = vpop.f32.mrf.mxu3 }
 0xb49   :  { %v628_v19 = vpop.f32.mrf.mxu3 }
 0xb4a   :  { %v631_v20 = vpack.c.bf16 %v628_v19, %v626_v49 }
 0xb4b   :  { %v696_v21 = vpop.f32.mrf.mxu0 }
 0xb4c   :  { %1891 = vmatmul.msk.bf16.vlgmr.msrb.gmra.mxu3 %vm135_vm8, %v631_v20 }
 0xb53   :  { %v698_v23 = vpop.f32.mrf.mxu0 }
 0xb54   :  { %v701_v50 = vpack.c.bf16 %v698_v23, %v696_v21 }
 0xb56   :  { %1886 = vmatmul.msk.bf16.vlgmr.msrb.gmra.mxu1 %vm135_vm8, %v701_v50 }
 0xbcf   :  { %v742_v24 = vpop.f32.mrf.mxu3 }
 0xbd3   :  { %v717_v25 = vpop.f32.mrf.mxu1 }
 0xbd4   :  { %v743_v27 = vadd.f32 %v742_v24, %v717_v25 }
 0xbd6   :  { %v751_v28 = vadd.f32 %v749_v26, %v743_v27 }
 0xbd7   :  { %v744_v31 = vpop.f32.mrf.mxu3 }
 0xbd8   :  { %v753_v29 = vadd.f32 %v751_v28, %v2356_v10 }
 0xbda   :  { %v755_v30 = vsel %vm27_vm0, %v753_v29, 0.0 }
 0xbdb   :  { %v719_v32 = vpop.f32.mrf.mxu1  ;;  %756 = vadd.xlane.f32.xlu0 %v755_v30 }
 0xbdc   :  { %v745_v33 = vadd.f32 %v744_v31, %v719_v32 }
 0xbde   :  { %v752_v34 = vadd.f32 %v749_v26, %v745_v33 }
 0xbe0   :  { %v754_v35 = vadd.f32 %v752_v34, %v2358_v12 }
 0xbe2   :  { %v758_v36 = vsel %vm27_vm0, %v754_v35, 0.0 }
 0xbe3   :  { %759 = vadd.xlane.f32.xlu2 %v758_v36 }
 0xbef   :  { %803 = vrot.lane.b32.xlu0 %v2019_v37, %s2174_s24 }
 0xbf7   :  { %866 = vrot.lane.b32.xlu0 %v1992_v43, %s2177_s11 }
 0xc4e   :  { %v757_v38 = vpop.xlane.xlu0 %756 }
 0xc4f   :  { %v761_v39 = vmul.f32 %v757_v38, %v2225_v11 }
 0xc51   :  { %v763_v3 = vsub.f32 %v753_v29, %v761_v39 }
 0xc53   :  { %v765_v40 = vmul.f32 %v763_v3, %v763_v3 }
 0xc55   :  { %v767_v41 = vsel %vm27_vm0, %v765_v40, 0.0 }
 0xc56   :  { %v760_v42 = vpop.xlane.xlu2 %759  ;;  %768 = vadd.xlane.f32.xlu1 %v767_v41 }
 0xc57   :  { %v762_v44 = vmul.f32 %v760_v42, %v2225_v11 }
 0xc59   :  { %v764_v45 = vsub.f32 %v754_v35, %v762_v44 }
 0xc5b   :  { %v766_v46 = vmul.f32 %v764_v45, %v764_v45 }
 0xc5d   :  { %v770_v47 = vsel %vm27_vm0, %v766_v46, 0.0 }
 0xc5e   :  { %771 = vadd.xlane.f32.xlu2 %v770_v47 }
 0xc61   :  { %v804_v13 = vpop.permute.xlu0 %803 }
 0xc69   :  { %v867_v19 = vpop.permute.xlu0 %866 }
 0xc6a   :  { %v874_v20 = vsel %vm437_vm15, %v867_v19, 0 }
 0xc6f   :  { %826 = vrot.lane.b32.xlu1 %v2019_v37, %s2177_s11 }
 0xc76   :  { %868 = vrot.lane.b32.xlu2 %v1993_v7, %s2177_s11 }
 0xcc9   :  { %v769_v22 = vpop.xlane.xlu1 %768 }
 0xcca   :  { %v773_v48 = vmul.f32 %v769_v22, %v2225_v11 }
 0xccc   :  { %v775_v51 = vadd.f32 1e-07, %v773_v48 }
 0xcce   :  { %2077 = vrsqrt.f32 %v775_v51  ;;  %vm783_vm9 = vweird.f32 %v775_v51 }
 0xcd1   :  { %v772_v52 = vpop.xlane.xlu2 %771 }
 0xcd2   :  { %v774_v54 = vmul.f32 %v772_v52, %v2225_v11 }
 0xcd4   :  { %v2078_v55 = vpop.eup %2077  ;;  %v776_v56 = vadd.f32 1e-07, %v774_v54 }
 0xcd5   :  { %v778_v57 = vmul.f32 %v2078_v55, %v775_v51  ;;  %vm784_vm7 = vweird.f32 %v2078_v55 }
 0xcd6   :  { %2079 = vrsqrt.f32 %v776_v56  ;;  %vm785_vm10 = vmor %vm783_vm9, %vm784_vm7  ;;  %vm793_vm12 = vweird.f32 %v776_v56 }
 0xcd7   :  { %v779_v58 = vmul.f32 %v2078_v55, %v778_v57 }
 0xcd9   :  { %v780_v53 = vmul.f32 0.5, %v779_v58  ;;  %v869_v18 = vpop.permute.xlu2 %868 }
 0xcda   :  { %v877_v49 = vsel %vm437_vm15, %v869_v18, 0 }
 0xcdb   :  { %v781_v59 = vsub.f32 1.5, %v780_v53  ;;  %885 = vmatpush.bf16.xpose.msra.mxu0 %v877_v49 }
 0xcdc   :  { %v2080_v60 = vpop.eup %2079 }
 0xcdd   :  { %v782_v61 = vmul.f32 %v2078_v55, %v781_v59  ;;  %v788_v62 = vmul.f32 %v2080_v60, %v776_v56  ;;  %vm794_vm11 = vweird.f32 %v2080_v60 }
 0xcde   :  { %vm795_vm13 = vmor %vm793_vm12, %vm794_vm11 }
 0xcdf   :  { %v789_v63 = vmul.f32 %v2080_v60, %v788_v62  ;;  %v786_v1 = vsel %vm785_vm10, %v2078_v55, %v782_v61 }
 0xce0   :  { %v797_v4 = vmul.f32 %v786_v1, %v763_v3 }
 0xce1   :  { %v790_v0 = vmul.f32 0.5, %v789_v63  ;;  %v827_v21 = vpop.permute.xlu1 %826  ;;  %v2439_v63 = vld [vmem:[%s2654_s3 + $0x28] sm:$0xff] }
 0xce2   :  { %v800_v9 = vmul.f32 %v2019_v37, %v797_v4  ;;  %983 = vmatpush.bf16.msra.mxu1 %v2439_v63  ;;  %v1994_v4 = vld [vmem:[%s2654_s3 + $0x20] sm:$0xff] }
 0xce3   :  { %v791_v2 = vsub.f32 1.5, %v790_v0  ;;  %886 = vmatpush.bf16.xpose.msra.mxu0 %v874_v20 }
 0xce4   :  { %v806_v15 = vadd.f32 %v804_v13, %v800_v9 }
 0xce5   :  { %v792_v5 = vmul.f32 %v2080_v60, %v791_v2 }
 0xce6   :  { %984 = vmatpush.bf16.msra.mxu1 %v1994_v4 }
 0xce7   :  { %v796_v6 = vsel %vm795_vm13, %v2080_v60, %v792_v5 }
 0xce8   :  { %v798_v8 = vmul.f32 %v796_v6, %v764_v45  ;;  %v2020_v45 = vld [vmem:[%s2653_s2 + $0x5] ss:$0 sm:$0xff] }
 0xcea   :  { %v801_v14 = vmul.f32 %v2019_v37, %v798_v8 }
 0xcec   :  { %v807_v16 = vadd.f32 %v804_v13, %v801_v14 }
 0xcee   :  { %v808_v17 = vpack.c.bf16 %v807_v16, %v806_v15 }
 0xcf0   :  { %1904 = vmatmul.msk.bf16.vlgmr.msra.gmra.mxu2 %vm27_vm0, %v808_v17 }
 0xd73   :  { %v841_v23 = vpop.f32.mrf.mxu2 }
 0xd74   :  { %v842_v50 = vadd.f32 %v841_v23, %v827_v21 }
 0xd76   :  { %v846_v24 = vmul.f32 %v842_v50, %v842_v50 }
 0xd78   :  { %v848_v25 = vmul.f32 %v846_v24, %v842_v50 }
 0xd7a   :  { %v850_v26 = vmul.f32 0.044715, %v848_v25 }
 0xd7b   :  { %v843_v27 = vpop.f32.mrf.mxu2 }
 0xd7c   :  { %v852_v28 = vadd.f32 %v850_v26, %v842_v50  ;;  %v844_v29 = vadd.f32 %v843_v27, %v827_v21 }
 0xd7e   :  { %v854_v30 = vmul.f32 0.7978846, %v852_v28  ;;  %v847_v31 = vmul.f32 %v844_v29, %v844_v29 }
 0xd80   :  { %v849_v32 = vmul.f32 %v847_v31, %v844_v29  ;;  %2081 = vtanh.f32 %v854_v30 }
 0xd82   :  { %v851_v33 = vmul.f32 0.044715, %v849_v32 }
 0xd84   :  { %v853_v34 = vadd.f32 %v851_v33, %v844_v29 }
 0xd86   :  { %v855_v35 = vmul.f32 0.7978846, %v853_v34  ;;  %v2082_v36 = vpop.eup %2081 }
 0xd87   :  { %v858_v37 = vadd.f32 1.0, %v2082_v36 }
 0xd88   :  { %2083 = vtanh.f32 %v855_v35  ;;  %v2457_v35 = vld [vmem:[%s2653_s2 + $0x6] ss:$0 sm:$0xff] }
 0xd89   :  { %v860_v39 = vmul.f32 0.5, %v858_v37 }
 0xd8b   :  { %v862_v41 = vmul.f32 %v860_v39, %v842_v50 }
 0xd8e   :  { %v2084_v38 = vpop.eup %2083 }
 0xd8f   :  { %v859_v3 = vadd.f32 1.0, %v2084_v38 }
 0xd91   :  { %v861_v40 = vmul.f32 0.5, %v859_v3 }
 0xd93   :  { %v863_v42 = vmul.f32 %v861_v40, %v844_v29 }
 0xd95   :  { %v864_v44 = vpack.c.bf16 %v863_v42, %v862_v41 }
 0xd97   :  { %1905 = vmatmul.msk.bf16.vlgmr.msra.gmra.mxu0 %vm437_vm15, %v864_v44 }
 0xe14   :  { %v888_v46 = vpop.f32.mrf.mxu0 }
 0xe15   :  { %v889_v47 = vadd.f32 %v2020_v45, %v888_v46 }
 0xe17   :  { %v893_v7 = vadd.f32 %v889_v47, %v806_v15 }
 0xe19   :  { %v895_v22 = vsel %vm27_vm0, %v893_v7, 0.0 }
 0xe1a   :  { %896 = vadd.xlane.f32.xlu1 %v895_v22 }
 0xe1c   :  { %v890_v48 = vpop.f32.mrf.mxu0 }
 0xe1d   :  { %v891_v51 = vadd.f32 %v2020_v45, %v890_v48  ;;  %v2471_v48 = vld [vmem:[%s2652_s1] sm:$0xff] }
 0xe1f   :  { %v894_v43 = vadd.f32 %v891_v51, %v807_v16 }
 0xe21   :  { %v898_v52 = vsel %vm27_vm0, %v894_v43, 0.0 }
 0xe22   :  { %899 = vadd.xlane.f32.xlu0 %v898_v52 }
 0xe36   :  { %940 = vrot.lane.b32.xlu0 %v2020_v45, %s2174_s24 }
 0xe8d   :  { %v897_v54 = vpop.xlane.xlu1 %896 }
 0xe8e   :  { %v901_v55 = vmul.f32 %v897_v54, %v2225_v11 }
 0xe90   :  { %v903_v56 = vsub.f32 %v893_v7, %v901_v55 }
 0xe92   :  { %v905_v57 = vmul.f32 %v903_v56, %v903_v56 }
 0xe94   :  { %v907_v58 = vsel %vm27_vm0, %v905_v57, 0.0  ;;  %v2480_v57 = vld [vmem:[%s2652_s1 + $0x8] sm:$0xff]  ;;  %s1826_s1 = sshll.u32 %s2656_s5, 4  ;;  %s1827_s1 = int_to_ptr.hbm [resolvable:$true] %s1826_s1 }
 0xe95   :  { %v900_v53 = vpop.xlane.xlu0 %899  ;;  %908 = vadd.xlane.f32.xlu2 %v907_v58 }
 0xe96   :  { %v902_v59 = vmul.f32 %v900_v53, %v2225_v11 }
 0xe98   :  { %v904_v60 = vsub.f32 %v894_v43, %v902_v59 }
 0xe9a   :  { %v906_v61 = vmul.f32 %v904_v60, %v904_v60 }
 0xe9c   :  { %v910_v62 = vsel %vm27_vm0, %v906_v61, 0.0 }
 0xe9d   :  { %911 = vadd.xlane.f32.xlu1 %v910_v62 }
 0xea8   :  { %v941_v24 = vpop.permute.xlu0 %940 }
 0xead   :  { %945 = vrot.lane.b32.xlu2 %v2020_v45, %s2177_s11 }
 0xf08   :  { %v909_v0 = vpop.xlane.xlu2 %908 }
 0xf09   :  { %v913_v1 = vmul.f32 %v909_v0, %v2225_v11 }
 0xf0b   :  { %v915_v2 = vadd.f32 1e-07, %v913_v1 }
 0xf0d   :  { %2085 = vrsqrt.f32 %v915_v2  ;;  %vm923_vm1 = vweird.f32 %v915_v2 }
 0xf10   :  { %v912_v5 = vpop.xlane.xlu1 %911  ;;  %v946_v29 = vpop.permute.xlu2 %945 }
 0xf11   :  { %v914_v6 = vmul.f32 %v912_v5, %v2225_v11 }
 0xf13   :  { %v2086_v8 = vpop.eup %2085  ;;  %v916_v9 = vadd.f32 1e-07, %v914_v6 }
 0xf14   :  { %v918_v13 = vmul.f32 %v2086_v8, %v915_v2  ;;  %vm924_vm14 = vweird.f32 %v2086_v8 }
 0xf15   :  { %2087 = vrsqrt.f32 %v916_v9  ;;  %vm925_vm2 = vmor %vm923_vm1, %vm924_vm14  ;;  %vm933_vm4 = vweird.f32 %v916_v9 }
 0xf16   :  { %v919_v14 = vmul.f32 %v2086_v8, %v918_v13 }
 0xf18   :  { %v920_v15 = vmul.f32 0.5, %v919_v14 }
 0xf1a   :  { %v921_v16 = vsub.f32 1.5, %v920_v15 }
 0xf1b   :  { %v2088_v17 = vpop.eup %2087 }
 0xf1c   :  { %v928_v18 = vmul.f32 %v2088_v17, %v916_v9  ;;  %v922_v49 = vmul.f32 %v2086_v8, %v921_v16  ;;  %vm934_vm3 = vweird.f32 %v2088_v17 }
 0xf1d   :  { %vm935_vm5 = vmor %vm933_vm4, %vm934_vm3 }
 0xf1e   :  { %v929_v19 = vmul.f32 %v2088_v17, %v928_v18  ;;  %v926_v21 = vsel %vm925_vm2, %v2086_v8, %v922_v49 }
 0xf1f   :  { %v937_v50 = vmul.f32 %v926_v21, %v903_v56 }
 0xf20   :  { %v930_v20 = vmul.f32 0.5, %v929_v19 }
 0xf21   :  { %v943_v28 = vmul.f32 %v941_v24, %v937_v50  ;;  %v1996_v50 = vld [vmem:[%s2654_s3 + $0x20] sm:$0xff] }
 0xf22   :  { %v931_v23 = vsub.f32 1.5, %v930_v20 }
 0xf23   :  { %v2447_v31 = vadd.f32 %v946_v29, %v943_v28 }
 0xf24   :  { %v932_v25 = vmul.f32 %v2088_v17, %v931_v23 }
 0xf26   :  { %v936_v26 = vsel %vm935_vm5, %v2088_v17, %v932_v25 }
 0xf27   :  { %v938_v27 = vmul.f32 %v936_v26, %v904_v60 }
 0xf29   :  { %v944_v30 = vmul.f32 %v941_v24, %v938_v27 }
 0xf2b   :  { %v2449_v32 = vadd.f32 %v946_v29, %v944_v30 }
 0xf2d   :  { %v955_v33 = vpack.c.bf16 %v2449_v32, %v2447_v31 }
 0xf2f   :  { %1918 = vmatmul.msk.bf16.vlgmr.msra.gmra.mxu1 %vm27_vm0, %v955_v33 }
 0xfac   :  { %v986_v34 = vpop.f32.mrf.mxu1 }
 0xfad   :  { %v987_v36 = vadd.f32 %v2457_v35, %v986_v34 }
 0xfaf   :  { %v991_v38 = vpack.c.bf16 %v987_v36, %v987_v36 }
 0xfb1   :  { %v995_v40 = vunpack.c.l.b16 %v991_v38 }
 0xfb4   :  { %v988_v37 = vpop.f32.mrf.mxu1 }
 0xfb5   :  { %v989_v39 = vadd.f32 %v2457_v35, %v988_v37 }
 0xfb7   :  { %v992_v3 = vpack.c.bf16 %v989_v39, %v989_v39 }
 0xfb9   :  { %v996_v41 = vunpack.c.l.b16 %v992_v3 }
 0xfbb   :  { %v997_v42 = vpack.c.b16 %v996_v41, %v995_v40 }
 0xfbd   :  { %1066 = vrot.lane.b32.xlu2 %v997_v42, %s2175_s30  ;;  %1068 = vrot.lane.b32.xlu0 %v997_v42, %s2176_s6 }
 0xfbe   :  { %998 = vrot.lane.b32.xlu1 %v997_v42, %s2174_s24 }
0x1017   :  { %v1067_v7 = vpop.permute.xlu2 %1066 }
0x102f   :  { %v1069_v44 = vpop.permute.xlu0 %1068 }
0x1030   :  { %v1074_v45 = vsel %vm135_vm8, %v1069_v44, 0  ;;  %v999_v46 = vpop.permute.xlu1 %998 }
0x1031   :  { %v1004_v47 = vsel %vm135_vm8, %v999_v46, 0  ;;  %1083 = vmatpush.bf16.xpose.msrb.mxu0 %v1074_v45 }
0x1032   :  { %1013 = vmatpush.bf16.xpose.msra.mxu3 %v1004_v47 }
0x1038   :  { %1923 = vmatmul.msk.bf16.vlgmr.msrb.gmra.mxu0 %vm135_vm8, %v1067_v7 }
0x1039   :  { %1919 = vmatmul.msk.bf16.vlgmr.msra.gmra.mxu3 %vm135_vm8, %v997_v42 }
0x10b5   :  { %v1085_v22 = vpop.f32.mrf.mxu0 }
0x10b6   :  { %v1086_v51 = vadd.f32 %v2471_v48, %v1085_v22 }
0x10b8   :  { %v1090_v43 = vsel %vm135_vm8, %v1086_v51, -inf }
0x10b9   :  { %1091 = vmax.xlane.f32.xlu2 %v1090_v43 }
0x10bc   :  { %v1015_v52 = vpop.f32.mrf.mxu3 }
0x10bd   :  { %v1016_v54 = vadd.f32 %v2471_v48, %v1015_v52  ;;  %v1087_v56 = vpop.f32.mrf.mxu0 }
0x10be   :  { %v1088_v58 = vadd.f32 %v2480_v57, %v1087_v56 }
0x10bf   :  { %v1020_v55 = vsel %vm135_vm8, %v1016_v54, -inf }
0x10c0   :  { %1021 = vmax.xlane.f32.xlu0 %v1020_v55  ;;  %v1093_v61 = vsel %vm135_vm8, %v1088_v58, -inf }
0x10c4   :  { %v1017_v53 = vpop.f32.mrf.mxu3 }
0x10c5   :  { %v1018_v59 = vadd.f32 %v2480_v57, %v1017_v53 }
0x10c7   :  { %v1023_v60 = vsel %vm135_vm8, %v1018_v59, -inf }
0x10c8   :  { %1024 = vmax.xlane.f32.xlu1 %v1023_v60  ;;  %1094 = vmax.xlane.f32.xlu0 %v1093_v61 }
0x112c   :  { %v1092_v62 = vpop.xlane.xlu2 %1091 }
0x112d   :  { %v1096_v0 = vsub.f32 %v1086_v51, %v1092_v62 }
0x112f   :  { %v1098_v1 = vmul.f32 1.442695, %v1096_v0  ;;  %v2022_v0 = vld [vmem:[%s2653_s2 + $0x7] ss:$0 sm:$0xff] }
0x1131   :  { %2089 = vpow2.f32 %v1098_v1 }
0x1133   :  { %v1022_v2 = vpop.xlane.xlu0 %1021 }
0x1134   :  { %v1026_v4 = vsub.f32 %v1016_v54, %v1022_v2 }
0x1136   :  { %v1028_v5 = vmul.f32 1.442695, %v1026_v4 }
0x1137   :  { %v2090_v6 = vpop.eup %2089 }
0x1138   :  { %2091 = vpow2.f32 %v1028_v5  ;;  %v1102_v8 = vsel %vm135_vm8, %v2090_v6, 0.0 }
0x1139   :  { %1103 = vadd.xlane.f32.xlu0 %v1102_v8 }
0x113b   :  { %v1025_v9 = vpop.xlane.xlu1 %1024  ;;  %v1095_v13 = vpop.xlane.xlu0 %1094 }
0x113c   :  { %v1027_v14 = vsub.f32 %v1018_v59, %v1025_v9  ;;  %v1097_v15 = vsub.f32 %v1088_v58, %v1095_v13 }
0x113e   :  { %v2092_v16 = vpop.eup %2091  ;;  %v1030_v17 = vmul.f32 1.442695, %v1027_v14  ;;  %v1100_v18 = vmul.f32 1.442695, %v1097_v15 }
0x113f   :  { %v1032_v49 = vsel %vm135_vm8, %v2092_v16, 0.0 }
0x1140   :  { %2093 = vpow2.f32 %v1030_v17  ;;  %1033 = vadd.xlane.f32.xlu1 %v1032_v49 }
0x1141   :  { %2095 = vpow2.f32 %v1100_v18 }
0x1146   :  { %v2094_v19 = vpop.eup %2093 }
0x1147   :  { %v2096_v20 = vpop.eup %2095  ;;  %v1035_v21 = vsel %vm135_vm8, %v2094_v19, 0.0 }
0x1148   :  { %1036 = vadd.xlane.f32.xlu2 %v1035_v21  ;;  %v1105_v23 = vsel %vm135_vm8, %v2096_v20, 0.0 }
0x1149   :  { %1106 = vadd.xlane.f32.xlu1 %v1105_v23 }
0x114d   :  { %1113 = vrot.lane.b32.xlu0 %v997_v42, %s2178_s12 }
0x1155   :  { %1159 = vrot.lane.b32.xlu0 %v1996_v50, %s2179_s13 }
0x1160   :  { %1043 = vrot.lane.b32.xlu2 %v997_v42, %s2177_s11 }
0x1162   :  { %1134 = vrot.lane.b32.xlu1 %v2439_v63, %s2179_s13 }
0x1168   :  { %1180 = vrot.lane.b32.xlu2 %v2457_v35, %s2179_s13 }
0x11ac   :  { %v1104_v25 = vpop.xlane.xlu0 %1103 }
0x11b3   :  { %v1034_v24 = vpop.xlane.xlu1 %1033 }
0x11b4   :  { %2097 = vrcp.f32 %v1034_v24 }
0x11b5   :  { %2099 = vrcp.f32 %v1104_v25 }
0x11ba   :  { %v2098_v29 = vpop.eup %2097 }
0x11bb   :  { %v1037_v26 = vpop.xlane.xlu2 %1036  ;;  %v2100_v63 = vpop.eup %2099  ;;  %v1040_v34 = vmul.f32 %v2098_v29, %v2092_v16  ;;  %v1998_v16 = vld [vmem:[%s2655_s4 + $0x28] sm:$0xff] }
0x11bc   :  { %2101 = vrcp.f32 %v1037_v26  ;;  %v1107_v27 = vpop.xlane.xlu1 %1106  ;;  %v1110_v37 = vmul.f32 %v2100_v63, %v2090_v6  ;;  %1270 = vmatpush.bf16.msra.mxu0 %v1998_v16 }
0x11bd   :  { %2103 = vrcp.f32 %v1107_v27 }
0x11bf   :  { %v1114_v28 = vpop.permute.xlu0 %1113 }
0x11c0   :  { %1126 = vmatpush.bf16.msrb.mxu1 %v1114_v28 }
0x11c2   :  { %v2102_v30 = vpop.eup %2101 }
0x11c3   :  { %v2104_v33 = vpop.eup %2103  ;;  %v1041_v35 = vmul.f32 %v2102_v30, %v2094_v19  ;;  %v1044_v36 = vpop.permute.xlu2 %1043  ;;  %v1997_v19 = vld [vmem:[%s2655_s4 + $0x20] sm:$0xff] }
0x11c4   :  { %v1111_v38 = vmul.f32 %v2104_v33, %v2096_v20  ;;  %1056 = vmatpush.bf16.msrb.mxu2 %v1044_v36  ;;  %1271 = vmatpush.bf16.msra.mxu0 %v1997_v19 }
0x11c5   :  { %v1042_v39 = vpack.c.bf16 %v1041_v35, %v1040_v34 }
0x11c6   :  { %v1112_v3 = vpack.c.bf16 %v1111_v38, %v1110_v37 }
0x11c7   :  { %1920 = vmatmul.msk.bf16.vlgmr.msrb.gmra.mxu2 %vm135_vm8, %v1042_v39  ;;  %v1160_v41 = vpop.permute.xlu0 %1159 }
0x11c8   :  { %1924 = vmatmul.msk.bf16.vlgmr.msrb.gmra.mxu1 %vm135_vm8, %v1112_v3  ;;  %1172 = vmatpush.bf16.msra.mxu2 %v1160_v41 }
0x11cb   :  { %v1181_v43 = vpop.permute.xlu2 %1180 }
0x11d4   :  { %v1135_v40 = vpop.permute.xlu1 %1134 }
0x11d5   :  { %1147 = vmatpush.bf16.msrb.mxu3 %v1135_v40 }
0x1245   :  { %v1128_v42 = vpop.f32.mrf.mxu1 }
0x124a   :  { %v1058_v44 = vpop.f32.mrf.mxu2 }
0x124d   :  { %v1130_v45 = vpop.f32.mrf.mxu1 }
0x124e   :  { %v1133_v46 = vpack.c.bf16 %v1130_v45, %v1128_v42 }
0x1250   :  { %1925 = vmatmul.msk.bf16.vlgmr.msrb.gmra.mxu3 %vm135_vm8, %v1133_v46 }
0x1252   :  { %v1060_v47 = vpop.f32.mrf.mxu2 }
0x1253   :  { %v1063_v7 = vpack.c.bf16 %v1060_v47, %v1058_v44 }
0x1255   :  { %1930 = vmatmul.msk.bf16.vlgmr.msra.gmra.mxu2 %vm135_vm8, %v1063_v7 }
0x12d3   :  { %v1149_v22 = vpop.f32.mrf.mxu3 }
0x12d8   :  { %v1174_v51 = vpop.f32.mrf.mxu2 }
0x12d9   :  { %v1175_v52 = vadd.f32 %v1174_v51, %v1149_v22 }
0x12db   :  { %v1183_v54 = vadd.f32 %v1181_v43, %v1175_v52  ;;  %v1151_v58 = vpop.f32.mrf.mxu3 }
0x12dd   :  { %v1185_v55 = vadd.f32 %v1183_v54, %v2447_v31 }
0x12df   :  { %v1187_v56 = vsel %vm27_vm0, %v1185_v55, 0.0 }
0x12e0   :  { %v1176_v53 = vpop.f32.mrf.mxu2  ;;  %1188 = vadd.xlane.f32.xlu0 %v1187_v56 }
0x12e1   :  { %v1177_v59 = vadd.f32 %v1176_v53, %v1151_v58 }
0x12e3   :  { %v1184_v60 = vadd.f32 %v1181_v43, %v1177_v59 }
0x12e5   :  { %v1186_v61 = vadd.f32 %v1184_v60, %v2449_v32 }
0x12e7   :  { %v1190_v62 = vsel %vm27_vm0, %v1186_v61, 0.0 }
0x12e8   :  { %1191 = vadd.xlane.f32.xlu1 %v1190_v62 }
0x1301   :  { %1235 = vrot.lane.b32.xlu1 %v2022_v0, %s2174_s24 }
0x1353   :  { %v1189_v1 = vpop.xlane.xlu0 %1188 }
0x1354   :  { %v1193_v2 = vmul.f32 %v1189_v1, %v2225_v11 }
0x1356   :  { %v1195_v4 = vsub.f32 %v1185_v55, %v1193_v2 }
0x1358   :  { %v1197_v5 = vmul.f32 %v1195_v4, %v1195_v4 }
0x135a   :  { %v1199_v6 = vsel %vm27_vm0, %v1197_v5, 0.0 }
0x135b   :  { %v1192_v8 = vpop.xlane.xlu1 %1191  ;;  %1200 = vadd.xlane.f32.xlu2 %v1199_v6 }
0x135c   :  { %v1194_v9 = vmul.f32 %v1192_v8, %v2225_v11 }
0x135e   :  { %v1196_v13 = vsub.f32 %v1186_v61, %v1194_v9 }
0x1360   :  { %v1198_v14 = vmul.f32 %v1196_v13, %v1196_v13 }
0x1362   :  { %v1202_v15 = vsel %vm27_vm0, %v1198_v14, 0.0 }
0x1363   :  { %1203 = vadd.xlane.f32.xlu0 %v1202_v15 }
0x1373   :  { %1258 = vrot.lane.b32.xlu2 %v2022_v0, %s2177_s11  ;;  %v1236_v40 = vpop.permute.xlu1 %1235 }
0x1377   :  { %1300 = vrot.lane.b32.xlu0 %v1998_v16, %s2177_s11 }
0x137b   :  { %1298 = vrot.lane.b32.xlu2 %v1997_v19, %s2177_s11 }
0x13ce   :  { %v1201_v17 = vpop.xlane.xlu2 %1200 }
0x13cf   :  { %v1205_v18 = vmul.f32 %v1201_v17, %v2225_v11  ;;  %v2023_v17 = vld [vmem:[%s2653_s2 + $0x8] ss:$0 sm:$0xff] }
0x13d1   :  { %v1207_v49 = vadd.f32 1e-07, %v1205_v18 }
0x13d3   :  { %2105 = vrsqrt.f32 %v1207_v49  ;;  %vm1215_vm7 = vweird.f32 %v1207_v49 }
0x13d6   :  { %v1204_v20 = vpop.xlane.xlu0 %1203  ;;  %v1259_v46 = vpop.permute.xlu2 %1258 }
0x13d7   :  { %v1206_v21 = vmul.f32 %v1204_v20, %v2225_v11 }
0x13d9   :  { %v2106_v23 = vpop.eup %2105  ;;  %v1208_v50 = vadd.f32 1e-07, %v1206_v21 }
0x13da   :  { %v1210_v24 = vmul.f32 %v2106_v23, %v1207_v49  ;;  %vm1216_vm6 = vweird.f32 %v2106_v23 }
0x13db   :  { %2107 = vrsqrt.f32 %v1208_v50  ;;  %vm1217_vm9 = vmor %vm1215_vm7, %vm1216_vm6  ;;  %vm1225_vm11 = vweird.f32 %v1208_v50 }
0x13dc   :  { %v1211_v25 = vmul.f32 %v2106_v23, %v1210_v24 }
0x13de   :  { %v1212_v26 = vmul.f32 0.5, %v1211_v25  ;;  %v1299_v22 = vpop.permute.xlu2 %1298 }
0x13df   :  { %v1306_v51 = vsel %vm437_vm15, %v1299_v22, 0 }
0x13e0   :  { %v1213_v27 = vsub.f32 1.5, %v1212_v26 }
0x13e1   :  { %v2108_v28 = vpop.eup %2107 }
0x13e2   :  { %v1214_v29 = vmul.f32 %v2106_v23, %v1213_v27  ;;  %v1220_v63 = vmul.f32 %v2108_v28, %v1208_v50  ;;  %vm1226_vm10 = vweird.f32 %v2108_v28 }
0x13e3   :  { %vm1227_vm12 = vmor %vm1225_vm11, %vm1226_vm10 }
0x13e4   :  { %v1221_v30 = vmul.f32 %v2108_v28, %v1220_v63  ;;  %v1218_v34 = vsel %vm1217_vm9, %v2106_v23, %v1214_v29 }
0x13e5   :  { %v1229_v36 = vmul.f32 %v1218_v34, %v1195_v4 }
0x13e6   :  { %v1222_v33 = vmul.f32 0.5, %v1221_v30 }
0x13e7   :  { %v1232_v3 = vmul.f32 %v2022_v0, %v1229_v36  ;;  %v2545_v36 = vld [vmem:[%s2654_s3 + $0x38] sm:$0xff] }
0x13e8   :  { %v1223_v35 = vsub.f32 1.5, %v1222_v33  ;;  %1415 = vmatpush.bf16.msra.mxu3 %v2545_v36 }
0x13e9   :  { %v1238_v42 = vadd.f32 %v1236_v40, %v1232_v3  ;;  %v1301_v47 = vpop.permute.xlu0 %1300  ;;  %v1999_v3 = vld [vmem:[%s2654_s3 + $0x30] sm:$0xff] }
0x13ea   :  { %v1224_v37 = vmul.f32 %v2108_v28, %v1223_v35  ;;  %v1309_v7 = vsel %vm437_vm15, %v1301_v47, 0 }
0x13eb   :  { %1317 = vmatpush.bf16.xpose.msra.mxu1 %v1309_v7 }
0x13ec   :  { %v1228_v38 = vsel %vm1227_vm12, %v2108_v28, %v1224_v37  ;;  %1416 = vmatpush.bf16.msra.mxu3 %v1999_v3 }
0x13ed   :  { %v1230_v39 = vmul.f32 %v1228_v38, %v1196_v13 }
0x13ef   :  { %v1233_v41 = vmul.f32 %v2022_v0, %v1230_v39 }
0x13f1   :  { %v1239_v44 = vadd.f32 %v1236_v40, %v1233_v41 }
0x13f3   :  { %v1240_v45 = vpack.c.bf16 %v1239_v44, %v1238_v42  ;;  %1318 = vmatpush.bf16.xpose.msra.mxu1 %v1306_v51 }
0x13f5   :  { %1943 = vmatmul.msk.bf16.vlgmr.msra.gmra.mxu0 %vm27_vm0, %v1240_v45 }
0x1472   :  { %v1273_v43 = vpop.f32.mrf.mxu0 }
0x1473   :  { %v1274_v52 = vadd.f32 %v1273_v43, %v1259_v46 }
0x1475   :  { %v1278_v54 = vmul.f32 %v1274_v52, %v1274_v52 }
0x1477   :  { %v1280_v55 = vmul.f32 %v1278_v54, %v1274_v52 }
0x1479   :  { %v1282_v56 = vmul.f32 0.044715, %v1280_v55 }
0x147a   :  { %v1275_v58 = vpop.f32.mrf.mxu0 }
0x147b   :  { %v1284_v53 = vadd.f32 %v1282_v56, %v1274_v52  ;;  %v1276_v59 = vadd.f32 %v1275_v58, %v1259_v46 }
0x147d   :  { %v1286_v60 = vmul.f32 0.7978846, %v1284_v53  ;;  %v1279_v61 = vmul.f32 %v1276_v59, %v1276_v59 }
0x147f   :  { %v1281_v62 = vmul.f32 %v1279_v61, %v1276_v59  ;;  %2109 = vtanh.f32 %v1286_v60 }
0x1481   :  { %v1283_v0 = vmul.f32 0.044715, %v1281_v62 }
0x1483   :  { %v1285_v1 = vadd.f32 %v1283_v0, %v1276_v59 }
0x1485   :  { %v1287_v2 = vmul.f32 0.7978846, %v1285_v1  ;;  %v2110_v4 = vpop.eup %2109 }
0x1486   :  { %v1290_v5 = vadd.f32 1.0, %v2110_v4 }
0x1487   :  { %2111 = vtanh.f32 %v1287_v2 }
0x1488   :  { %v1292_v8 = vmul.f32 0.5, %v1290_v5 }
0x148a   :  { %v1294_v14 = vmul.f32 %v1292_v8, %v1274_v52  ;;  %v2563_v8 = vld [vmem:[%s2653_s2 + $0x9] ss:$0 sm:$0xff] }
0x148d   :  { %v2112_v6 = vpop.eup %2111 }
0x148e   :  { %v1291_v9 = vadd.f32 1.0, %v2112_v6 }
0x1490   :  { %v1293_v13 = vmul.f32 0.5, %v1291_v9 }
0x1492   :  { %v1295_v15 = vmul.f32 %v1293_v13, %v1276_v59 }
0x1494   :  { %v1296_v16 = vpack.c.bf16 %v1295_v15, %v1294_v14 }
0x1496   :  { %1944 = vmatmul.msk.bf16.vlgmr.msra.gmra.mxu1 %vm437_vm15, %v1296_v16 }
0x1513   :  { %v1320_v18 = vpop.f32.mrf.mxu1 }
0x1514   :  { %v1321_v49 = vadd.f32 %v2023_v17, %v1320_v18 }
0x1516   :  { %v1325_v19 = vadd.f32 %v1321_v49, %v1238_v42 }
0x1518   :  { %v1327_v20 = vsel %vm27_vm0, %v1325_v19, 0.0 }
0x1519   :  { %1328 = vadd.xlane.f32.xlu1 %v1327_v20 }
0x151b   :  { %v1322_v21 = vpop.f32.mrf.mxu1 }
0x151c   :  { %v1323_v23 = vadd.f32 %v2023_v17, %v1322_v21 }
0x151e   :  { %v1326_v50 = vadd.f32 %v1323_v23, %v1239_v44 }
0x1520   :  { %v1330_v24 = vsel %vm27_vm0, %v1326_v50, 0.0 }
0x1521   :  { %1331 = vadd.xlane.f32.xlu0 %v1330_v24 }
0x1535   :  { %1372 = vrot.lane.b32.xlu0 %v2023_v17, %s2174_s24 }
0x158c   :  { %v1329_v25 = vpop.xlane.xlu1 %1328 }
0x158d   :  { %v1333_v26 = vmul.f32 %v1329_v25, %v2225_v11 }
0x158f   :  { %v1335_v27 = vsub.f32 %v1325_v19, %v1333_v26 }
0x1591   :  { %v1337_v28 = vmul.f32 %v1335_v27, %v1335_v27 }
0x1593   :  { %v1339_v29 = vsel %vm27_vm0, %v1337_v28, 0.0 }
0x1594   :  { %v1332_v63 = vpop.xlane.xlu0 %1331  ;;  %1340 = vadd.xlane.f32.xlu2 %v1339_v29 }
0x1595   :  { %v1334_v30 = vmul.f32 %v1332_v63, %v2225_v11 }
0x1597   :  { %v1336_v33 = vsub.f32 %v1326_v50, %v1334_v30 }
0x1599   :  { %v1338_v34 = vmul.f32 %v1336_v33, %v1336_v33 }
0x159b   :  { %v1342_v35 = vsel %vm27_vm0, %v1338_v34, 0.0 }
0x159c   :  { %1343 = vadd.xlane.f32.xlu1 %v1342_v35 }
0x15a7   :  { %v1373_v53 = vpop.permute.xlu0 %1372 }
0x15ac   :  { %1377 = vrot.lane.b32.xlu2 %v2023_v17, %s2177_s11 }
0x1607   :  { %v1341_v37 = vpop.xlane.xlu2 %1340 }
0x1608   :  { %v1345_v38 = vmul.f32 %v1341_v37, %v2225_v11 }
0x160a   :  { %v1347_v39 = vadd.f32 1e-07, %v1345_v38 }
0x160c   :  { %2113 = vrsqrt.f32 %v1347_v39  ;;  %vm1355_vm14 = vweird.f32 %v1347_v39 }
0x160f   :  { %v1344_v40 = vpop.xlane.xlu1 %1343  ;;  %v1378_v0 = vpop.permute.xlu2 %1377 }
0x1610   :  { %v1346_v41 = vmul.f32 %v1344_v40, %v2225_v11 }
0x1612   :  { %v2114_v42 = vpop.eup %2113  ;;  %v1348_v44 = vadd.f32 1e-07, %v1346_v41 }
0x1613   :  { %v1350_v45 = vmul.f32 %v2114_v42, %v1347_v39  ;;  %vm1356_vm13 = vweird.f32 %v2114_v42 }
0x1614   :  { %2115 = vrsqrt.f32 %v1348_v44  ;;  %vm1357_vm1 = vmor %vm1355_vm14, %vm1356_vm13  ;;  %vm1365_vm3 = vweird.f32 %v1348_v44 }
0x1615   :  { %v1351_v46 = vmul.f32 %v2114_v42, %v1350_v45 }
0x1617   :  { %v1352_v47 = vmul.f32 0.5, %v1351_v46 }
0x1619   :  { %v1353_v7 = vsub.f32 1.5, %v1352_v47 }
0x161a   :  { %v2116_v22 = vpop.eup %2115 }
0x161b   :  { %v1360_v51 = vmul.f32 %v2116_v22, %v1348_v44  ;;  %v1354_v43 = vmul.f32 %v2114_v42, %v1353_v7  ;;  %vm1366_vm2 = vweird.f32 %v2116_v22 }
0x161c   :  { %vm1367_vm4 = vmor %vm1365_vm3, %vm1366_vm2 }
0x161d   :  { %v1361_v52 = vmul.f32 %v2116_v22, %v1360_v51  ;;  %v1358_v55 = vsel %vm1357_vm1, %v2114_v42, %v1354_v43 }
0x161e   :  { %v1369_v58 = vmul.f32 %v1358_v55, %v1335_v27 }
0x161f   :  { %v1362_v54 = vmul.f32 0.5, %v1361_v52 }
0x1620   :  { %v1375_v62 = vmul.f32 %v1373_v53, %v1369_v58 }
0x1621   :  { %v1363_v56 = vsub.f32 1.5, %v1362_v54 }
0x1622   :  { %v2553_v2 = vadd.f32 %v1378_v0, %v1375_v62 }
0x1623   :  { %v1364_v59 = vmul.f32 %v2116_v22, %v1363_v56 }
0x1625   :  { %v1368_v60 = vsel %vm1367_vm4, %v2116_v22, %v1364_v59  ;;  %v2001_v59 = vld [vmem:[%s2654_s3 + $0x30] sm:$0xff] }
0x1626   :  { %v1370_v61 = vmul.f32 %v1368_v60, %v1336_v33 }
0x1628   :  { %v1376_v1 = vmul.f32 %v1373_v53, %v1370_v61 }
0x162a   :  { %v2555_v4 = vadd.f32 %v1378_v0, %v1376_v1 }
0x162c   :  { %v1387_v5 = vpack.c.bf16 %v2555_v4, %v2553_v2 }
0x162e   :  { %1957 = vmatmul.msk.bf16.vlgmr.msra.gmra.mxu3 %vm27_vm0, %v1387_v5 }
0x16b1   :  { %v1418_v6 = vpop.f32.mrf.mxu3 }
0x16b2   :  { %v1419_v9 = vadd.f32 %v2563_v8, %v1418_v6 }
0x16b4   :  { %v1423_v14 = vpack.c.bf16 %v1419_v9, %v1419_v9 }
0x16b6   :  { %v1427_v17 = vunpack.c.l.b16 %v1423_v14 }
0x16b9   :  { %v1420_v13 = vpop.f32.mrf.mxu3 }
0x16ba   :  { %v1421_v15 = vadd.f32 %v2563_v8, %v1420_v13 }
0x16bc   :  { %v1424_v16 = vpack.c.bf16 %v1421_v15, %v1421_v15 }
0x16be   :  { %v1428_v18 = vunpack.c.l.b16 %v1424_v16 }
0x16c0   :  { %v1429_v49 = vpack.c.b16 %v1428_v18, %v1427_v17 }
0x16c2   :  { %1498 = vrot.lane.b32.xlu2 %v1429_v49, %s2175_s30  ;;  %1430 = vrot.lane.b32.xlu0 %v1429_v49, %s2174_s24 }
0x16c3   :  { %1500 = vrot.lane.b32.xlu1 %v1429_v49, %s2176_s6 }
0x171c   :  { %v1499_v50 = vpop.permute.xlu2 %1498 }
0x1734   :  { %v1431_v19 = vpop.permute.xlu0 %1430 }
0x1735   :  { %v1436_v20 = vsel %vm135_vm8, %v1431_v19, 0  ;;  %v1501_v21 = vpop.permute.xlu1 %1500 }
0x1736   :  { %v1506_v23 = vsel %vm135_vm8, %v1501_v21, 0  ;;  %1445 = vmatpush.bf16.xpose.msrb.mxu2 %v1436_v20 }
0x1737   :  { %1515 = vmatpush.bf16.xpose.msrb.mxu1 %v1506_v23 }
0x173d   :  { %1958 = vmatmul.msk.bf16.vlgmr.msrb.gmra.mxu2 %vm135_vm8, %v1429_v49 }
0x173e   :  { %1962 = vmatmul.msk.bf16.vlgmr.msrb.gmra.mxu1 %vm135_vm8, %v1499_v50 }
0x17bb   :  { %v1517_v24 = vpop.f32.mrf.mxu1 }
0x17bc   :  { %v1518_v25 = vadd.f32 %v2471_v48, %v1517_v24 }
0x17be   :  { %v1522_v26 = vsel %vm135_vm8, %v1518_v25, -inf }
0x17bf   :  { %1523 = vmax.xlane.f32.xlu0 %v1522_v26 }
0x17c0   :  { %v1447_v27 = vpop.f32.mrf.mxu2 }
0x17c1   :  { %v1448_v28 = vadd.f32 %v2471_v48, %v1447_v27 }
0x17c3   :  { %v1519_v29 = vpop.f32.mrf.mxu1  ;;  %v1452_v63 = vsel %vm135_vm8, %v1448_v28, -inf }
0x17c4   :  { %v1520_v30 = vadd.f32 %v2480_v57, %v1519_v29  ;;  %1453 = vmax.xlane.f32.xlu2 %v1452_v63 }
0x17c6   :  { %v1525_v33 = vsel %vm135_vm8, %v1520_v30, -inf }
0x17c7   :  { %1526 = vmax.xlane.f32.xlu1 %v1525_v33 }
0x17c8   :  { %v1449_v34 = vpop.f32.mrf.mxu2 }
0x17c9   :  { %v1450_v35 = vadd.f32 %v2480_v57, %v1449_v34 }
0x17cb   :  { %v1455_v37 = vsel %vm135_vm8, %v1450_v35, -inf }
0x17cc   :  { %1456 = vmax.xlane.f32.xlu0 %v1455_v37 }
0x17e0   :  { %1545 = vrot.lane.b32.xlu0 %v1429_v49, %s2178_s12 }
0x17e8   :  { %1591 = vrot.lane.b32.xlu0 %v2001_v59, %s2179_s13 }
0x17f0   :  { %1612 = vrot.lane.b32.xlu0 %v2563_v8, %s2179_s13 }
0x1832   :  { %v1524_v38 = vpop.xlane.xlu0 %1523 }
0x1833   :  { %v1528_v39 = vsub.f32 %v1518_v25, %v1524_v38 }
0x1835   :  { %v1530_v48 = vmul.f32 1.442695, %v1528_v39  ;;  %v2025_v39 = vld [vmem:[%s2653_s2 + $0xa] ss:$0 sm:$0xff] }
0x1837   :  { %2117 = vpow2.f32 %v1530_v48  ;;  %v1454_v3 = vpop.xlane.xlu2 %1453 }
0x1838   :  { %v1458_v40 = vsub.f32 %v1448_v28, %v1454_v3 }
0x183a   :  { %v1460_v41 = vmul.f32 1.442695, %v1458_v40  ;;  %v1527_v42 = vpop.xlane.xlu1 %1526 }
0x183b   :  { %v1529_v44 = vsub.f32 %v1520_v30, %v1527_v42 }
0x183c   :  { %2119 = vpow2.f32 %v1460_v41 }
0x183d   :  { %v2118_v45 = vpop.eup %2117  ;;  %v1532_v46 = vmul.f32 1.442695, %v1529_v44 }
0x183e   :  { %v1534_v47 = vsel %vm135_vm8, %v2118_v45, 0.0 }
0x183f   :  { %2121 = vpow2.f32 %v1532_v46  ;;  %1535 = vadd.xlane.f32.xlu1 %v1534_v47  ;;  %v1457_v57 = vpop.xlane.xlu0 %1456 }
0x1840   :  { %v1459_v7 = vsub.f32 %v1450_v35, %v1457_v57 }
0x1842   :  { %v1462_v22 = vmul.f32 1.442695, %v1459_v7  ;;  %v2120_v51 = vpop.eup %2119  ;;  %v2003_v7 = vld [vmem:[%s2655_s4 + $0x38] sm:$0xff] }
0x1843   :  { %v1464_v54 = vsel %vm135_vm8, %v2120_v51, 0.0  ;;  %1702 = vmatpush.bf16.msra.mxu1 %v2003_v7 }
0x1844   :  { %2123 = vpow2.f32 %v1462_v22 }
0x1845   :  { %v2122_v43 = vpop.eup %2121 }
0x1846   :  { %v1537_v52 = vsel %vm135_vm8, %v2122_v43, 0.0 }
0x1847   :  { %1538 = vadd.xlane.f32.xlu2 %v1537_v52  ;;  %1465 = vadd.xlane.f32.xlu1 %v1464_v54  ;;  %v2002_v52 = vld [vmem:[%s2655_s4 + $0x30] sm:$0xff] }
0x1848   :  { %1703 = vmatpush.bf16.msra.mxu1 %v2002_v52 }
0x184a   :  { %v2124_v55 = vpop.eup %2123 }
0x184b   :  { %v1467_v56 = vsel %vm135_vm8, %v2124_v55, 0.0 }
0x184f   :  { %1468 = vadd.xlane.f32.xlu2 %v1467_v56 }
0x1852   :  { %v1546_v58 = vpop.permute.xlu0 %1545 }
0x1853   :  { %1558 = vmatpush.bf16.msrb.mxu3 %v1546_v58 }
0x185a   :  { %v1592_v18 = vpop.permute.xlu0 %1591 }
0x1860   :  { %1475 = vrot.lane.b32.xlu1 %v1429_v49, %s2177_s11 }
0x1862   :  { %v1613_v26 = vpop.permute.xlu0 %1612 }
0x1867   :  { %1566 = vrot.lane.b32.xlu2 %v2545_v36, %s2179_s13 }
0x18b2   :  { %v1536_v53 = vpop.xlane.xlu1 %1535 }
0x18b3   :  { %2125 = vrcp.f32 %v1536_v53 }
0x18b9   :  { %v2126_v61 = vpop.eup %2125 }
0x18ba   :  { %v1539_v60 = vpop.xlane.xlu2 %1538  ;;  %v1542_v0 = vmul.f32 %v2126_v61, %v2118_v45  ;;  %v1466_v36 = vpop.xlane.xlu1 %1465 }
0x18bb   :  { %2127 = vrcp.f32 %v1539_v60 }
0x18c1   :  { %v2128_v62 = vpop.eup %2127 }
0x18c2   :  { %v1543_v1 = vmul.f32 %v2128_v62, %v2122_v43  ;;  %v1469_v6 = vpop.xlane.xlu2 %1468 }
0x18c3   :  { %2129 = vrcp.f32 %v1469_v6 }
0x18c4   :  { %v1544_v5 = vpack.c.bf16 %v1543_v1, %v1542_v0  ;;  %2131 = vrcp.f32 %v1466_v36 }
0x18c6   :  { %1963 = vmatmul.msk.bf16.vlgmr.msrb.gmra.mxu3 %vm135_vm8, %v1544_v5 }
0x18c9   :  { %v2130_v9 = vpop.eup %2129 }
0x18ca   :  { %v2132_v13 = vpop.eup %2131  ;;  %v1473_v14 = vmul.f32 %v2130_v9, %v2124_v55  ;;  %v1567_v8 = vpop.permute.xlu2 %1566 }
0x18cb   :  { %v1472_v15 = vmul.f32 %v2132_v13, %v2120_v51  ;;  %1579 = vmatpush.bf16.msra.mxu2 %v1567_v8 }
0x18cd   :  { %v1474_v17 = vpack.c.bf16 %v1473_v14, %v1472_v15 }
0x18d2   :  { %v1476_v16 = vpop.permute.xlu1 %1475 }
0x18d3   :  { %1488 = vmatpush.bf16.msrb.mxu0 %v1476_v16 }
0x18d6   :  { %1959 = vmatmul.msk.bf16.vlgmr.msrb.gmra.mxu0 %vm135_vm8, %v1474_v17 }
0x18d7   :  { %1604 = vmatpush.bf16.msra.mxu0 %v1592_v18 }
0x1949   :  { %v1560_v49 = vpop.f32.mrf.mxu3 }
0x1951   :  { %v1562_v19 = vpop.f32.mrf.mxu3 }
0x1952   :  { %v1565_v20 = vpack.c.bf16 %v1562_v19, %v1560_v49 }
0x1953   :  { %v1490_v21 = vpop.f32.mrf.mxu0 }
0x1954   :  { %1964 = vmatmul.msk.bf16.vlgmr.msra.gmra.mxu2 %vm135_vm8, %v1565_v20 }
0x195b   :  { %v1492_v23 = vpop.f32.mrf.mxu0 }
0x195c   :  { %v1495_v50 = vpack.c.bf16 %v1492_v23, %v1490_v21 }
0x195e   :  { %1969 = vmatmul.msk.bf16.vlgmr.msra.gmra.mxu0 %vm135_vm8, %v1495_v50 }
0x19d7   :  { %v1581_v24 = vpop.f32.mrf.mxu2 }
0x19db   :  { %v1606_v25 = vpop.f32.mrf.mxu0 }
0x19dc   :  { %v1607_v27 = vadd.f32 %v1606_v25, %v1581_v24 }
0x19de   :  { %v1615_v28 = vadd.f32 %v1613_v26, %v1607_v27 }
0x19df   :  { %v1583_v30 = vpop.f32.mrf.mxu2 }
0x19e0   :  { %v1617_v29 = vadd.f32 %v1615_v28, %v2553_v2 }
0x19e2   :  { %v1619_v63 = vsel %vm27_vm0, %v1617_v29, 0.0 }
0x19e3   :  { %v1608_v33 = vpop.f32.mrf.mxu0  ;;  %1620 = vadd.xlane.f32.xlu1 %v1619_v63 }
0x19e4   :  { %v1609_v34 = vadd.f32 %v1608_v33, %v1583_v30 }
0x19e6   :  { %v1616_v35 = vadd.f32 %v1613_v26, %v1609_v34 }
0x19e8   :  { %v1618_v37 = vadd.f32 %v1616_v35, %v2555_v4 }
0x19ea   :  { %v1622_v38 = vsel %vm27_vm0, %v1618_v37, 0.0 }
0x19eb   :  { %1623 = vadd.xlane.f32.xlu0 %v1622_v38 }
0x19ff   :  { %1667 = vrot.lane.b32.xlu0 %v2025_v39, %s2174_s24 }
0x1a07   :  { %1730 = vrot.lane.b32.xlu0 %v2002_v52, %s2177_s11 }
0x1a56   :  { %v1621_v48 = vpop.xlane.xlu1 %1620 }
0x1a57   :  { %v1625_v3 = vmul.f32 %v1621_v48, %v2225_v11 }
0x1a59   :  { %v1627_v40 = vsub.f32 %v1617_v29, %v1625_v3 }
0x1a5b   :  { %v1629_v41 = vmul.f32 %v1627_v40, %v1627_v40 }
0x1a5d   :  { %v1631_v42 = vsel %vm27_vm0, %v1629_v41, 0.0 }
0x1a5e   :  { %v1624_v44 = vpop.xlane.xlu0 %1623  ;;  %1632 = vadd.xlane.f32.xlu2 %v1631_v42 }
0x1a5f   :  { %v1626_v45 = vmul.f32 %v1624_v44, %v2225_v11 }
0x1a61   :  { %v1628_v46 = vsub.f32 %v1618_v37, %v1626_v45 }
0x1a63   :  { %v1630_v47 = vmul.f32 %v1628_v46, %v1628_v46 }
0x1a65   :  { %v1634_v57 = vsel %vm27_vm0, %v1630_v47, 0.0 }
0x1a66   :  { %1635 = vadd.xlane.f32.xlu1 %v1634_v57 }
0x1a71   :  { %v1668_v8 = vpop.permute.xlu0 %1667 }
0x1a76   :  { %1690 = vrot.lane.b32.xlu2 %v2025_v39, %s2177_s11 }
0x1a79   :  { %v1731_v50 = vpop.permute.xlu0 %1730 }
0x1a7a   :  { %v1738_v24 = vsel %vm437_vm15, %v1731_v50, 0 }
0x1a7f   :  { %1732 = vrot.lane.b32.xlu1 %v2003_v7, %s2177_s11 }
0x1ad1   :  { %v1633_v22 = vpop.xlane.xlu2 %1632 }
0x1ad2   :  { %v1637_v51 = vmul.f32 %v1633_v22, %v2225_v11  ;;  %v2026_v22 = vld [vmem:[%s2653_s2 + $0xb] ss:$0 sm:$0xff]  ;;  %s2180_s2 = smov [#allocation2]  }
0x1ad4   :  { %v1639_v43 = vadd.f32 1e-07, %v1637_v51 }
0x1ad6   :  { %2133 = vrsqrt.f32 %v1639_v43  ;;  %vm1647_vm5 = vweird.f32 %v1639_v43 }
0x1ad9   :  { %v1636_v54 = vpop.xlane.xlu1 %1635  ;;  %v1691_v25 = vpop.permute.xlu2 %1690 }
0x1ada   :  { %v1638_v55 = vmul.f32 %v1636_v54, %v2225_v11 }
0x1adc   :  { %v2134_v56 = vpop.eup %2133  ;;  %v1640_v58 = vadd.f32 1e-07, %v1638_v55 }
0x1add   :  { %v1642_v53 = vmul.f32 %v2134_v56, %v1639_v43  ;;  %vm1648_vm8 = vweird.f32 %v2134_v56 }
0x1ade   :  { %2135 = vrsqrt.f32 %v1640_v58  ;;  %vm1649_vm6 = vmor %vm1647_vm5, %vm1648_vm8  ;;  %vm1657_vm9 = vweird.f32 %v1640_v58 }
0x1adf   :  { %v1643_v59 = vmul.f32 %v2134_v56, %v1642_v53 }
0x1ae1   :  { %v1644_v60 = vmul.f32 0.5, %v1643_v59 }
0x1ae3   :  { %v1645_v61 = vsub.f32 1.5, %v1644_v60 }
0x1ae4   :  { %v2136_v62 = vpop.eup %2135 }
0x1ae5   :  { %v1646_v0 = vmul.f32 %v2134_v56, %v1645_v61  ;;  %v1652_v1 = vmul.f32 %v2136_v62, %v1640_v58  ;;  %vm1658_vm7 = vweird.f32 %v2136_v62 }
0x1ae6   :  { %vm1659_vm10 = vmor %vm1657_vm9, %vm1658_vm7 }
0x1ae7   :  { %v1653_v5 = vmul.f32 %v2136_v62, %v1652_v1  ;;  %v1650_v36 = vsel %vm1649_vm6, %v2134_v56, %v1646_v0 }
0x1ae8   :  { %v1661_v13 = vmul.f32 %v1650_v36, %v1627_v40 }
0x1ae9   :  { %v1654_v6 = vmul.f32 0.5, %v1653_v5 }
0x1aea   :  { %v1664_v17 = vmul.f32 %v2025_v39, %v1661_v13 }
0x1aeb   :  { %v1655_v9 = vsub.f32 1.5, %v1654_v6 }
0x1aec   :  { %v1670_v49 = vadd.f32 %v1668_v8, %v1664_v17 }
0x1aed   :  { %v1656_v14 = vmul.f32 %v2136_v62, %v1655_v9 }
0x1aef   :  { %v1660_v15 = vsel %vm1659_vm10, %v2136_v62, %v1656_v14 }
0x1af0   :  { %v1662_v16 = vmul.f32 %v1660_v15, %v1628_v46 }
0x1af1   :  { %v1733_v21 = vpop.permute.xlu1 %1732 }
0x1af2   :  { %v1665_v18 = vmul.f32 %v2025_v39, %v1662_v16  ;;  %v1741_v23 = vsel %vm437_vm15, %v1733_v21, 0 }
0x1af3   :  { %1749 = vmatpush.bf16.xpose.msra.mxu3 %v1741_v23 }
0x1af4   :  { %v1671_v19 = vadd.f32 %v1668_v8, %v1665_v18 }
0x1af6   :  { %v1672_v20 = vpack.c.bf16 %v1671_v19, %v1670_v49 }
0x1af8   :  { %1982 = vmatmul.msk.bf16.vlgmr.msra.gmra.mxu1 %vm27_vm0, %v1672_v20 }
0x1afb   :  { %1750 = vmatpush.bf16.xpose.msra.mxu3 %v1738_v24 }
0x1b75   :  { %v1705_v26 = vpop.f32.mrf.mxu1 }
0x1b76   :  { %v1706_v27 = vadd.f32 %v1705_v26, %v1691_v25 }
0x1b78   :  { %v1710_v28 = vmul.f32 %v1706_v27, %v1706_v27 }
0x1b7a   :  { %v1712_v29 = vmul.f32 %v1710_v28, %v1706_v27 }
0x1b7c   :  { %v1714_v63 = vmul.f32 0.044715, %v1712_v29 }
0x1b7d   :  { %v1707_v30 = vpop.f32.mrf.mxu1 }
0x1b7e   :  { %v1716_v33 = vadd.f32 %v1714_v63, %v1706_v27  ;;  %v1708_v34 = vadd.f32 %v1707_v30, %v1691_v25 }
0x1b80   :  { %v1718_v35 = vmul.f32 0.7978846, %v1716_v33  ;;  %v1711_v37 = vmul.f32 %v1708_v34, %v1708_v34 }
0x1b82   :  { %v1713_v38 = vmul.f32 %v1711_v37, %v1708_v34  ;;  %2137 = vtanh.f32 %v1718_v35 }
0x1b84   :  { %v1715_v39 = vmul.f32 0.044715, %v1713_v38 }
0x1b86   :  { %v1717_v48 = vadd.f32 %v1715_v39, %v1708_v34 }
0x1b88   :  { %v1719_v3 = vmul.f32 0.7978846, %v1717_v48  ;;  %v2138_v40 = vpop.eup %2137 }
0x1b89   :  { %v1722_v41 = vadd.f32 1.0, %v2138_v40  ;;  %v951_v40 = vadd.f32 %v2449_v32, %v2358_v12 }
0x1b8a   :  { %2139 = vtanh.f32 %v1719_v3 }
0x1b8b   :  { %v1724_v44 = vmul.f32 0.5, %v1722_v41 }
0x1b8d   :  { %v1726_v47 = vmul.f32 %v1724_v44, %v1706_v27 }
0x1b90   :  { %v2140_v42 = vpop.eup %2139 }
0x1b91   :  { %v1723_v45 = vadd.f32 1.0, %v2140_v42 }
0x1b93   :  { %v1725_v46 = vmul.f32 0.5, %v1723_v45 }
0x1b95   :  { %v1727_v57 = vmul.f32 %v1725_v46, %v1708_v34 }
0x1b97   :  { %v1728_v7 = vpack.c.bf16 %v1727_v57, %v1726_v47 }
0x1b99   :  { %1983 = vmatmul.msk.bf16.vlgmr.msra.gmra.mxu3 %vm437_vm15, %v1728_v7 }
0x1c1c   :  { %v1752_v51 = vpop.f32.mrf.mxu3 }
0x1c1d   :  { %v1753_v43 = vadd.f32 %v2026_v22, %v1752_v51 }
0x1c1f   :  { %v1757_v52 = vadd.f32 %v1753_v43, %v1670_v49 }
0x1c21   :  { %v1759_v54 = vsel %vm27_vm0, %v1757_v52, 0.0 }
0x1c22   :  { %1760 = vadd.xlane.f32.xlu2 %v1759_v54 }
0x1c24   :  { %v1754_v55 = vpop.f32.mrf.mxu3 }
0x1c25   :  { %v1755_v56 = vadd.f32 %v2026_v22, %v1754_v55 }
0x1c27   :  { %v1758_v58 = vadd.f32 %v1755_v56, %v1671_v19 }
0x1c29   :  { %v1762_v53 = vsel %vm27_vm0, %v1758_v58, 0.0 }
0x1c2a   :  { %1763 = vadd.xlane.f32.xlu0 %v1762_v53 }
0x1c3e   :  { %1804 = vrot.lane.b32.xlu0 %v2026_v22, %s2174_s24  ;;  %s1824_s24 = sshll.u32 %s2180_s2, 4  ;;  %s1825_s24 = int_to_ptr.vmem [resolvable:$true] %s1824_s24 }
0x1c95   :  { %v1761_v59 = vpop.xlane.xlu2 %1760 }
0x1c96   :  { %v1765_v60 = vmul.f32 %v1761_v59, %v2225_v11 }
0x1c98   :  { %v1767_v61 = vsub.f32 %v1757_v52, %v1765_v60 }
0x1c9a   :  { %v1769_v62 = vmul.f32 %v1767_v61, %v1767_v61 }
0x1c9c   :  { %v1771_v0 = vsel %vm27_vm0, %v1769_v62, 0.0 }
0x1c9d   :  { %v1764_v1 = vpop.xlane.xlu0 %1763  ;;  %1772 = vadd.xlane.f32.xlu1 %v1771_v0 }
0x1c9e   :  { %v1766_v5 = vmul.f32 %v1764_v1, %v2225_v11 }
0x1ca0   :  { %v1768_v6 = vsub.f32 %v1758_v58, %v1766_v5 }
0x1ca2   :  { %v1770_v36 = vmul.f32 %v1768_v6, %v1768_v6 }
0x1ca4   :  { %v1774_v9 = vsel %vm27_vm0, %v1770_v36, 0.0 }
0x1ca5   :  { %1775 = vadd.xlane.f32.xlu2 %v1774_v9 }
0x1cb0   :  { %v1805_v26 = vpop.permute.xlu0 %1804 }
0x1cb6   :  { %1809 = vrot.lane.b32.xlu1 %v2026_v22, %s2177_s11 }
0x1d10   :  { %v1773_v13 = vpop.xlane.xlu1 %1772 }
0x1d11   :  { %v1777_v14 = vmul.f32 %v1773_v13, %v2225_v11 }
0x1d13   :  { %v1779_v15 = vadd.f32 1e-07, %v1777_v14 }
0x1d15   :  { %2141 = vrsqrt.f32 %v1779_v15  ;;  %vm1787_vm11 = vweird.f32 %v1779_v15 }
0x1d18   :  { %v1776_v16 = vpop.xlane.xlu2 %1775 }
0x1d19   :  { %v1778_v17 = vmul.f32 %v1776_v16, %v2225_v11  ;;  %v950_v11 = vadd.f32 %v2447_v31, %v2356_v10  ;;  %v1383_v10 = vadd.f32 %v2555_v4, %v951_v40 }
0x1d1b   :  { %v2142_v8 = vpop.eup %2141  ;;  %v1780_v18 = vadd.f32 1e-07, %v1778_v17  ;;  %v1382_v34 = vadd.f32 %v2553_v2, %v950_v11 }
0x1d1c   :  { %v1782_v49 = vmul.f32 %v2142_v8, %v1779_v15  ;;  %vm1788_vm15 = vweird.f32 %v2142_v8 }
0x1d1d   :  { %2143 = vrsqrt.f32 %v1780_v18  ;;  %vm1789_vm12 = vmor %vm1787_vm11, %vm1788_vm15  ;;  %vm1797_vm14 = vweird.f32 %v1780_v18 }
0x1d1e   :  { %v1783_v19 = vmul.f32 %v2142_v8, %v1782_v49 }
0x1d20   :  { %v1784_v20 = vmul.f32 0.5, %v1783_v19 }
0x1d22   :  { %v1785_v21 = vsub.f32 1.5, %v1784_v20 }
0x1d23   :  { %v2144_v23 = vpop.eup %2143 }
0x1d24   :  { %v1792_v50 = vmul.f32 %v2144_v23, %v1780_v18  ;;  %v1786_v24 = vmul.f32 %v2142_v8, %v1785_v21  ;;  %vm1798_vm13 = vweird.f32 %v2144_v23 }
0x1d25   :  { %vm1799_vm1 = vmor %vm1797_vm14, %vm1798_vm13 }
0x1d26   :  { %v1793_v25 = vmul.f32 %v2144_v23, %v1792_v50  ;;  %v1790_v27 = vsel %vm1789_vm12, %v2142_v8, %v1786_v24 }
0x1d27   :  { %v1801_v28 = vmul.f32 %v1790_v27, %v1767_v61 }
0x1d28   :  { %v1794_v29 = vmul.f32 0.5, %v1793_v25  ;;  %v1810_v63 = vpop.permute.xlu1 %1809 }
0x1d29   :  { %v1807_v30 = vmul.f32 %v1805_v26, %v1801_v28 }
0x1d2a   :  { %v1795_v33 = vsub.f32 1.5, %v1794_v29 }
0x1d2b   :  { %v1812_v35 = vadd.f32 %v1810_v63, %v1807_v30 }
0x1d2c   :  { %v1796_v37 = vmul.f32 %v2144_v23, %v1795_v33 }
0x1d2d   :  { %v1814_v38 = vadd.f32 %v1812_v35, %v1382_v34 }
0x1d2e   :  { %v1800_v39 = vsel %vm1799_vm1, %v2144_v23, %v1796_v37 }
0x1d2f   :  { %v1802_v48 = vmul.f32 %v1800_v39, %v1768_v6  ;;  %v1816_v3 = vmul.f32 0.25, %v1814_v38 }
0x1d31   :  { %v1808_v41 = vmul.f32 %v1805_v26, %v1802_v48  ;;  %1818 = vst.msk [vmem:[#allocation2] sm:$0xff] %vm27_vm0, %v1816_v3 }
0x1d33   :  { %v1813_v31 = vadd.f32 %v1810_v63, %v1808_v41 }
0x1d35   :  { %v1815_v2 = vadd.f32 %v1813_v31, %v1383_v10 }
0x1d37   :  { %v1817_v42 = vmul.f32 0.25, %v1815_v2 }
0x1d39   :  { %1819 = vst.msk [vmem:[#allocation2 + $0x8] sm:$0xff] %vm27_vm0, %v1817_v42 }
0x1d3a   :  { %1832 = dma.vmem_to_hbm [thread:$0]  %s1825_s24, 256, %s1827_s1, [#allocation3], %s2181_s7, %s2181_s7, %s2182_s8  }
0x1d3b   :  { %2171 = dma.done.wait [#allocation3], 256  }
0x1d3c   :  { %2172 = vsyncadd [#allocation3], 4294967040 }
0x1d3d   :  { %1837 = vsyncpa [#allocation3], 1 }

</bundles_post_ra>
